<compile_context>
chip_gen: v7x
topology: tpu7x:2x2x1
jax: 0.10.0
libtpu: 0.0.40
codegen_flags: <defaults>
</compile_context>

<pallas_src>
import functools

import jax
import jax.numpy as jnp
import numpy as np
from jax.experimental import pallas as pl
from jax.experimental.pallas import tpu as pltpu

# ----------------------------------------------------------------------------
# Config (torch: mlp_hidden=2048, gru_io=7770=3*2590, gru_hidden=2048,
#         gru_layers=8, n_nodes=2590, graph_feat=8, graph_blocks=16)
# Toy config picked lane-dense: hidden dims = 128, n_nodes = 128 -> gru_io = 384.
# ----------------------------------------------------------------------------
CFG = dict(
    batch=2,
    seq=4,
    dim_feature_in=8,
    mlp_hidden=128,
    n_nodes=128,
    gru_hidden=128,
    gru_layers=2,
    graph_feat=8,
    graph_blocks=2,
    slope=0.01,            # nn.LeakyReLU default negative_slope
)
CFG["gru_io"] = 3 * CFG["n_nodes"]     # mlp output == GRU input == GRU fc output

DTYPE = jnp.float32        # activations / accumulators / state / biases
WDTYPE = jnp.bfloat16      # weights & MXU operands

_SUBLANE = 8
_ROW_TILE = 8              # row-panel tile for the MLP kernel


def _vmem_limit_bytes():
    """Generation-dependent scoped-VMEM limit (review item)."""
    try:
        kind = jax.devices()[0].device_kind.lower()
    except Exception:
        kind = ""
    if "v7" in kind:
        return 48 * 1024 * 1024            # 64 MiB/TC physical on v7x
    if any(k in kind for k in ("v4", "v5", "v6")):
        return 100 * 1024 * 1024           # 128 MiB physical
    return None                            # unknown: keep the compiler default


def _cparams(*sem):
    kw = dict(dimension_semantics=sem)
    lim = _vmem_limit_bytes()
    if lim is not None:
        kw["vmem_limit_bytes"] = lim
    return pltpu.CompilerParams(**kw)


def _leaky(y, slope):
    return jnp.where(y >= 0.0, y, slope * y)


# ----------------------------------------------------------------------------
# Kernel 1: fused 3-layer MLP + GRU layer-0 input projection.
# Grid over independent row panels ("parallel" -> both TCs on v7x); all weights
# VMEM-resident via constant index maps.
# ----------------------------------------------------------------------------
def _mlp_gi0_kernel(x_ref, w1_ref, b1_ref, w2_ref, b2_ref, w3_ref, b3_ref,
                    wih0_ref, bih0_ref, o_ref, *, slope):
    h = jnp.dot(x_ref[...].astype(WDTYPE), w1_ref[...],
                preferred_element_type=jnp.float32) + b1_ref[...]
    h = _leaky(h, slope)
    h = jnp.dot(h.astype(WDTYPE), w2_ref[...],
                preferred_element_type=jnp.float32) + b2_ref[...]
    h = _leaky(h, slope)
    h = jnp.dot(h.astype(WDTYPE), w3_ref[...],
                preferred_element_type=jnp.float32) + b3_ref[...]
    # fc3 output feeds the GRU directly -> fuse layer-0 input projection (both linear)
    gi = jnp.dot(h.astype(WDTYPE), wih0_ref[...],
                 preferred_element_type=jnp.float32) + bih0_ref[...]
    o_ref[...] = gi.astype(o_ref.dtype)


def fused_mlp_gi0(x, w1, b1, w2, b2, w3, b3, wih0, bih0, slope):
    M, D = x.shape
    H1, H2, N3 = w1.shape[1], w2.shape[1], w3.shape[1]
    G = wih0.shape[1]
    rt = _ROW_TILE
    assert M % rt == 0
    c2 = lambda i: (0, 0)
    return pl.pallas_call(
        functools.partial(_mlp_gi0_kernel, slope=slope),
        out_shape=jax.ShapeDtypeStruct((M, G), DTYPE),
        grid=(M // rt,),
        in_specs=[
            pl.BlockSpec((rt, D), lambda i: (i, 0)),
            pl.BlockSpec((D, H1), c2), pl.BlockSpec((1, H1), c2),
            pl.BlockSpec((H1, H2), c2), pl.BlockSpec((1, H2), c2),
            pl.BlockSpec((H2, N3), c2), pl.BlockSpec((1, N3), c2),
            pl.BlockSpec((N3, G), c2), pl.BlockSpec((1, G), c2),
        ],
        out_specs=pl.BlockSpec((rt, G), lambda i: (i, 0)),
        compiler_params=_cparams("parallel"),
    )(x, w1, b1.reshape(1, -1), w2, b2.reshape(1, -1),
      w3, b3.reshape(1, -1), wih0, bih0)


# ----------------------------------------------------------------------------
# Kernel 2: the whole GRU stack.  grid=(T,), "arbitrary"; per step every layer
# advances once (layer>=1 input projection computed in-kernel from the previous
# layer's fresh hidden).  PyTorch gate order (r, z, n); h0 = 0; fc head applied
# only at t == T-1 (only out[:, -1, :] is needed).
# ----------------------------------------------------------------------------
def _gru_step(gi, h, whh, bhh, H):
    gh = jnp.dot(h.astype(whh.dtype), whh,
                 preferred_element_type=jnp.float32) + bhh
    r = jax.nn.sigmoid(gi[:, 0:H] + gh[:, 0:H])
    z = jax.nn.sigmoid(gi[:, H:2 * H] + gh[:, H:2 * H])
    n = jnp.tanh(gi[:, 2 * H:3 * H] + r * gh[:, 2 * H:3 * H])
    return (1.0 - z) * n + z * h


def _gru_stack_kernel(gi0_ref, wihr_ref, bihr_ref, whh_ref, bhh_ref,
                      fcw_ref, fcb_ref, o_ref, h_sc, *, L, H):
    t = pl.program_id(0)

    @pl.when(t == 0)
    def _():
        h_sc[...] = jnp.zeros_like(h_sc)

    x = _gru_step(gi0_ref[0], h_sc[0], whh_ref[0], bhh_ref[0], H)
    h_sc[0] = x
    for l in range(1, L):                       # static layer loop
        wih = wihr_ref[l - 1]
        gi = jnp.dot(x.astype(wih.dtype), wih,
                     preferred_element_type=jnp.float32) + bihr_ref[l - 1]
        x = _gru_step(gi, h_sc[l], whh_ref[l], bhh_ref[l], H)
        h_sc[l] = x

    @pl.when(t == pl.num_programs(0) - 1)
    def _():
        y = jnp.dot(x.astype(WDTYPE), fcw_ref[...],
                    preferred_element_type=jnp.float32) + fcb_ref[...]
        o_ref[...] = y.astype(o_ref.dtype)


def gru_stack(gi0_seq, wih_rest, bih_rest, whh_all, bhh_all, fc_w, fc_b):
    T, B, G = gi0_seq.shape
    L = whh_all.shape[0]
    Lr = wih_rest.shape[0]
    H = G // 3
    O = fc_w.shape[1]
    c2 = lambda t: (0, 0)
    c3 = lambda t: (0, 0, 0)
    return pl.pallas_call(
        functools.partial(_gru_stack_kernel, L=L, H=H),
        out_shape=jax.ShapeDtypeStruct((B, O), DTYPE),
        grid=(T,),
        in_specs=[
            pl.BlockSpec((1, B, G), lambda t: (t, 0, 0)),   # per-step gi (layer 0)
            pl.BlockSpec((Lr, H, G), c3),                   # W_ih layers >= 1 (resident)
            pl.BlockSpec((Lr, 1, G), c3),
            pl.BlockSpec((L, H, G), c3),                    # W_hh all layers (resident)
            pl.BlockSpec((L, 1, G), c3),
            pl.BlockSpec((H, O), c2),                       # fc head (resident)
            pl.BlockSpec((1, O), c2),
        ],
        out_specs=pl.BlockSpec((B, O), lambda t: (0, 0)),   # written at t == T-1
        scratch_shapes=[pltpu.VMEM((L, B, H), jnp.float32)],
        compiler_params=_cparams("arbitrary"),
    )(gi0_seq, wih_rest, bih_rest, whh_all, bhh_all, fc_w, fc_b.reshape(1, -1))


# ----------------------------------------------------------------------------
# Kernel 3: whole GraphResNet.  grid=(blocks,), "arbitrary".
# State X is (N, B*F) with the batch packed into the lane axis, held in VMEM;
# per block: X <- tanh(A @ (W @ X)) + X  (node-mixing Linear, bias=False, then
# normalized-adjacency add-aggregation, matching the torch GCNConv exactly).
# graph_in / graph_out linears are fused into the first / last grid step via
# block-diagonal (kron) weights.  Per-block W is streamed (double-buffered).
# ----------------------------------------------------------------------------
def _graph_stack_kernel(gin_ref, a_ref, w_ref, win_ref, bin_ref,
                        wout_ref, bout_ref, o_ref, x_sc, *, slope):
    blk = pl.program_id(0)

    @pl.when(blk == 0)
    def _():
        x0 = jnp.dot(gin_ref[...].astype(WDTYPE), win_ref[...],
                     preferred_element_type=jnp.float32) + bin_ref[...]
        x_sc[...] = _leaky(x0, slope)

    a = a_ref[...]
    w = w_ref[0]
    x = x_sc[...]
    xl = jnp.dot(w, x.astype(WDTYPE), preferred_element_type=jnp.float32)
    agg = jnp.dot(a, xl.astype(WDTYPE), preferred_element_type=jnp.float32)
    x_sc[...] = jnp.tanh(agg) + x

    @pl.when(blk == pl.num_programs(0) - 1)
    def _():
        y = jnp.dot(x_sc[...].astype(WDTYPE), wout_ref[...],
                    preferred_element_type=jnp.float32) + bout_ref[...]
        o_ref[...] = y.astype(o_ref.dtype)


def graph_stack(gin, a_norm, w_stack, win_bd, bin_t, wout_bd, bout_t, slope):
    N, C3 = gin.shape            # C3 = B*3 (packed)
    CF = win_bd.shape[1]         # CF = B*F (packed)
    n_blk = w_stack.shape[0]
    c2 = lambda k: (0, 0)
    return pl.pallas_call(
        functools.partial(_graph_stack_kernel, slope=slope),
        out_shape=jax.ShapeDtypeStruct((N, C3), DTYPE),
        grid=(n_blk,),
        in_specs=[
            pl.BlockSpec((N, C3), c2),                      # packed initial node state
            pl.BlockSpec((N, N), c2),                       # A_norm resident
            pl.BlockSpec((1, N, N), lambda k: (k, 0, 0)),   # per-block W streamed
            pl.BlockSpec((C3, CF), c2),                     # block-diag graph_in W
            pl.BlockSpec((1, CF), c2),
            pl.BlockSpec((CF, C3), c2),                     # block-diag graph_out W
            pl.BlockSpec((1, C3), c2),
        ],
        out_specs=pl.BlockSpec((N, C3), c2),
        scratch_shapes=[pltpu.VMEM((N, CF), jnp.float32)],
        compiler_params=_cparams("arbitrary"),
    )(gin, a_norm, w_stack, win_bd, bin_t, wout_bd, bout_t)


# ----------------------------------------------------------------------------
# Parameters (PyTorch-style uniform init).  Matmul weights pre-transposed
# (in, out) and bf16; biases f32.
# ----------------------------------------------------------------------------
def _uniform(key, shape, lim, dtype=DTYPE):
    return jax.random.uniform(key, shape, DTYPE, -lim, lim).astype(dtype)


def init_params(key, cfg):
    D, Hm, G = cfg["dim_feature_in"], cfg["mlp_hidden"], cfg["gru_io"]
    H, L = cfg["gru_hidden"], cfg["gru_layers"]
    N, F, NB = cfg["n_nodes"], cfg["graph_feat"], cfg["graph_blocks"]
    keys = iter(jax.random.split(key, 64))
    p = {}
    # MLP
    lim = 1.0 / D ** 0.5
    p["mlp_w1"] = _uniform(next(keys), (D, Hm), lim, WDTYPE)
    p["mlp_b1"] = _uniform(next(keys), (Hm,), lim)
    lim = 1.0 / Hm ** 0.5
    p["mlp_w2"] = _uniform(next(keys), (Hm, Hm), lim, WDTYPE)
    p["mlp_b2"] = _uniform(next(keys), (Hm,), lim)
    p["mlp_w3"] = _uniform(next(keys), (Hm, G), lim, WDTYPE)
    p["mlp_b3"] = _uniform(next(keys), (G,), lim)
    # GRU (gate order r,z,n stacked along the 3H axis)
    lim = 1.0 / H ** 0.5
    p["wih0_t"] = _uniform(next(keys), (G, 3 * H), lim, WDTYPE)
    p["bih0"] = _uniform(next(keys), (1, 3 * H), lim)
    Lr = max(L - 1, 1)
    p["wih_rest"] = _uniform(next(keys), (Lr, H, 3 * H), lim, WDTYPE)
    p["bih_rest"] = _uniform(next(keys), (Lr, 1, 3 * H), lim)
    p["whh_all"] = _uniform(next(keys), (L, H, 3 * H), lim, WDTYPE)
    p["bhh_all"] = _uniform(next(keys), (L, 1, 3 * H), lim)
    p["gru_fc_w"] = _uniform(next(keys), (H, G), lim, WDTYPE)
    p["gru_fc_b"] = _uniform(next(keys), (G,), lim)
    # GraphResNet
    lim = 1.0 / 3 ** 0.5
    p["graph_in_w"] = _uniform(next(keys), (3, F), lim)       # f32; block-diag built per call
    p["graph_in_b"] = _uniform(next(keys), (F,), lim)
    lim = 1.0 / N ** 0.5
    p["gcn_w"] = _uniform(next(keys), (NB, N, N), lim, WDTYPE)  # node-mixing W (out,in)
    lim = 1.0 / F ** 0.5
    p["graph_out_w"] = _uniform(next(keys), (F, 3), lim)
    p["graph_out_b"] = _uniform(next(keys), (3,), lim)
    return p


def build_normalized_adjacency(edge_index, n):
    """Dense A with A[target, source] += deg^-1/2[src]*deg^-1/2[dst] incl. self
    loops; A @ x == PyG add-aggregation of norm * x_j (duplicate edges sum)."""
    self_loops = jnp.stack([jnp.arange(n), jnp.arange(n)])
    ei = jnp.concatenate([edge_index, self_loops], axis=1)
    row, col = ei[0], ei[1]                  # row = source (j), col = target (i)
    deg = jnp.zeros((n,), DTYPE).at[col].add(1.0)
    dinv = jnp.where(deg > 0, jax.lax.rsqrt(deg), 0.0)
    norm = dinv[row] * dinv[col]
    return jnp.zeros((n, n), DTYPE).at[col, row].add(norm)    # f32


# ----------------------------------------------------------------------------
# Fitnet forward (3 pallas_calls)
# ----------------------------------------------------------------------------
def fitnet_forward(params, x, a_norm, cfg):
    B, T, D = x.shape
    N, F, H = cfg["n_nodes"], cfg["graph_feat"], cfg["gru_hidden"]
    slope = cfg["slope"]

    # pad the batch to a sublane multiple once; slice once at exit
    Bp = max(_SUBLANE, ((B + _SUBLANE - 1) // _SUBLANE) * _SUBLANE)
    x_p = jnp.pad(x, ((0, Bp - B), (0, 0), (0, 0)))
    # single entry transpose to time-major so the GRU streams contiguous slabs
    x_tm = jnp.transpose(x_p, (1, 0, 2)).reshape(T * Bp, D)

    # (1) fused MLP + layer-0 input projection
    gi0 = fused_mlp_gi0(x_tm, params["mlp_w1"], params["mlp_b1"],
                        params["mlp_w2"], params["mlp_b2"],
                        params["mlp_w3"], params["mlp_b3"],
                        params["wih0_t"], params["bih0"], slope)      # (T*Bp, 3H)
    gi0_seq = gi0.reshape(T, Bp, 3 * H)

    # (2) whole GRU stack + fc head
    gru_out = gru_stack(gi0_seq, params["wih_rest"], params["bih_rest"],
                        params["whh_all"], params["bhh_all"],
                        params["gru_fc_w"], params["gru_fc_b"])       # (Bp, 3N)

    # (3) view(-1, N, 3) on the UNPADDED feature layout, then pack the batch
    # into the lane axis -> state (N, Bp*F) inside the graph kernel
    g = gru_out.reshape(Bp, N, 3)
    g_packed = jnp.transpose(g, (1, 0, 2)).reshape(N, Bp * 3)

    eye = jnp.eye(Bp, dtype=DTYPE)
    win_bd = jnp.kron(eye, params["graph_in_w"]).astype(WDTYPE)       # (Bp*3, Bp*F)
    bin_t = jnp.tile(params["graph_in_b"], Bp).reshape(1, Bp * F)
    wout_bd = jnp.kron(eye, params["graph_out_w"]).astype(WDTYPE)     # (Bp*F, Bp*3)
    bout_t = jnp.tile(params["graph_out_b"], Bp).reshape(1, Bp * 3)

    out_packed = graph_stack(g_packed, a_norm.astype(WDTYPE), params["gcn_w"],
                             win_bd, bin_t, wout_bd, bout_t, slope)   # (N, Bp*3)

    out = jnp.transpose(out_packed.reshape(N, Bp, 3), (1, 0, 2))      # (Bp, N, 3)
    return out[:B]


# ----------------------------------------------------------------------------
# Pure-JAX f32 reference (tolerance target for the bf16-MXU kernel path)
# ----------------------------------------------------------------------------
def fitnet_reference(params, x, a_norm, cfg):
    s, H, N, L = cfg["slope"], cfg["gru_hidden"], cfg["n_nodes"], cfg["gru_layers"]
    f = lambda a: a.astype(jnp.float32)
    leaky = lambda y: jnp.where(y >= 0.0, y, s * y)

    h = leaky(x @ f(params["mlp_w1"]) + params["mlp_b1"])
    h = leaky(h @ f(params["mlp_w2"]) + params["mlp_b2"])
    h = h @ f(params["mlp_w3"]) + params["mlp_b3"]                      # (B, T, 3N)

    B, T, _ = h.shape
    layer_in = h
    for l in range(L):
        wih = f(params["wih0_t"]) if l == 0 else f(params["wih_rest"][l - 1])
        bih = params["bih0"][0] if l == 0 else params["bih_rest"][l - 1, 0]
        whh = f(params["whh_all"][l])
        bhh = params["bhh_all"][l, 0]
        hs = jnp.zeros((B, H), jnp.float32)
        outs = []
        for t in range(T):
            gi = layer_in[:, t, :] @ wih + bih
            gh = hs @ whh + bhh
            r = jax.nn.sigmoid(gi[:, :H] + gh[:, :H])
            z = jax.nn.sigmoid(gi[:, H:2 * H] + gh[:, H:2 * H])
            n = jnp.tanh(gi[:, 2 * H:] + r * gh[:, 2 * H:])
            hs = (1.0 - z) * n + z * hs
            outs.append(hs)
        layer_in = jnp.stack(outs, axis=1)
    y = layer_in[:, -1, :] @ f(params["gru_fc_w"]) + params["gru_fc_b"]  # (B, 3N)

    g = y.reshape(B, N, 3)
    g = leaky(g @ params["graph_in_w"] + params["graph_in_b"])           # (B, N, F)
    for k in range(cfg["graph_blocks"]):
        W = f(params["gcn_w"][k])
        xl = jnp.einsum("nm,bmf->bnf", W, g)
        agg = jnp.einsum("nm,bmf->bnf", a_norm, xl)
        g = jnp.tanh(agg) + g
    return g @ params["graph_out_w"] + params["graph_out_b"]


# ----------------------------------------------------------------------------
if __name__ == "__main__":
    key = jax.random.PRNGKey(0)
    k_params, k_x = jax.random.split(key)

    params = init_params(k_params, CFG)

    N = CFG["n_nodes"]
    # deterministic undirected ring graph, shape (2, 2N)
    src = jnp.arange(N, dtype=jnp.int32)
    dst = (src + 1) % N
    edges = jnp.stack([jnp.concatenate([src, dst]), jnp.concatenate([dst, src])])
    a_norm = build_normalized_adjacency(edges, N)

    x = jax.random.normal(k_x, (CFG["batch"], CFG["seq"], CFG["dim_feature_in"]), DTYPE)

    fwd = jax.jit(lambda p, xx, a: fitnet_forward(p, xx, a, CFG))
    out = jax.block_until_ready(fwd(params, x, a_norm))

    assert out.shape == (CFG["batch"], N, 3), out.shape
    assert bool(jnp.all(jnp.isfinite(out)))

    ref = fitnet_reference(params, x, a_norm, CFG)
    assert np.allclose(np.asarray(out), np.asarray(ref), rtol=5e-2, atol=5e-2)

    print("KERNEL_OK")
</pallas_src>

<mosaic_0001>
module attributes {stable_mosaic.version = 11 : i64} {
  func.func @_mlp_gi0_kernel(%arg0: i32, %arg1: memref<8x8xf32, #tpu.memory_space<vmem>>, %arg2: memref<8x128xbf16, #tpu.memory_space<vmem>>, %arg3: memref<1x128xf32, #tpu.memory_space<vmem>>, %arg4: memref<128x128xbf16, #tpu.memory_space<vmem>>, %arg5: memref<1x128xf32, #tpu.memory_space<vmem>>, %arg6: memref<128x384xbf16, #tpu.memory_space<vmem>>, %arg7: memref<1x384xf32, #tpu.memory_space<vmem>>, %arg8: memref<384x384xbf16, #tpu.memory_space<vmem>>, %arg9: memref<1x384xf32, #tpu.memory_space<vmem>>, %arg10: memref<8x384xf32, #tpu.memory_space<vmem>>) attributes {dimension_semantics = [#tpu.dimension_semantics<parallel>], iteration_bounds = array<i64: 4>, scalar_prefetch = 0 : i64, scratch_operands = 0 : i64, tpu.core_type = #tpu.core_type<tc>, window_params = [{transform_indices = @transform_0, window_bounds = array<i64: 8, 8>}, {pipeline_mode = #tpu.pipeline_mode<synchronous>, transform_indices = @transform_1, window_bounds = array<i64: 8, 128>}, {pipeline_mode = #tpu.pipeline_mode<synchronous>, transform_indices = @transform_2, window_bounds = array<i64: 1, 128>}, {pipeline_mode = #tpu.pipeline_mode<synchronous>, transform_indices = @transform_3, window_bounds = array<i64: 128, 128>}, {pipeline_mode = #tpu.pipeline_mode<synchronous>, transform_indices = @transform_4, window_bounds = array<i64: 1, 128>}, {pipeline_mode = #tpu.pipeline_mode<synchronous>, transform_indices = @transform_5, window_bounds = array<i64: 128, 384>}, {pipeline_mode = #tpu.pipeline_mode<synchronous>, transform_indices = @transform_6, window_bounds = array<i64: 1, 384>}, {pipeline_mode = #tpu.pipeline_mode<synchronous>, transform_indices = @transform_7, window_bounds = array<i64: 384, 384>}, {pipeline_mode = #tpu.pipeline_mode<synchronous>, transform_indices = @transform_8, window_bounds = array<i64: 1, 384>}, {transform_indices = @transform_9, window_bounds = array<i64: 8, 384>}]} {
    %c0 = arith.constant 0 : index
    %c0_0 = arith.constant 0 : index
    %0 = vector.load %arg1[%c0, %c0_0] : memref<8x8xf32, #tpu.memory_space<vmem>>, vector<8x8xf32>
    %1 = arith.truncf %0 : vector<8x8xf32> to vector<8x8xbf16>
    %c0_1 = arith.constant 0 : index
    %c0_2 = arith.constant 0 : index
    %2 = vector.load %arg2[%c0_1, %c0_2] : memref<8x128xbf16, #tpu.memory_space<vmem>>, vector<8x128xbf16>
    %cst = arith.constant dense<0.000000e+00> : vector<8x128xf32>
    %3 = tpu.matmul %1, %2, %cst {dimension_numbers = #tpu.dot_dimension_numbers<[1], [0], [0], [1], [0, 0, 1, 1], [], []>} : vector<8x8xbf16>, vector<8x128xbf16>, vector<8x128xf32> -> vector<8x128xf32>
    %c0_3 = arith.constant 0 : index
    %c0_4 = arith.constant 0 : index
    %4 = vector.load %arg3[%c0_3, %c0_4] : memref<1x128xf32, #tpu.memory_space<vmem>>, vector<1x128xf32>
    %5 = vector.broadcast %4 : vector<1x128xf32> to vector<8x128xf32>
    %6 = arith.addf %3, %5 : vector<8x128xf32>
    %cst_5 = arith.constant 0.000000e+00 : f32
    %7 = vector.broadcast %cst_5 : f32 to vector<8x128xf32>
    %8 = arith.cmpf oge, %6, %7 : vector<8x128xf32>
    %cst_6 = arith.constant 0.00999999977 : f32
    %9 = vector.broadcast %cst_6 : f32 to vector<8x128xf32>
    %10 = arith.mulf %9, %6 : vector<8x128xf32>
    %11 = arith.select %8, %6, %10 : vector<8x128xi1>, vector<8x128xf32>
    %12 = arith.truncf %11 : vector<8x128xf32> to vector<8x128xbf16>
    %c0_7 = arith.constant 0 : index
    %c0_8 = arith.constant 0 : index
    %13 = vector.load %arg4[%c0_7, %c0_8] : memref<128x128xbf16, #tpu.memory_space<vmem>>, vector<128x128xbf16>
    %cst_9 = arith.constant dense<0.000000e+00> : vector<8x128xf32>
    %14 = tpu.matmul %12, %13, %cst_9 {dimension_numbers = #tpu.dot_dimension_numbers<[1], [0], [0], [1], [0, 0, 1, 1], [], []>} : vector<8x128xbf16>, vector<128x128xbf16>, vector<8x128xf32> -> vector<8x128xf32>
    %c0_10 = arith.constant 0 : index
    %c0_11 = arith.constant 0 : index
    %15 = vector.load %arg5[%c0_10, %c0_11] : memref<1x128xf32, #tpu.memory_space<vmem>>, vector<1x128xf32>
    %16 = vector.broadcast %15 : vector<1x128xf32> to vector<8x128xf32>
    %17 = arith.addf %14, %16 : vector<8x128xf32>
    %cst_12 = arith.constant 0.000000e+00 : f32
    %18 = vector.broadcast %cst_12 : f32 to vector<8x128xf32>
    %19 = arith.cmpf oge, %17, %18 : vector<8x128xf32>
    %cst_13 = arith.constant 0.00999999977 : f32
    %20 = vector.broadcast %cst_13 : f32 to vector<8x128xf32>
    %21 = arith.mulf %20, %17 : vector<8x128xf32>
    %22 = arith.select %19, %17, %21 : vector<8x128xi1>, vector<8x128xf32>
    %23 = arith.truncf %22 : vector<8x128xf32> to vector<8x128xbf16>
    %c0_14 = arith.constant 0 : index
    %c0_15 = arith.constant 0 : index
    %24 = vector.load %arg6[%c0_14, %c0_15] : memref<128x384xbf16, #tpu.memory_space<vmem>>, vector<128x384xbf16>
    %cst_16 = arith.constant dense<0.000000e+00> : vector<8x384xf32>
    %25 = tpu.matmul %23, %24, %cst_16 {dimension_numbers = #tpu.dot_dimension_numbers<[1], [0], [0], [1], [0, 0, 1, 1], [], []>} : vector<8x128xbf16>, vector<128x384xbf16>, vector<8x384xf32> -> vector<8x384xf32>
    %c0_17 = arith.constant 0 : index
    %c0_18 = arith.constant 0 : index
    %26 = vector.load %arg7[%c0_17, %c0_18] : memref<1x384xf32, #tpu.memory_space<vmem>>, vector<1x384xf32>
    %27 = vector.broadcast %26 : vector<1x384xf32> to vector<8x384xf32>
    %28 = arith.addf %25, %27 : vector<8x384xf32>
    %29 = arith.truncf %28 : vector<8x384xf32> to vector<8x384xbf16>
    %c0_19 = arith.constant 0 : index
    %c0_20 = arith.constant 0 : index
    %30 = vector.load %arg8[%c0_19, %c0_20] : memref<384x384xbf16, #tpu.memory_space<vmem>>, vector<384x384xbf16>
    %cst_21 = arith.constant dense<0.000000e+00> : vector<8x384xf32>
    %31 = tpu.matmul %29, %30, %cst_21 {dimension_numbers = #tpu.dot_dimension_numbers<[1], [0], [0], [1], [0, 0, 1, 1], [], []>} : vector<8x384xbf16>, vector<384x384xbf16>, vector<8x384xf32> -> vector<8x384xf32>
    %c0_22 = arith.constant 0 : index
    %c0_23 = arith.constant 0 : index
    %32 = vector.load %arg9[%c0_22, %c0_23] : memref<1x384xf32, #tpu.memory_space<vmem>>, vector<1x384xf32>
    %33 = vector.broadcast %32 : vector<1x384xf32> to vector<8x384xf32>
    %34 = arith.addf %31, %33 : vector<8x384xf32>
    %c0_24 = arith.constant 0 : index
    %c0_25 = arith.constant 0 : index
    %35 = vector.load %arg10[%c0_24, %c0_25] : memref<8x384xf32, #tpu.memory_space<vmem>>, vector<8x384xf32>
    tpu.vector_store %arg10[%c0_24, %c0_25], %34 {strides = array<i32>} : memref<8x384xf32, #tpu.memory_space<vmem>>, vector<8x384xf32>,
    return
  }
  func.func @transform_0(%arg0: i32) -> (i32, i32) {
    %c0_i32 = arith.constant 0 : i32
    %c0_i32_0 = arith.constant 0 : i32
    return %arg0, %c0_i32 : i32, i32
  }
  func.func @transform_1(%arg0: i32) -> (i32, i32) {
    %c0_i32 = arith.constant 0 : i32
    %c0_i32_0 = arith.constant 0 : i32
    %c0_i32_1 = arith.constant 0 : i32
    return %c0_i32, %c0_i32_0 : i32, i32
  }
  func.func @transform_2(%arg0: i32) -> (i32, i32) {
    %c0_i32 = arith.constant 0 : i32
    %c0_i32_0 = arith.constant 0 : i32
    %c0_i32_1 = arith.constant 0 : i32
    return %c0_i32, %c0_i32_0 : i32, i32
  }
  func.func @transform_3(%arg0: i32) -> (i32, i32) {
    %c0_i32 = arith.constant 0 : i32
    %c0_i32_0 = arith.constant 0 : i32
    %c0_i32_1 = arith.constant 0 : i32
    return %c0_i32, %c0_i32_0 : i32, i32
  }
  func.func @transform_4(%arg0: i32) -> (i32, i32) {
    %c0_i32 = arith.constant 0 : i32
    %c0_i32_0 = arith.constant 0 : i32
    %c0_i32_1 = arith.constant 0 : i32
    return %c0_i32, %c0_i32_0 : i32, i32
  }
  func.func @transform_5(%arg0: i32) -> (i32, i32) {
    %c0_i32 = arith.constant 0 : i32
    %c0_i32_0 = arith.constant 0 : i32
    %c0_i32_1 = arith.constant 0 : i32
    return %c0_i32, %c0_i32_0 : i32, i32
  }
  func.func @transform_6(%arg0: i32) -> (i32, i32) {
    %c0_i32 = arith.constant 0 : i32
    %c0_i32_0 = arith.constant 0 : i32
    %c0_i32_1 = arith.constant 0 : i32
    return %c0_i32, %c0_i32_0 : i32, i32
  }
  func.func @transform_7(%arg0: i32) -> (i32, i32) {
    %c0_i32 = arith.constant 0 : i32
    %c0_i32_0 = arith.constant 0 : i32
    %c0_i32_1 = arith.constant 0 : i32
    return %c0_i32, %c0_i32_0 : i32, i32
  }
  func.func @transform_8(%arg0: i32) -> (i32, i32) {
    %c0_i32 = arith.constant 0 : i32
    %c0_i32_0 = arith.constant 0 : i32
    %c0_i32_1 = arith.constant 0 : i32
    return %c0_i32, %c0_i32_0 : i32, i32
  }
  func.func @transform_9(%arg0: i32) -> (i32, i32) {
    %c0_i32 = arith.constant 0 : i32
    %c0_i32_0 = arith.constant 0 : i32
    return %arg0, %c0_i32 : i32, i32
  }
}

module attributes {stable_mosaic.version = 11 : i64} {
  func.func @_gru_stack_kernel(%arg0: i32, %arg1: memref<1x8x384xf32, #tpu.memory_space<vmem>>, %arg2: memref<1x128x384xbf16, #tpu.memory_space<vmem>>, %arg3: memref<1x1x384xf32, #tpu.memory_space<vmem>>, %arg4: memref<2x128x384xbf16, #tpu.memory_space<vmem>>, %arg5: memref<2x1x384xf32, #tpu.memory_space<vmem>>, %arg6: memref<128x384xbf16, #tpu.memory_space<vmem>>, %arg7: memref<1x384xf32, #tpu.memory_space<vmem>>, %arg8: memref<8x384xf32, #tpu.memory_space<vmem>>, %arg9: memref<2x8x128xf32, #tpu.memory_space<vmem>>) attributes {dimension_semantics = [#tpu.dimension_semantics<arbitrary>], iteration_bounds = array<i64: 4>, scalar_prefetch = 0 : i64, scratch_operands = 1 : i64, tpu.core_type = #tpu.core_type<tc>, window_params = [{transform_indices = @transform_0, window_bounds = array<i64: 1, 8, 384>}, {pipeline_mode = #tpu.pipeline_mode<synchronous>, transform_indices = @transform_1, window_bounds = array<i64: 1, 128, 384>}, {pipeline_mode = #tpu.pipeline_mode<synchronous>, transform_indices = @transform_2, window_bounds = array<i64: 1, 1, 384>}, {pipeline_mode = #tpu.pipeline_mode<synchronous>, transform_indices = @transform_3, window_bounds = array<i64: 2, 128, 384>}, {pipeline_mode = #tpu.pipeline_mode<synchronous>, transform_indices = @transform_4, window_bounds = array<i64: 2, 1, 384>}, {pipeline_mode = #tpu.pipeline_mode<synchronous>, transform_indices = @transform_5, window_bounds = array<i64: 128, 384>}, {pipeline_mode = #tpu.pipeline_mode<synchronous>, transform_indices = @transform_6, window_bounds = array<i64: 1, 384>}, {pipeline_mode = #tpu.pipeline_mode<synchronous>, transform_indices = @transform_7, window_bounds = array<i64: 8, 384>}]} {
    %c0_i32 = arith.constant 0 : i32
    %0 = arith.cmpi eq, %arg0, %c0_i32 : i32
    %1 = arith.extui %0 : i1 to i32
    %c0_i32_0 = arith.constant 0 : i32
    %2 = arith.cmpi ne, %1, %c0_i32_0 : i32
    scf.if %2 {
      %cst_41 = arith.constant 0.000000e+00 : f32
      %94 = vector.broadcast %cst_41 : f32 to vector<2x8x128xf32>
      %c0_42 = arith.constant 0 : index
      %c0_43 = arith.constant 0 : index
      %c0_44 = arith.constant 0 : index
      %95 = vector.load %arg9[%c0_42, %c0_43, %c0_44] : memref<2x8x128xf32, #tpu.memory_space<vmem>>, vector<2x8x128xf32>
      tpu.vector_store %arg9[%c0_42, %c0_43, %c0_44], %94 {strides = array<i32>} : memref<2x8x128xf32, #tpu.memory_space<vmem>>, vector<2x8x128xf32>,
    } else {
    }
    %c0 = arith.constant 0 : index
    %c0_1 = arith.constant 0 : index
    %c0_2 = arith.constant 0 : index
    %3 = vector.load %arg1[%c0, %c0_1, %c0_2] : memref<1x8x384xf32, #tpu.memory_space<vmem>>, vector<1x8x384xf32>
    %4 = vector.shape_cast %3 : vector<1x8x384xf32> to vector<8x384xf32>
    %c0_3 = arith.constant 0 : index
    %c0_4 = arith.constant 0 : index
    %c0_5 = arith.constant 0 : index
    %5 = vector.load %arg9[%c0_3, %c0_4, %c0_5] : memref<2x8x128xf32, #tpu.memory_space<vmem>>, vector<1x8x128xf32>
    %6 = vector.shape_cast %5 : vector<1x8x128xf32> to vector<8x128xf32>
    %c0_6 = arith.constant 0 : index
    %c0_7 = arith.constant 0 : index
    %c0_8 = arith.constant 0 : index
    %7 = vector.load %arg4[%c0_6, %c0_7, %c0_8] : memref<2x128x384xbf16, #tpu.memory_space<vmem>>, vector<1x128x384xbf16>
    %8 = vector.shape_cast %7 : vector<1x128x384xbf16> to vector<128x384xbf16>
    %c0_9 = arith.constant 0 : index
    %c0_10 = arith.constant 0 : index
    %c0_11 = arith.constant 0 : index
    %9 = vector.load %arg5[%c0_9, %c0_10, %c0_11] : memref<2x1x384xf32, #tpu.memory_space<vmem>>, vector<1x1x384xf32>
    %10 = vector.shape_cast %9 : vector<1x1x384xf32> to vector<1x384xf32>
    %11 = arith.truncf %6 : vector<8x128xf32> to vector<8x128xbf16>
    %cst = arith.constant dense<0.000000e+00> : vector<8x384xf32>
    %12 = tpu.matmul %11, %8, %cst {dimension_numbers = #tpu.dot_dimension_numbers<[1], [0], [0], [1], [0, 0, 1, 1], [], []>} : vector<8x128xbf16>, vector<128x384xbf16>, vector<8x384xf32> -> vector<8x384xf32>
    %13 = vector.broadcast %10 : vector<1x384xf32> to vector<8x384xf32>
    %14 = arith.addf %12, %13 : vector<8x384xf32>
    %15 = vector.extract_strided_slice %4 {offsets = [0, 0], sizes = [8, 128], strides = [1, 1]} : vector<8x384xf32> to vector<8x128xf32>
    %16 = vector.extract_strided_slice %14 {offsets = [0, 0], sizes = [8, 128], strides = [1, 1]} : vector<8x384xf32> to vector<8x128xf32>
    %17 = arith.addf %15, %16 : vector<8x128xf32>
    %18 = arith.negf %17 : vector<8x128xf32>
    %19 = math.exp %18 : vector<8x128xf32>
    %cst_12 = arith.constant 1.000000e+00 : f32
    %20 = vector.broadcast %cst_12 : f32 to vector<8x128xf32>
    %21 = arith.addf %20, %19 : vector<8x128xf32>
    %22 = arith.divf %20, %21 : vector<8x128xf32>
    %23 = vector.extract_strided_slice %4 {offsets = [0, 128], sizes = [8, 128], strides = [1, 1]} : vector<8x384xf32> to vector<8x128xf32>
    %24 = vector.extract_strided_slice %14 {offsets = [0, 128], sizes = [8, 128], strides = [1, 1]} : vector<8x384xf32> to vector<8x128xf32>
    %25 = arith.addf %23, %24 : vector<8x128xf32>
    %26 = arith.negf %25 : vector<8x128xf32>
    %27 = math.exp %26 : vector<8x128xf32>
    %cst_13 = arith.constant 1.000000e+00 : f32
    %28 = vector.broadcast %cst_13 : f32 to vector<8x128xf32>
    %29 = arith.addf %28, %27 : vector<8x128xf32>
    %30 = arith.divf %28, %29 : vector<8x128xf32>
    %31 = vector.extract_strided_slice %4 {offsets = [0, 256], sizes = [8, 128], strides = [1, 1]} : vector<8x384xf32> to vector<8x128xf32>
    %32 = vector.extract_strided_slice %14 {offsets = [0, 256], sizes = [8, 128], strides = [1, 1]} : vector<8x384xf32> to vector<8x128xf32>
    %33 = arith.mulf %22, %32 : vector<8x128xf32>
    %34 = arith.addf %31, %33 : vector<8x128xf32>
    %35 = math.tanh %34 : vector<8x128xf32>
    %cst_14 = arith.constant 1.000000e+00 : f32
    %36 = vector.broadcast %cst_14 : f32 to vector<8x128xf32>
    %37 = arith.subf %36, %30 : vector<8x128xf32>
    %38 = arith.mulf %37, %35 : vector<8x128xf32>
    %39 = arith.mulf %30, %6 : vector<8x128xf32>
    %40 = arith.addf %38, %39 : vector<8x128xf32>
    %c0_15 = arith.constant 0 : index
    %c0_16 = arith.constant 0 : index
    %c0_17 = arith.constant 0 : index
    %41 = vector.load %arg9[%c0_15, %c0_16, %c0_17] : memref<2x8x128xf32, #tpu.memory_space<vmem>>, vector<1x8x128xf32>
    %42 = vector.shape_cast %41 : vector<1x8x128xf32> to vector<8x128xf32>
    %43 = vector.shape_cast %40 : vector<8x128xf32> to vector<1x8x128xf32>
    tpu.vector_store %arg9[%c0_15, %c0_16, %c0_17], %43 {strides = array<i32>} : memref<2x8x128xf32, #tpu.memory_space<vmem>>, vector<1x8x128xf32>,
    %c0_18 = arith.constant 0 : index
    %c0_19 = arith.constant 0 : index
    %c0_20 = arith.constant 0 : index
    %44 = vector.load %arg2[%c0_18, %c0_19, %c0_20] : memref<1x128x384xbf16, #tpu.memory_space<vmem>>, vector<1x128x384xbf16>
    %45 = vector.shape_cast %44 : vector<1x128x384xbf16> to vector<128x384xbf16>
    %46 = arith.truncf %40 : vector<8x128xf32> to vector<8x128xbf16>
    %cst_21 = arith.constant dense<0.000000e+00> : vector<8x384xf32>
    %47 = tpu.matmul %46, %45, %cst_21 {dimension_numbers = #tpu.dot_dimension_numbers<[1], [0], [0], [1], [0, 0, 1, 1], [], []>} : vector<8x128xbf16>, vector<128x384xbf16>, vector<8x384xf32> -> vector<8x384xf32>
    %c0_22 = arith.constant 0 : index
    %c0_23 = arith.constant 0 : index
    %c0_24 = arith.constant 0 : index
    %48 = vector.load %arg3[%c0_22, %c0_23, %c0_24] : memref<1x1x384xf32, #tpu.memory_space<vmem>>, vector<1x1x384xf32>
    %49 = vector.shape_cast %48 : vector<1x1x384xf32> to vector<1x384xf32>
    %50 = vector.broadcast %49 : vector<1x384xf32> to vector<8x384xf32>
    %51 = arith.addf %47, %50 : vector<8x384xf32>
    %c1 = arith.constant 1 : index
    %c0_25 = arith.constant 0 : index
    %c0_26 = arith.constant 0 : index
    %52 = vector.load %arg9[%c1, %c0_25, %c0_26] : memref<2x8x128xf32, #tpu.memory_space<vmem>>, vector<1x8x128xf32>
    %53 = vector.shape_cast %52 : vector<1x8x128xf32> to vector<8x128xf32>
    %c1_27 = arith.constant 1 : index
    %c0_28 = arith.constant 0 : index
    %c0_29 = arith.constant 0 : index
    %54 = vector.load %arg4[%c1_27, %c0_28, %c0_29] : memref<2x128x384xbf16, #tpu.memory_space<vmem>>, vector<1x128x384xbf16>
    %55 = vector.shape_cast %54 : vector<1x128x384xbf16> to vector<128x384xbf16>
    %c1_30 = arith.constant 1 : index
    %c0_31 = arith.constant 0 : index
    %c0_32 = arith.constant 0 : index
    %56 = vector.load %arg5[%c1_30, %c0_31, %c0_32] : memref<2x1x384xf32, #tpu.memory_space<vmem>>, vector<1x1x384xf32>
    %57 = vector.shape_cast %56 : vector<1x1x384xf32> to vector<1x384xf32>
    %58 = arith.truncf %53 : vector<8x128xf32> to vector<8x128xbf16>
    %cst_33 = arith.constant dense<0.000000e+00> : vector<8x384xf32>
    %59 = tpu.matmul %58, %55, %cst_33 {dimension_numbers = #tpu.dot_dimension_numbers<[1], [0], [0], [1], [0, 0, 1, 1], [], []>} : vector<8x128xbf16>, vector<128x384xbf16>, vector<8x384xf32> -> vector<8x384xf32>
    %60 = vector.broadcast %57 : vector<1x384xf32> to vector<8x384xf32>
    %61 = arith.addf %59, %60 : vector<8x384xf32>
    %62 = vector.extract_strided_slice %51 {offsets = [0, 0], sizes = [8, 128], strides = [1, 1]} : vector<8x384xf32> to vector<8x128xf32>
    %63 = vector.extract_strided_slice %61 {offsets = [0, 0], sizes = [8, 128], strides = [1, 1]} : vector<8x384xf32> to vector<8x128xf32>
    %64 = arith.addf %62, %63 : vector<8x128xf32>
    %65 = arith.negf %64 : vector<8x128xf32>
    %66 = math.exp %65 : vector<8x128xf32>
    %cst_34 = arith.constant 1.000000e+00 : f32
    %67 = vector.broadcast %cst_34 : f32 to vector<8x128xf32>
    %68 = arith.addf %67, %66 : vector<8x128xf32>
    %69 = arith.divf %67, %68 : vector<8x128xf32>
    %70 = vector.extract_strided_slice %51 {offsets = [0, 128], sizes = [8, 128], strides = [1, 1]} : vector<8x384xf32> to vector<8x128xf32>
    %71 = vector.extract_strided_slice %61 {offsets = [0, 128], sizes = [8, 128], strides = [1, 1]} : vector<8x384xf32> to vector<8x128xf32>
    %72 = arith.addf %70, %71 : vector<8x128xf32>
    %73 = arith.negf %72 : vector<8x128xf32>
    %74 = math.exp %73 : vector<8x128xf32>
    %cst_35 = arith.constant 1.000000e+00 : f32
    %75 = vector.broadcast %cst_35 : f32 to vector<8x128xf32>
    %76 = arith.addf %75, %74 : vector<8x128xf32>
    %77 = arith.divf %75, %76 : vector<8x128xf32>
    %78 = vector.extract_strided_slice %51 {offsets = [0, 256], sizes = [8, 128], strides = [1, 1]} : vector<8x384xf32> to vector<8x128xf32>
    %79 = vector.extract_strided_slice %61 {offsets = [0, 256], sizes = [8, 128], strides = [1, 1]} : vector<8x384xf32> to vector<8x128xf32>
    %80 = arith.mulf %69, %79 : vector<8x128xf32>
    %81 = arith.addf %78, %80 : vector<8x128xf32>
    %82 = math.tanh %81 : vector<8x128xf32>
    %cst_36 = arith.constant 1.000000e+00 : f32
    %83 = vector.broadcast %cst_36 : f32 to vector<8x128xf32>
    %84 = arith.subf %83, %77 : vector<8x128xf32>
    %85 = arith.mulf %84, %82 : vector<8x128xf32>
    %86 = arith.mulf %77, %53 : vector<8x128xf32>
    %87 = arith.addf %85, %86 : vector<8x128xf32>
    %c1_37 = arith.constant 1 : index
    %c0_38 = arith.constant 0 : index
    %c0_39 = arith.constant 0 : index
    %88 = vector.load %arg9[%c1_37, %c0_38, %c0_39] : memref<2x8x128xf32, #tpu.memory_space<vmem>>, vector<1x8x128xf32>
    %89 = vector.shape_cast %88 : vector<1x8x128xf32> to vector<8x128xf32>
    %90 = vector.shape_cast %87 : vector<8x128xf32> to vector<1x8x128xf32>
    tpu.vector_store %arg9[%c1_37, %c0_38, %c0_39], %90 {strides = array<i32>} : memref<2x8x128xf32, #tpu.memory_space<vmem>>, vector<1x8x128xf32>,
    %c3_i32 = arith.constant 3 : i32
    %91 = arith.cmpi eq, %arg0, %c3_i32 : i32
    %92 = arith.extui %91 : i1 to i32
    %c0_i32_40 = arith.constant 0 : i32
    %93 = arith.cmpi ne, %92, %c0_i32_40 : i32
    scf.if %93 {
      %94 = arith.truncf %87 : vector<8x128xf32> to vector<8x128xbf16>
      %c0_41 = arith.constant 0 : index
      %c0_42 = arith.constant 0 : index
      %95 = vector.load %arg6[%c0_41, %c0_42] : memref<128x384xbf16, #tpu.memory_space<vmem>>, vector<128x384xbf16>
      %cst_43 = arith.constant dense<0.000000e+00> : vector<8x384xf32>
      %96 = tpu.matmul %94, %95, %cst_43 {dimension_numbers = #tpu.dot_dimension_numbers<[1], [0], [0], [1], [0, 0, 1, 1], [], []>} : vector<8x128xbf16>, vector<128x384xbf16>, vector<8x384xf32> -> vector<8x384xf32>
      %c0_44 = arith.constant 0 : index
      %c0_45 = arith.constant 0 : index
      %97 = vector.load %arg7[%c0_44, %c0_45] : memref<1x384xf32, #tpu.memory_space<vmem>>, vector<1x384xf32>
      %98 = vector.broadcast %97 : vector<1x384xf32> to vector<8x384xf32>
      %99 = arith.addf %96, %98 : vector<8x384xf32>
      %c0_46 = arith.constant 0 : index
      %c0_47 = arith.constant 0 : index
      %100 = vector.load %arg8[%c0_46, %c0_47] : memref<8x384xf32, #tpu.memory_space<vmem>>, vector<8x384xf32>
      tpu.vector_store %arg8[%c0_46, %c0_47], %99 {strides = array<i32>} : memref<8x384xf32, #tpu.memory_space<vmem>>, vector<8x384xf32>,
    } else {
    }
    return
  }
  func.func @transform_0(%arg0: i32) -> (i32, i32, i32) {
    %c0_i32 = arith.constant 0 : i32
    %c0_i32_0 = arith.constant 0 : i32
    %c0_i32_1 = arith.constant 0 : i32
    return %arg0, %c0_i32, %c0_i32_0 : i32, i32, i32
  }
  func.func @transform_1(%arg0: i32) -> (i32, i32, i32) {
    %c0_i32 = arith.constant 0 : i32
    %c0_i32_0 = arith.constant 0 : i32
    %c0_i32_1 = arith.constant 0 : i32
    %c0_i32_2 = arith.constant 0 : i32
    return %c0_i32, %c0_i32_0, %c0_i32_1 : i32, i32, i32
  }
  func.func @transform_2(%arg0: i32) -> (i32, i32, i32) {
    %c0_i32 = arith.constant 0 : i32
    %c0_i32_0 = arith.constant 0 : i32
    %c0_i32_1 = arith.constant 0 : i32
    %c0_i32_2 = arith.constant 0 : i32
    return %c0_i32, %c0_i32_0, %c0_i32_1 : i32, i32, i32
  }
  func.func @transform_3(%arg0: i32) -> (i32, i32, i32) {
    %c0_i32 = arith.constant 0 : i32
    %c0_i32_0 = arith.constant 0 : i32
    %c0_i32_1 = arith.constant 0 : i32
    %c0_i32_2 = arith.constant 0 : i32
    return %c0_i32, %c0_i32_0, %c0_i32_1 : i32, i32, i32
  }
  func.func @transform_4(%arg0: i32) -> (i32, i32, i32) {
    %c0_i32 = arith.constant 0 : i32
    %c0_i32_0 = arith.constant 0 : i32
    %c0_i32_1 = arith.constant 0 : i32
    %c0_i32_2 = arith.constant 0 : i32
    return %c0_i32, %c0_i32_0, %c0_i32_1 : i32, i32, i32
  }
  func.func @transform_5(%arg0: i32) -> (i32, i32) {
    %c0_i32 = arith.constant 0 : i32
    %c0_i32_0 = arith.constant 0 : i32
    %c0_i32_1 = arith.constant 0 : i32
    return %c0_i32, %c0_i32_0 : i32, i32
  }
  func.func @transform_6(%arg0: i32) -> (i32, i32) {
    %c0_i32 = arith.constant 0 : i32
    %c0_i32_0 = arith.constant 0 : i32
    %c0_i32_1 = arith.constant 0 : i32
    return %c0_i32, %c0_i32_0 : i32, i32
  }
  func.func @transform_7(%arg0: i32) -> (i32, i32) {
    %c0_i32 = arith.constant 0 : i32
    %c0_i32_0 = arith.constant 0 : i32
    %c0_i32_1 = arith.constant 0 : i32
    return %c0_i32, %c0_i32_0 : i32, i32
  }
}

module attributes {stable_mosaic.version = 11 : i64} {
  func.func @_graph_stack_kernel(%arg0: i32, %arg1: memref<128x24xf32, #tpu.memory_space<vmem>>, %arg2: memref<128x128xbf16, #tpu.memory_space<vmem>>, %arg3: memref<1x128x128xbf16, #tpu.memory_space<vmem>>, %arg4: memref<24x64xbf16, #tpu.memory_space<vmem>>, %arg5: memref<1x64xf32, #tpu.memory_space<vmem>>, %arg6: memref<64x24xbf16, #tpu.memory_space<vmem>>, %arg7: memref<1x24xf32, #tpu.memory_space<vmem>>, %arg8: memref<128x24xf32, #tpu.memory_space<vmem>>, %arg9: memref<128x64xf32, #tpu.memory_space<vmem>>) attributes {dimension_semantics = [#tpu.dimension_semantics<arbitrary>], iteration_bounds = array<i64: 2>, scalar_prefetch = 0 : i64, scratch_operands = 1 : i64, tpu.core_type = #tpu.core_type<tc>, window_params = [{pipeline_mode = #tpu.pipeline_mode<synchronous>, transform_indices = @transform_0, window_bounds = array<i64: 128, 24>}, {pipeline_mode = #tpu.pipeline_mode<synchronous>, transform_indices = @transform_1, window_bounds = array<i64: 128, 128>}, {transform_indices = @transform_2, window_bounds = array<i64: 1, 128, 128>}, {pipeline_mode = #tpu.pipeline_mode<synchronous>, transform_indices = @transform_3, window_bounds = array<i64: 24, 64>}, {pipeline_mode = #tpu.pipeline_mode<synchronous>, transform_indices = @transform_4, window_bounds = array<i64: 1, 64>}, {pipeline_mode = #tpu.pipeline_mode<synchronous>, transform_indices = @transform_5, window_bounds = array<i64: 64, 24>}, {pipeline_mode = #tpu.pipeline_mode<synchronous>, transform_indices = @transform_6, window_bounds = array<i64: 1, 24>}, {pipeline_mode = #tpu.pipeline_mode<synchronous>, transform_indices = @transform_7, window_bounds = array<i64: 128, 24>}]} {
    %c0_i32 = arith.constant 0 : i32
    %0 = arith.cmpi eq, %arg0, %c0_i32 : i32
    %1 = arith.extui %0 : i1 to i32
    %c0_i32_0 = arith.constant 0 : i32
    %2 = arith.cmpi ne, %1, %c0_i32_0 : i32
    scf.if %2 {
      %c0_11 = arith.constant 0 : index
      %c0_12 = arith.constant 0 : index
      %17 = vector.load %arg1[%c0_11, %c0_12] : memref<128x24xf32, #tpu.memory_space<vmem>>, vector<128x24xf32>
      %18 = arith.truncf %17 : vector<128x24xf32> to vector<128x24xbf16>
      %c0_13 = arith.constant 0 : index
      %c0_14 = arith.constant 0 : index
      %19 = vector.load %arg4[%c0_13, %c0_14] : memref<24x64xbf16, #tpu.memory_space<vmem>>, vector<24x64xbf16>
      %cst_15 = arith.constant dense<0.000000e+00> : vector<128x64xf32>
      %20 = tpu.matmul %18, %19, %cst_15 {dimension_numbers = #tpu.dot_dimension_numbers<[1], [0], [0], [1], [0, 0, 1, 1], [], []>} : vector<128x24xbf16>, vector<24x64xbf16>, vector<128x64xf32> -> vector<128x64xf32>
      %c0_16 = arith.constant 0 : index
      %c0_17 = arith.constant 0 : index
      %21 = vector.load %arg5[%c0_16, %c0_17] : memref<1x64xf32, #tpu.memory_space<vmem>>, vector<1x64xf32>
      %22 = vector.broadcast %21 : vector<1x64xf32> to vector<128x64xf32>
      %23 = arith.addf %20, %22 : vector<128x64xf32>
      %cst_18 = arith.constant 0.000000e+00 : f32
      %24 = vector.broadcast %cst_18 : f32 to vector<128x64xf32>
      %25 = arith.cmpf oge, %23, %24 : vector<128x64xf32>
      %cst_19 = arith.constant 0.00999999977 : f32
      %26 = vector.broadcast %cst_19 : f32 to vector<128x64xf32>
      %27 = arith.mulf %26, %23 : vector<128x64xf32>
      %28 = arith.select %25, %23, %27 : vector<128x64xi1>, vector<128x64xf32>
      %c0_20 = arith.constant 0 : index
      %c0_21 = arith.constant 0 : index
      %29 = vector.load %arg9[%c0_20, %c0_21] : memref<128x64xf32, #tpu.memory_space<vmem>>, vector<128x64xf32>
      tpu.vector_store %arg9[%c0_20, %c0_21], %28 {strides = array<i32>} : memref<128x64xf32, #tpu.memory_space<vmem>>, vector<128x64xf32>,
    } else {
    }
    %c0 = arith.constant 0 : index
    %c0_1 = arith.constant 0 : index
    %3 = vector.load %arg2[%c0, %c0_1] : memref<128x128xbf16, #tpu.memory_space<vmem>>, vector<128x128xbf16>
    %c0_2 = arith.constant 0 : index
    %c0_3 = arith.constant 0 : index
    %c0_4 = arith.constant 0 : index
    %4 = vector.load %arg3[%c0_2, %c0_3, %c0_4] : memref<1x128x128xbf16, #tpu.memory_space<vmem>>, vector<1x128x128xbf16>
    %5 = vector.shape_cast %4 : vector<1x128x128xbf16> to vector<128x128xbf16>
    %c0_5 = arith.constant 0 : index
    %c0_6 = arith.constant 0 : index
    %6 = vector.load %arg9[%c0_5, %c0_6] : memref<128x64xf32, #tpu.memory_space<vmem>>, vector<128x64xf32>
    %7 = arith.truncf %6 : vector<128x64xf32> to vector<128x64xbf16>
    %cst = arith.constant dense<0.000000e+00> : vector<128x64xf32>
    %8 = tpu.matmul %5, %7, %cst {dimension_numbers = #tpu.dot_dimension_numbers<[1], [0], [0], [1], [0, 0, 1, 1], [], []>} : vector<128x128xbf16>, vector<128x64xbf16>, vector<128x64xf32> -> vector<128x64xf32>
    %9 = arith.truncf %8 : vector<128x64xf32> to vector<128x64xbf16>
    %cst_7 = arith.constant dense<0.000000e+00> : vector<128x64xf32>
    %10 = tpu.matmul %3, %9, %cst_7 {dimension_numbers = #tpu.dot_dimension_numbers<[1], [0], [0], [1], [0, 0, 1, 1], [], []>} : vector<128x128xbf16>, vector<128x64xbf16>, vector<128x64xf32> -> vector<128x64xf32>
    %11 = math.tanh %10 : vector<128x64xf32>
    %12 = arith.addf %11, %6 : vector<128x64xf32>
    %c0_8 = arith.constant 0 : index
    %c0_9 = arith.constant 0 : index
    %13 = vector.load %arg9[%c0_8, %c0_9] : memref<128x64xf32, #tpu.memory_space<vmem>>, vector<128x64xf32>
    tpu.vector_store %arg9[%c0_8, %c0_9], %12 {strides = array<i32>} : memref<128x64xf32, #tpu.memory_space<vmem>>, vector<128x64xf32>,
    %c1_i32 = arith.constant 1 : i32
    %14 = arith.cmpi eq, %arg0, %c1_i32 : i32
    %15 = arith.extui %14 : i1 to i32
    %c0_i32_10 = arith.constant 0 : i32
    %16 = arith.cmpi ne, %15, %c0_i32_10 : i32
    scf.if %16 {
      %c0_11 = arith.constant 0 : index
      %c0_12 = arith.constant 0 : index
      %17 = vector.load %arg9[%c0_11, %c0_12] : memref<128x64xf32, #tpu.memory_space<vmem>>, vector<128x64xf32>
      %18 = arith.truncf %17 : vector<128x64xf32> to vector<128x64xbf16>
      %c0_13 = arith.constant 0 : index
      %c0_14 = arith.constant 0 : index
      %19 = vector.load %arg6[%c0_13, %c0_14] : memref<64x24xbf16, #tpu.memory_space<vmem>>, vector<64x24xbf16>
      %cst_15 = arith.constant dense<0.000000e+00> : vector<128x24xf32>
      %20 = tpu.matmul %18, %19, %cst_15 {dimension_numbers = #tpu.dot_dimension_numbers<[1], [0], [0], [1], [0, 0, 1, 1], [], []>} : vector<128x64xbf16>, vector<64x24xbf16>, vector<128x24xf32> -> vector<128x24xf32>
      %c0_16 = arith.constant 0 : index
      %c0_17 = arith.constant 0 : index
      %21 = vector.load %arg7[%c0_16, %c0_17] : memref<1x24xf32, #tpu.memory_space<vmem>>, vector<1x24xf32>
      %22 = vector.broadcast %21 : vector<1x24xf32> to vector<128x24xf32>
      %23 = arith.addf %20, %22 : vector<128x24xf32>
      %c0_18 = arith.constant 0 : index
      %c0_19 = arith.constant 0 : index
      %24 = vector.load %arg8[%c0_18, %c0_19] : memref<128x24xf32, #tpu.memory_space<vmem>>, vector<128x24xf32>
      tpu.vector_store %arg8[%c0_18, %c0_19], %23 {strides = array<i32>} : memref<128x24xf32, #tpu.memory_space<vmem>>, vector<128x24xf32>,
    } else {
    }
    return
  }
  func.func @transform_0(%arg0: i32) -> (i32, i32) {
    %c0_i32 = arith.constant 0 : i32
    %c0_i32_0 = arith.constant 0 : i32
    %c0_i32_1 = arith.constant 0 : i32
    return %c0_i32, %c0_i32_0 : i32, i32
  }
  func.func @transform_1(%arg0: i32) -> (i32, i32) {
    %c0_i32 = arith.constant 0 : i32
    %c0_i32_0 = arith.constant 0 : i32
    %c0_i32_1 = arith.constant 0 : i32
    return %c0_i32, %c0_i32_0 : i32, i32
  }
  func.func @transform_2(%arg0: i32) -> (i32, i32, i32) {
    %c0_i32 = arith.constant 0 : i32
    %c0_i32_0 = arith.constant 0 : i32
    %c0_i32_1 = arith.constant 0 : i32
    return %arg0, %c0_i32, %c0_i32_0 : i32, i32, i32
  }
  func.func @transform_3(%arg0: i32) -> (i32, i32) {
    %c0_i32 = arith.constant 0 : i32
    %c0_i32_0 = arith.constant 0 : i32
    %c0_i32_1 = arith.constant 0 : i32
    return %c0_i32, %c0_i32_0 : i32, i32
  }
  func.func @transform_4(%arg0: i32) -> (i32, i32) {
    %c0_i32 = arith.constant 0 : i32
    %c0_i32_0 = arith.constant 0 : i32
    %c0_i32_1 = arith.constant 0 : i32
    return %c0_i32, %c0_i32_0 : i32, i32
  }
  func.func @transform_5(%arg0: i32) -> (i32, i32) {
    %c0_i32 = arith.constant 0 : i32
    %c0_i32_0 = arith.constant 0 : i32
    %c0_i32_1 = arith.constant 0 : i32
    return %c0_i32, %c0_i32_0 : i32, i32
  }
  func.func @transform_6(%arg0: i32) -> (i32, i32) {
    %c0_i32 = arith.constant 0 : i32
    %c0_i32_0 = arith.constant 0 : i32
    %c0_i32_1 = arith.constant 0 : i32
    return %c0_i32, %c0_i32_0 : i32, i32
  }
  func.func @transform_7(%arg0: i32) -> (i32, i32) {
    %c0_i32 = arith.constant 0 : i32
    %c0_i32_0 = arith.constant 0 : i32
    %c0_i32_1 = arith.constant 0 : i32
    return %c0_i32, %c0_i32_0 : i32, i32
  }
}

</mosaic_0001>

<bundles_post_ra>
// kernel: tile.13
= control target key start
LH: loop header
LB: loop body
LE: loop exit
PB: predicated region body
PF: predicated region fallthrough
CT: control target
= control target key end

     0   :  { %s22_s0 = inlined_call_operand.vmem [shape: f32[8], index: 0, kind: input, shape index: {}]   ;;  %s23_s1 = inlined_call_operand.vmem [shape: f32[8,8], index: 1, kind: output, shape index: {}]  }
   0x1   :  { %v4_v0 = vld [vmem:[%s22_s0] ss:$0 sm:$0xff] }
   0x2   :  { %5 = vst [vmem:[%s23_s1] sm:$0xff] %v4_v0 }

// kernel: tile.14
= control target key start
LH: loop header
LB: loop body
LE: loop exit
PB: predicated region body
PF: predicated region fallthrough
CT: control target
= control target key end

     0   :  { %s67_s10 = smov 56   ;;  %s68_s11 = smov 40   ;;  %vm3_vm0 = vcmask 64512   ;;  %vm9_vm1 = vcmask 523712   ;;  %vm15_vm2 = vcmask 458112   ;;  %vm21_vm3 = vcmask 392512   ;;  %s111_s0 = inlined_call_operand.vmem [shape: f32[8,8], index: 0, kind: input, shape index: {}]   ;;  %s112_s1 = inlined_call_operand.vmem [shape: f32[1,64], index: 1, kind: output, shape index: {}]  }
   0x1   :  { %v53_v0 = vld [vmem:[%s111_s0 + $0x7] sm:$0x1]   ;;  %v55_v1 = vld [vmem:[%s111_s0 + $0x5] sm:$0x1]   ;;  %v54_v2 = vld [vmem:[%s111_s0 + $0x6] sm:$0x1]  }
   0x2   :  { %7 = vrot.lane.b32.xlu0 %v53_v0, %s67_s10  ;;  %19 = vrot.lane.b32.xlu1 %v55_v1, %s68_s11  ;;  %v56_v3 = vld [vmem:[%s111_s0 + $0x4] sm:$0x1]   ;;  %v2_v4 = vld [vmem:[%s111_s0] sm:$0x1]   ;;  %s69_s18 = smov 48   ;;  %s70_s19 = smov 32  }
   0x3   :  { %4 = vst.msk [vmem:[#allocation0] sm:$0x1] %vm3_vm0, %v2_v4   ;;  %v57_v5 = vld [vmem:[%s111_s0 + $0x3] sm:$0x1]   ;;  %v58_v6 = vld [vmem:[%s111_s0 + $0x2] sm:$0x1]  }
   0x4   :  { %s71_s24 = smov 24   ;;  %s72_s25 = smov 16   ;;  %v59_v7 = vld [vmem:[%s111_s0 + $0x1] sm:$0x1]   ;;  %vm27_vm4 = vcmask 326912   ;;  %vm33_vm5 = vcmask 261312  }
   0x5   :  { %s73_s0 = smov 8   ;;  %vm39_vm6 = vcmask 195712   ;;  %vm45_vm7 = vcmask 130112  }
   0x6   :  { %13 = vrot.lane.b32.xlu0 %v54_v2, %s69_s18  ;;  %25 = vrot.lane.b32.xlu1 %v56_v3, %s70_s19 }
   0xa   :  { %31 = vrot.lane.b32.xlu0 %v57_v5, %s71_s24  ;;  %37 = vrot.lane.b32.xlu1 %v58_v6, %s72_s25 }
   0xe   :  { %43 = vrot.lane.b32.xlu0 %v59_v7, %s73_s0 }
  0x74   :  { %v8_v8 = vpop.permute.xlu0 %7   ;;  %v20_v9 = vpop.permute.xlu1 %19  }
  0x75   :  { %10 = vst.msk [vmem:[#allocation0] sm:$0x1] %vm9_vm1, %v8_v8  }
  0x78   :  { %v14_v10 = vpop.permute.xlu0 %13   ;;  %v26_v11 = vpop.permute.xlu1 %25  }
  0x79   :  { %16 = vst.msk [vmem:[#allocation0] sm:$0x1] %vm15_vm2, %v14_v10  }
  0x7a   :  { %22 = vst.msk [vmem:[#allocation0] sm:$0x1] %vm21_vm3, %v20_v9  }
  0x7b   :  { %28 = vst.msk [vmem:[#allocation0] sm:$0x1] %vm27_vm4, %v26_v11  }
  0x7c   :  { %v32_v12 = vpop.permute.xlu0 %31   ;;  %v38_v13 = vpop.permute.xlu1 %37  }
  0x7d   :  { %34 = vst.msk [vmem:[#allocation0] sm:$0x1] %vm33_vm5, %v32_v12  }
  0x7e   :  { %40 = vst.msk [vmem:[#allocation0] sm:$0x1] %vm39_vm6, %v38_v13  }
  0x80   :  { %v44_v14 = vpop.permute.xlu0 %43  }
  0x81   :  { %46 = vst.msk [vmem:[#allocation0] sm:$0x1] %vm45_vm7, %v44_v14  }
  0x88   :  { %v50_v15 = vld [vmem:[#allocation0] sm:$0x1] }
  0x89   :  { %52 = vst [vmem:[%s112_s1] sm:$0x1] %v50_v15 }

// kernel: _lambda_.3
= control target key start
LH: loop header
LB: loop body
LE: loop exit
PB: predicated region body
PF: predicated region fallthrough
CT: control target
= control target key end

     0   :  { %14 = vsyncpa [#allocation3], 0  ;;  %s2273_s0 = inlined_call_operand.vmem [shape: f32[32,8], index: 0, kind: input, shape index: {}]   ;;  %s2274_s1 = inlined_call_operand.vmem [shape: bf16[8,128], index: 1, kind: input, shape index: {}]   ;;  %s2275_s2 = inlined_call_operand.vmem [shape: f32[1,128], index: 2, kind: input, shape index: {}]   ;;  %s2276_s3 = inlined_call_operand.vmem [shape: bf16[128,128], index: 3, kind: input, shape index: {}]   ;;  %s2277_s4 = inlined_call_operand.vmem [shape: f32[1,128], index: 4, kind: input, shape index: {}]   ;;  %s2278_s5 = inlined_call_operand.hbm [shape: bf16[128,384], index: 5, kind: input, shape index: {}]   ;;  %s2279_s6 = inlined_call_operand.vmem [shape: f32[1,384], index: 6, kind: input, shape index: {}]   ;;  %s2280_s7 = inlined_call_operand.hbm [shape: bf16[384,384], index: 7, kind: input, shape index: {}]   ;;  %s2281_s8 = inlined_call_operand.vmem [shape: f32[1,384], index: 8, kind: input, shape index: {}]   ;;  %s2282_s9 = inlined_call_operand.vmem [shape: f32[32,384], index: 9, kind: output, shape index: {}]  }
   0x1   :  { %15 = vsyncpa [#allocation5], 0  ;;  %s2081_s30 = smov 0  }
   0x2 LB: > { %s2087_s10 = sadd.s32 4294967295, %s2022_s30   ;;  %p1540_p0 = scmp.ge.s32.totalorder %s2022_s30, 1  ;;  %s2022_s30 = sphi %s2081_s30, %s21_s30  }
   0x3   : > { %p246_p1 = scmp.lt.s32.totalorder %s2022_s30, 5  ;;  %s2024_s11 = smov [#allocation2]  }
   0x4   : > { %s270_s12 = sshll.u32 %s2024_s11, 4  ;;  %p2283_p3 = scmp.eq.s32.totalorder %s2087_s10, 0  ;;  %s271_s12 = int_to_ptr.vmem [resolvable:$true] %s270_s12 }
   0x5   : > { %p2091_p2 = pnand %p1540_p0, %p246_p1  ;;  %s2025_s14 = smov [#allocation4]  }
   0x6   : > { %s286_s15 = sshll.u32 %s2025_s14, 4  ;;  %s1952_s19 = scalar_lea.hbm %s2278_s5, 3072  ;;  %s2104_s15 = int_to_ptr.vmem [resolvable:$true] %s286_s15 }
   0x7   : > { %s2285_s13 = scalar_select %p2091_p2, 1, 0 }
   0x8   : > { %p1790_p4 = pneg %p2091_p2  ;;  %p1953_p6 = scmp.ne.s32.totalorder %s2278_s5, %s1952_s19 }
   0x9   : > { %p1959_p10 = scmp.lt.u32.totalorder %s1952_s19, %s2278_s5 }
   0xa   : > { %p2100_p5 = pnand %p2283_p3, %p1790_p4 }
   0xc   : > { %p1954_p7 = pneg %p2100_p5 }
   0xe   : > { %p1955_p8 = pnand %p1954_p7, %p1953_p6 }
  0x10   : > { %p1956_p9 = pneg %p1955_p8 }
  0x12   : > { %p1961_p11 = pnand %p1959_p10, %p1956_p9 }
  0x14   : > { %1964 = shalt.err (!%p1961_p11)
}
  0x15   : > { %s1965_s24 = scalar_lea.vmem %s271_s12, 3072  ;;  %p1973_p1 = scmp.lt.s32.totalorder %s271_s12, %s271_s12 }
  0x16   : > { %p1966_p12 = scmp.ne.s32.totalorder %s271_s12, %s1965_s24  ;;  %p1974_p4 = scmp.lt.s32.totalorder %s1965_s24, %s1965_s24 }
  0x18   : > { %p1968_p13 = pnand %p1966_p12, %p1954_p7  ;;  %p1975_p3 = por %p1974_p4, %p1973_p1 }
  0x1a   : > { %p1969_p0 = pneg %p1968_p13 }
  0x1c   : > { %p1976_p2 = pnand %p1975_p3, %p1969_p0 }
  0x1e   : > { %1979 = shalt.err (!%p1976_p2)
}
  0x1f   : > { %s2026_s25 = smov 192   ;;  %s2027_s26 = smov 12  }
  0x20   : > { %1793 = dma.hbm_to_vmem [thread:$0]  (!%p2100_p5), %s2278_s5, 3072, %s271_s12, [#allocation3], %s2026_s25, %s2026_s25, %s2027_s26  }
  0x21   : > { %s1980_s14 = scalar_lea.hbm %s2280_s7, 9216 }
  0x22   : > { %p1981_p6 = scmp.ne.s32.totalorder %s2280_s7, %s1980_s14  ;;  %p1987_p8 = scmp.lt.u32.totalorder %s1980_s14, %s2280_s7 }
  0x24   : > { %p1983_p2 = pnand %p1981_p6, %p1954_p7 }
  0x26   : > { %p1984_p3 = pneg %p1983_p2 }
  0x28   : > { %p1989_p9 = pnand %p1987_p8, %p1984_p3 }
  0x2a   : > { %1992 = shalt.err (!%p1989_p9)
}
  0x2b   : > { %s1993_s12 = scalar_lea.vmem %s2104_s15, 9216  ;;  %p2001_p13 = scmp.lt.s32.totalorder %s2104_s15, %s2104_s15 }
  0x2c   : > { %p1994_p10 = scmp.ne.s32.totalorder %s2104_s15, %s1993_s12  ;;  %p2002_p0 = scmp.lt.s32.totalorder %s1993_s12, %s1993_s12 }
  0x2e   : > { %p1996_p11 = pnand %p1994_p10, %p1954_p7  ;;  %p2003_p1 = por %p2002_p0, %p2001_p13 }
  0x30   : > { %p1997_p12 = pneg %p1996_p11 }
  0x32   : > { %p2004_p4 = pnand %p2003_p1, %p1997_p12 }
  0x34   : > { %2007 = shalt.err (!%p2004_p4)
}
  0x35   : > { %1796 = dma.hbm_to_vmem [thread:$0]  (!%p2100_p5), %s2280_s7, 9216, %s2104_s15, [#allocation5], %s2026_s25, %s2026_s25, %s2027_s26  }
  0x36   : > { %p2287_p6 = scmp.ne.s32.totalorder %s2285_s13, 0 }
  0x37   : > { %p2288_p2 = scmp.eq.s32.totalorder (!%p2287_p6), %s2087_s10, 0 }
  0x38   : > { %312 = sbr.rel (%p2287_p6) target bundleno = 979 (0x3d3), region = 56 }
  0x3f   : > { %2013 = dma.done.wait (%p2288_p2), [#allocation3], 3072   ;;  %p2289_p7 = pmov %p2288_p2 }
  0x40   : > { %p2290_p3 = pmov %p2288_p2 }
  0x41   : > { %2015 = vsyncadd (%p2289_p7), [#allocation3], 4294964224 }
  0x42   : > { %2017 = dma.done.wait (%p2290_p3), [#allocation5], 9216   ;;  %p2291_p8 = pmov %p2288_p2 }
  0x43   : > { %p351_p9 = scmp.lt.s32.totalorder %s2087_s10, 3  ;;  %v2028_v0 = vmov 0.0   ;;  %vm2029_vm0 = vmmov 0   ;;  %vm375_vm1 = vcmask 1043456   ;;  %v363_v1 = vld [vmem:[%s2274_s1] sm:$0xf] }
  0x44   : > { %2019 = vsyncadd (%p2291_p8), [#allocation5], 4294958080  ;;  %1709 = vmatprep.subr.bf16.mxu0 %v2028_v0  ;;  %1711 = vmatprep.mubr.msk.bf16.mxu0 %vm2029_vm0, %v2028_v0  ;;  %v377_v3 = vsel %vm375_vm1, %v363_v1, 0  ;;  %v1816_v5 = vld [vmem:[%s2276_s3] sm:$0xff]   ;;  %vm371_vm2 = vcmask 64512   ;;  %v1817_v6 = vld [vmem:[%s2276_s3 + $0x8] sm:$0xff]  }
  0x45   : > { %s2293_s10 = smov (!%p351_p9, %s2087_s10), 3  ;;  %1715 = vmatprep.subr.bf16.mxu1 %v2028_v0  ;;  %1731 = vmatprep.mubr.msk.bf16.mxu1 %vm2029_vm0, %v2028_v0  ;;  %v1818_v7 = vld [vmem:[%s2276_s3 + $0x10] sm:$0xff]   ;;  %v1819_v8 = vld [vmem:[%s2276_s3 + $0x18] sm:$0xff]   ;;  %v1820_v9 = vld [vmem:[%s2276_s3 + $0x20] sm:$0xff]   ;;  %v2030_v46 = vmov 0  }
  0x46   : > { %s1547_s13 = sshll.u32 %s2293_s10, 3  ;;  %1710 = vmatpush3.bf16.msra.mxu0 %v377_v3  ;;  %1716 = vmatpush3.bf16.msra.mxu1 %v1816_v5  ;;  %v1821_v10 = vld [vmem:[%s2276_s3 + $0x28] sm:$0xff]   ;;  %v1822_v11 = vld [vmem:[%s2276_s3 + $0x30] sm:$0xff]   ;;  %v1823_v12 = vld [vmem:[%s2276_s3 + $0x38] sm:$0xff]   ;;  %s1781_s14 = smul.u32 24, %s2293_s10 }
  0x47   : > { %s354_s23 = scalar_lea.vmem %s2273_s0, %s1547_s13  ;;  %1717 = vmatprep.subr.bf16.mxu1 %v2028_v0  ;;  %v1824_v13 = vld [vmem:[#allocation2] ss:$12 sps:$4 sm:$0xff]   ;;  %v1826_v14 = vld [vmem:[#allocation2 + $0x4] ss:$12 sps:$4 sm:$0xff]   ;;  %v1830_v15 = vld [vmem:[#allocation2 + $0x1c] ss:$12 sps:$4 sm:$0xff]  }
  0x48   : > { %v361_v2 = vld [vmem:[%s354_s23] sm:$0xff]  ;;  %715 = vmatprep.subr.bf16.mxu0 %v1826_v14  ;;  %v1832_v18 = vld [vmem:[#allocation2 + $0x30] ss:$12 sps:$4 sm:$0xff]   ;;  %v1838_v19 = vld [vmem:[#allocation2 + $0x4c] ss:$12 sps:$4 sm:$0xff]   ;;  %s359_s19 = scalar_lea.vmem %s2282_s9, %s1781_s14 }
  0x49   : > { %v362_v4 = vpack.c.bf16 %v361_v2, %v361_v2  ;;  %v1828_v16 = vld [vmem:[#allocation2 + $0x18] ss:$12 sps:$4 sm:$0xff]   ;;  %v1834_v17 = vld [vmem:[#allocation2 + $0x34] ss:$12 sps:$4 sm:$0xff]   ;;  %v1846_v23 = vld [vmem:[#allocation2 + $0x7c] ss:$12 sps:$4 sm:$0xff]  }
  0x4a   : > { %1718 = vmatpush3.bf16.msra.mxu1 %v1817_v6  ;;  %v1836_v20 = vld [vmem:[#allocation2 + $0x48] ss:$12 sps:$4 sm:$0xff]   ;;  %v1842_v21 = vld [vmem:[#allocation2 + $0x64] ss:$12 sps:$4 sm:$0xff]   ;;  %v1840_v22 = vld [vmem:[#allocation2 + $0x60] ss:$12 sps:$4 sm:$0xff]  }
  0x4b   : > { %1712 = vmatmul.mubr.msk.bf16.vlgmr.msra.gmra.mrb[0].mxu0 %vm371_vm2, %v362_v4  ;;  %1719 = vmatprep.subr.bf16.mxu1 %v2028_v0  ;;  %v1844_v24 = vld [vmem:[#allocation2 + $0x78] ss:$12 sps:$4 sm:$0xff]   ;;  %v1549_v25 = vld [vmem:[%s2275_s2] ss:$0 sm:$0xff]  ;;  %v1827_v33 = vld [vmem:[#allocation2 + $0x8] ss:$12 sps:$4 sm:$0xff]  }
  0x4c   : > { %716 = vmatpush1.bf16.msra.mxu0 %v1824_v13  ;;  %v1831_v35 = vld [vmem:[#allocation2 + $0x20] ss:$12 sps:$4 sm:$0xff]   ;;  %v1835_v36 = vld [vmem:[#allocation2 + $0x38] ss:$12 sps:$4 sm:$0xff]   ;;  %v1839_v37 = vld [vmem:[#allocation2 + $0x50] ss:$12 sps:$4 sm:$0xff]   ;;  %747 = vmatprep.mubr.bf16.mxu0 %v2030_v46 }
  0x4d   : > { %717 = vmatprep.subr.bf16.mxu0 %v1830_v15  ;;  %v1843_v38 = vld [vmem:[#allocation2 + $0x68] ss:$12 sps:$4 sm:$0xff]   ;;  %v1847_v39 = vld [vmem:[#allocation2 + $0x80] ss:$12 sps:$4 sm:$0xff]   ;;  %v1848_v41 = vld [vmem:[#allocation2 + $0x90] ss:$12 sps:$4 sm:$0xff]  }
  0x4e   : > { %1720 = vmatpush3.bf16.msra.mxu1 %v1818_v7  ;;  %v1850_v40 = vld [vmem:[#allocation2 + $0x94] ss:$12 sps:$4 sm:$0xff]   ;;  %v1851_v42 = vld [vmem:[#allocation2 + $0x98] ss:$12 sps:$4 sm:$0xff]   ;;  %v1855_v45 = vld [vmem:[#allocation2 + $0xb0] ss:$12 sps:$4 sm:$0xff]  }
  0x4f   : > { %1721 = vmatprep.subr.bf16.mxu1 %v2028_v0  ;;  %v1854_v43 = vld [vmem:[#allocation2 + $0xac] ss:$12 sps:$4 sm:$0xff]   ;;  %v1852_v44 = vld [vmem:[#allocation2 + $0xa8] ss:$12 sps:$4 sm:$0xff]   ;;  %v1858_v47 = vld [vmem:[#allocation4 + $0x4] ss:$12 sps:$4 sm:$0xff]  }
  0x50   : > { %718 = vmatpush1.bf16.msra.mxu0 %v1828_v16  ;;  %v1883_v48 = vld [vmem:[#allocation4 + $0xc8] ss:$12 sps:$4 sm:$0xff]   ;;  %v1551_v49 = vld [vmem:[%s2277_s4] ss:$0 sm:$0xff]  ;;  %v1859_v62 = vld [vmem:[#allocation4 + $0x18] ss:$12 sps:$4 sm:$0xff]  }
  0x51   : > { %719 = vmatprep.subr.bf16.mxu0 %v1834_v17  ;;  %v1856_v57 = vld [vmem:[#allocation4] ss:$12 sps:$4 sm:$0xff]   ;;  %v1884_v58 = vld [vmem:[#allocation4 + $0x8] ss:$12 sps:$4 sm:$0xff]   ;;  %v1893_v2 = vld [vmem:[#allocation4 + $0xf8] ss:$12 sps:$4 sm:$0xff]  }
  0x52   : > { %1722 = vmatpush3.bf16.msra.mxu1 %v1819_v8  ;;  %v1861_v60 = vld [vmem:[#allocation4 + $0x1c] ss:$12 sps:$4 sm:$0xff]   ;;  %v1888_v61 = vld [vmem:[#allocation4 + $0xe0] ss:$12 sps:$4 sm:$0xff]   ;;  %v1894_v4 = vld [vmem:[#allocation4 + $0x38] ss:$12 sps:$4 sm:$0xff]  }
  0x53   : > { %1723 = vmatprep.subr.bf16.mxu1 %v2028_v0  ;;  %v1889_v63 = vld [vmem:[#allocation4 + $0x20] ss:$12 sps:$4 sm:$0xff]   ;;  %v1862_v3 = vld [vmem:[#allocation4 + $0x30] ss:$12 sps:$4 sm:$0xff]   ;;  %v1865_v7 = vld [vmem:[#allocation4 + $0x48] ss:$12 sps:$4 sm:$0xff]  }
  0x54   : > { %720 = vmatpush1.bf16.msra.mxu0 %v1832_v18  ;;  %v1864_v1 = vld [vmem:[#allocation4 + $0x34] ss:$12 sps:$4 sm:$0xff]   ;;  %v1867_v5 = vld [vmem:[#allocation4 + $0x4c] ss:$12 sps:$4 sm:$0xff]   ;;  %v1898_v6 = vld [vmem:[#allocation4 + $0x110] ss:$12 sps:$4 sm:$0xff]  }
  0x55   : > { %721 = vmatprep.subr.bf16.mxu0 %v1838_v19  ;;  %v1899_v8 = vld [vmem:[#allocation4 + $0x50] ss:$12 sps:$4 sm:$0xff]   ;;  %v1908_v14 = vld [vmem:[#allocation4 + $0x140] ss:$12 sps:$4 sm:$0xff]   ;;  %v1871_v15 = vld [vmem:[#allocation4 + $0x78] ss:$12 sps:$4 sm:$0xff]  }
  0x56   : > { %1724 = vmatpush3.bf16.msra.mxu1 %v1820_v9  ;;  %v1870_v9 = vld [vmem:[#allocation4 + $0x64] ss:$12 sps:$4 sm:$0xff]   ;;  %v1873_v13 = vld [vmem:[#allocation4 + $0x7c] ss:$12 sps:$4 sm:$0xff]   ;;  %v1909_v16 = vld [vmem:[#allocation4 + $0x80] ss:$12 sps:$4 sm:$0xff]  }
  0x57   : > { %1725 = vmatprep.subr.bf16.mxu1 %v2028_v0  ;;  %v1876_v17 = vld [vmem:[#allocation4 + $0x94] ss:$12 sps:$4 sm:$0xff]   ;;  %v1913_v18 = vld [vmem:[#allocation4 + $0x158] ss:$12 sps:$4 sm:$0xff]   ;;  %v1874_v19 = vld [vmem:[#allocation4 + $0x90] ss:$12 sps:$4 sm:$0xff]  }
  0x58   : > { %722 = vmatpush1.bf16.msra.mxu0 %v1836_v20  ;;  %v1914_v20 = vld [vmem:[#allocation4 + $0x98] ss:$12 sps:$4 sm:$0xff]  }
  0x59   : > { %723 = vmatprep.subr.bf16.mxu0 %v1842_v21  ;;  %v1879_v21 = vld [vmem:[#allocation4 + $0xac] ss:$12 sps:$4 sm:$0xff]  }
  0x5a   : > { %1726 = vmatpush3.bf16.msra.mxu1 %v1821_v10  ;;  %v1903_v10 = vld [vmem:[#allocation4 + $0x128] ss:$12 sps:$4 sm:$0xff]  }
  0x5b   : > { %1727 = vmatprep.subr.bf16.mxu1 %v2028_v0 }
  0x5c   : > { %724 = vmatpush1.bf16.msra.mxu0 %v1840_v22  ;;  %v1877_v22 = vld [vmem:[#allocation4 + $0xa8] ss:$12 sps:$4 sm:$0xff]  }
  0x5d   : > { %725 = vmatprep.subr.bf16.mxu0 %v1846_v23  ;;  %v1882_v23 = vld [vmem:[#allocation4 + $0xc4] ss:$12 sps:$4 sm:$0xff]  }
  0x5e   : > { %1728 = vmatpush3.bf16.msra.mxu1 %v1822_v11  ;;  %v1868_v11 = vld [vmem:[#allocation4 + $0x60] ss:$12 sps:$4 sm:$0xff]  }
  0x5f   : > { %1729 = vmatprep.subr.bf16.mxu1 %v2028_v0 }
  0x60   : > { %726 = vmatpush1.bf16.msra.mxu0 %v1844_v24  ;;  %v1880_v24 = vld [vmem:[#allocation4 + $0xc0] ss:$12 sps:$4 sm:$0xff]  }
  0x61   : > { %727 = vmatprep.subr.bf16.mxu0 %v1850_v40  ;;  %v1919_v40 = vld [vmem:[#allocation4 + $0xb0] ss:$12 sps:$4 sm:$0xff]  }
  0x62   : > { %1730 = vmatpush3.bf16.msra.mxu1 %v1823_v12  ;;  %v1904_v12 = vld [vmem:[#allocation4 + $0x68] ss:$12 sps:$4 sm:$0xff]  }
  0x63   : > { %1735 = vmatprep.subr.bf16.mxu1 %v2028_v0 }
  0x64   : > { %728 = vmatpush1.bf16.msra.mxu0 %v1848_v41  ;;  %v1922_v41 = vld [vmem:[#allocation4 + $0x184] ss:$12 sps:$4 sm:$0xff]  }
  0x65   : > { %729 = vmatprep.subr.bf16.mxu0 %v1854_v43 }
  0x68   : > { %730 = vmatpush1.bf16.msra.mxu0 %v1852_v44 }
  0x69   : > { %1296 = vmatprep.subr.bf16.mxu0 %v1858_v47 }
 0x11e   : > { %v413_v26 = vpop.f32.mrb[0].mxu0 }
 0x11f   : > { %v414_v27 = vadd.f32 %v1549_v25, %v413_v26  ;;  %v1713_v28 = vpop.f32.mrb[1].mxu0  ;;  %v1887_v25 = vld [vmem:[#allocation4 + $0xdc] ss:$12 sps:$4 sm:$0xff]   ;;  %v1885_v26 = vld [vmem:[#allocation4 + $0xd8] ss:$12 sps:$4 sm:$0xff]  }
 0x120   : > { %v416_v29 = vpop.f32.mrb[2].mxu0  ;;  %v1890_v28 = vld [vmem:[#allocation4 + $0xf0] ss:$12 sps:$4 sm:$0xff]  }
 0x121   : > { %vm419_vm3 = vcmp.ge.f32.partialorder %v414_v27, 0.0  ;;  %v420_v30 = vmul.f32 0.01, %v414_v27  ;;  %v1714_v31 = vpop.f32.mrb[3].mxu0  ;;  %v1897_v29 = vld [vmem:[#allocation4 + $0x10c] ss:$12 sps:$4 sm:$0xff]  }
 0x122   : > { %v1902_v31 = vld [vmem:[#allocation4 + $0x124] ss:$12 sps:$4 sm:$0xff]  }
 0x123   : > { %v421_v32 = vsel %vm419_vm3, %v414_v27, %v420_v30  ;;  %v1892_v27 = vld [vmem:[#allocation4 + $0xf4] ss:$12 sps:$4 sm:$0xff]  }
 0x124   : > { %v422_v34 = vpack.c.bf16 %v421_v32, %v421_v32  ;;  %v1895_v30 = vld [vmem:[#allocation4 + $0x108] ss:$12 sps:$4 sm:$0xff]   ;;  %v1900_v32 = vld [vmem:[#allocation4 + $0x120] ss:$12 sps:$4 sm:$0xff]  }
 0x126   : > { %1732 = vmatmul.mubr.bf16.vlgmr.msra.gmra.mrb[0].mxu1 %v422_v34  ;;  %v1905_v34 = vld [vmem:[#allocation4 + $0x138] ss:$12 sps:$4 sm:$0xff]  }
 0x127   : > { %1736 = vmatpush3.bf16.msra.mxu1 %v1827_v33  ;;  %1751 = vmatprep.mubr.msk.bf16.mxu1 %vm2029_vm0, %v2028_v0  ;;  %v1907_v33 = vld [vmem:[#allocation4 + $0x13c] ss:$12 sps:$4 sm:$0xff]  }
 0x128   : > { %1737 = vmatprep.subr.bf16.mxu1 %v2028_v0 }
 0x12b   : > { %1738 = vmatpush3.bf16.msra.mxu1 %v1831_v35  ;;  %v1912_v35 = vld [vmem:[#allocation4 + $0x154] ss:$12 sps:$4 sm:$0xff]  }
 0x12c   : > { %1739 = vmatprep.subr.bf16.mxu1 %v2028_v0 }
 0x12f   : > { %1740 = vmatpush3.bf16.msra.mxu1 %v1835_v36  ;;  %v1910_v36 = vld [vmem:[#allocation4 + $0x150] ss:$12 sps:$4 sm:$0xff]  }
 0x130   : > { %1741 = vmatprep.subr.bf16.mxu1 %v2028_v0 }
 0x133   : > { %1742 = vmatpush3.bf16.msra.mxu1 %v1839_v37  ;;  %v1917_v37 = vld [vmem:[#allocation4 + $0x16c] ss:$12 sps:$4 sm:$0xff]  }
 0x134   : > { %1743 = vmatprep.subr.bf16.mxu1 %v2028_v0 }
 0x137   : > { %1744 = vmatpush3.bf16.msra.mxu1 %v1843_v38  ;;  %v1918_v38 = vld [vmem:[#allocation4 + $0x170] ss:$12 sps:$4 sm:$0xff]  }
 0x138   : > { %1745 = vmatprep.subr.bf16.mxu1 %v2028_v0 }
 0x13b   : > { %1746 = vmatpush3.bf16.msra.mxu1 %v1847_v39  ;;  %v1915_v39 = vld [vmem:[#allocation4 + $0x168] ss:$12 sps:$4 sm:$0xff]  }
 0x13c   : > { %1747 = vmatprep.subr.bf16.mxu1 %v2028_v0 }
 0x13f   : > { %1748 = vmatpush3.bf16.msra.mxu1 %v1851_v42  ;;  %v572_v42 = vlaneseq }
 0x140   : > { %1749 = vmatprep.subr.bf16.mxu1 %v2028_v0 }
 0x141   : > { %v2229_v43 = vshrl.u32 %v572_v42, 7 }
 0x143   : > { %1750 = vmatpush3.bf16.msra.mxu1 %v1855_v45  ;;  %v574_v44 = vsub.s32 0, %v2229_v43  ;;  %v2235_v45 = vld [vmem:[%s2279_s6] sm:$0x7]  ;;  %v578_v47 = vsub.s32 1, %v2229_v43 }
 0x144   : > { %1678 = vmatprep.subr.bf16.mxu1 %v1883_v48 }
 0x145   : > { %v575_v48 = vrot.slane %v2235_v45, %v574_v44 }
 0x1f9   : > { %v528_v50 = vpop.f32.mrb[0].mxu1 }
 0x1fa   : > { %v529_v51 = vadd.f32 %v1551_v49, %v528_v50  ;;  %v1733_v52 = vpop.f32.mrb[1].mxu1  ;;  %v579_v49 = vrot.slane %v2235_v45, %v578_v47 }
 0x1fb   : > { %v531_v53 = vpop.f32.mrb[2].mxu1 }
 0x1fc   : > { %vm534_vm4 = vcmp.ge.f32.partialorder %v529_v51, 0.0  ;;  %v535_v54 = vmul.f32 0.01, %v529_v51  ;;  %v1734_v55 = vpop.f32.mrb[3].mxu1 }
 0x1fe   : > { %v536_v56 = vsel %vm534_vm4, %v529_v51, %v535_v54 }
 0x1ff   : > { %v537_v59 = vpack.c.bf16 %v536_v56, %v536_v56 }
 0x201   : > { %748 = vmatmul.mubr.bf16.vlgmr.msra.gmra.mrb[4].mxu0 %v537_v59  ;;  %1752 = vmatmul.mubr.bf16.vlgmr.msra.gmra.mrb[4].mxu1 %v537_v59 }
 0x202   : > { %1297 = vmatpush1.bf16.msra.mxu0 %v1856_v57  ;;  %1679 = vmatpush3.bf16.msra.mxu1 %v1884_v58 }
 0x203   : > { %1298 = vmatprep.subr.bf16.mxu0 %v1861_v60  ;;  %1680 = vmatprep.subr.bf16.mxu1 %v1888_v61  ;;  %v1920_v61 = vld [vmem:[#allocation4 + $0x180] ss:$12 sps:$4 sm:$0xff]  }
 0x206   : > { %1299 = vmatpush1.bf16.msra.mxu0 %v1859_v62  ;;  %1681 = vmatpush3.bf16.msra.mxu1 %v1889_v63  ;;  %v1923_v62 = vld [vmem:[#allocation4 + $0x188] ss:$12 sps:$4 sm:$0xff]  }
 0x207   : > { %1300 = vmatprep.subr.bf16.mxu0 %v1864_v1  ;;  %1682 = vmatprep.subr.bf16.mxu1 %v1893_v2  ;;  %v1926_v1 = vld [vmem:[#allocation4 + $0x19c] ss:$12 sps:$4 sm:$0xff]   ;;  %v1924_v2 = vld [vmem:[#allocation4 + $0x198] ss:$12 sps:$4 sm:$0xff]  }
 0x20a   : > { %1301 = vmatpush1.bf16.msra.mxu0 %v1862_v3  ;;  %1683 = vmatpush3.bf16.msra.mxu1 %v1894_v4  ;;  %v1927_v3 = vld [vmem:[#allocation4 + $0x1a0] ss:$12 sps:$4 sm:$0xff]  }
 0x20b   : > { %1302 = vmatprep.subr.bf16.mxu0 %v1867_v5  ;;  %1684 = vmatprep.subr.bf16.mxu1 %v1898_v6  ;;  %v1930_v4 = vld [vmem:[#allocation4 + $0x1b4] ss:$12 sps:$4 sm:$0xff]   ;;  %v1928_v5 = vld [vmem:[#allocation4 + $0x1b0] ss:$12 sps:$4 sm:$0xff]   ;;  %v1931_v6 = vld [vmem:[#allocation4 + $0x1b8] ss:$12 sps:$4 sm:$0xff]  }
 0x20e   : > { %1303 = vmatpush1.bf16.msra.mxu0 %v1865_v7  ;;  %1685 = vmatpush3.bf16.msra.mxu1 %v1899_v8  ;;  %v1934_v7 = vld [vmem:[#allocation4 + $0x1cc] ss:$12 sps:$4 sm:$0xff]   ;;  %v1932_v8 = vld [vmem:[#allocation4 + $0x1c8] ss:$12 sps:$4 sm:$0xff]  }
 0x20f   : > { %1304 = vmatprep.subr.bf16.mxu0 %v1870_v9  ;;  %1686 = vmatprep.subr.bf16.mxu1 %v1903_v10  ;;  %v1935_v9 = vld [vmem:[#allocation4 + $0x1d0] ss:$12 sps:$4 sm:$0xff]  }
 0x210   : > { %v1938_v10 = vld [vmem:[#allocation4 + $0x1e4] ss:$12 sps:$4 sm:$0xff]  }
 0x212   : > { %1305 = vmatpush1.bf16.msra.mxu0 %v1868_v11  ;;  %1687 = vmatpush3.bf16.msra.mxu1 %v1904_v12  ;;  %v1939_v11 = vld [vmem:[#allocation4 + $0x1e8] ss:$12 sps:$4 sm:$0xff]  }
 0x213   : > { %1306 = vmatprep.subr.bf16.mxu0 %v1873_v13  ;;  %1688 = vmatprep.subr.bf16.mxu1 %v1908_v14  ;;  %v1942_v12 = vld [vmem:[#allocation4 + $0x1fc] ss:$12 sps:$4 sm:$0xff]   ;;  %v1940_v13 = vld [vmem:[#allocation4 + $0x1f8] ss:$12 sps:$4 sm:$0xff]   ;;  %v1943_v14 = vld [vmem:[#allocation4 + $0x200] ss:$12 sps:$4 sm:$0xff]  }
 0x216   : > { %1307 = vmatpush1.bf16.msra.mxu0 %v1871_v15  ;;  %1689 = vmatpush3.bf16.msra.mxu1 %v1909_v16  ;;  %v582_v15 = vsub.s32 2, %v2229_v43  ;;  %v1946_v16 = vld [vmem:[#allocation4 + $0x214] ss:$12 sps:$4 sm:$0xff]  }
 0x217   : > { %1308 = vmatprep.subr.bf16.mxu0 %v1876_v17  ;;  %1690 = vmatprep.subr.bf16.mxu1 %v1913_v18  ;;  %v1944_v17 = vld [vmem:[#allocation4 + $0x210] ss:$12 sps:$4 sm:$0xff]   ;;  %v1947_v18 = vld [vmem:[#allocation4 + $0x218] ss:$12 sps:$4 sm:$0xff]  }
 0x21a   : > { %1309 = vmatpush1.bf16.msra.mxu0 %v1874_v19  ;;  %1691 = vmatpush3.bf16.msra.mxu1 %v1914_v20  ;;  %v583_v19 = vrot.slane %v2235_v45, %v582_v15  ;;  %v1950_v20 = vld [vmem:[#allocation4 + $0x22c] ss:$12 sps:$4 sm:$0xff]  }
 0x21b   : > { %1310 = vmatprep.subr.bf16.mxu0 %v1879_v21  ;;  %1692 = vmatprep.subr.bf16.mxu1 %v1918_v38  ;;  %v1948_v21 = vld [vmem:[#allocation4 + $0x228] ss:$12 sps:$4 sm:$0xff]  }
 0x21e   : > { %1311 = vmatpush1.bf16.msra.mxu0 %v1877_v22  ;;  %1693 = vmatpush3.bf16.msra.mxu1 %v1919_v40  ;;  %v1951_v22 = vld [vmem:[#allocation4 + $0x230] ss:$12 sps:$4 sm:$0xff]  }
 0x21f   : > { %1312 = vmatprep.subr.bf16.mxu0 %v1882_v23  ;;  %1755 = vmatprep.subr.bf16.mxu1 %v2028_v0 }
 0x222   : > { %1313 = vmatpush1.bf16.msra.mxu0 %v1880_v24 }
 0x223   : > { %1314 = vmatprep.subr.bf16.mxu0 %v1887_v25 }
 0x226   : > { %1315 = vmatpush1.bf16.msra.mxu0 %v1885_v26 }
 0x227   : > { %1316 = vmatprep.subr.bf16.mxu0 %v1892_v27 }
 0x22a   : > { %1317 = vmatpush1.bf16.msra.mxu0 %v1890_v28 }
 0x22b   : > { %1318 = vmatprep.subr.bf16.mxu0 %v1897_v29 }
 0x22e   : > { %1319 = vmatpush1.bf16.msra.mxu0 %v1895_v30  ;;  %v895_v30 = vld [vmem:[%s2281_s8] sm:$0x7] }
 0x22f   : > { %1320 = vmatprep.subr.bf16.mxu0 %v1902_v31  ;;  %v908_v31 = vrot.slane %v895_v30, %v582_v15 }
 0x232   : > { %1321 = vmatpush1.bf16.msra.mxu0 %v1900_v32  ;;  %v900_v32 = vrot.slane %v895_v30, %v574_v44 }
 0x233   : > { %1322 = vmatprep.subr.bf16.mxu0 %v1907_v33 }
 0x236   : > { %1323 = vmatpush1.bf16.msra.mxu0 %v1905_v34 }
 0x237   : > { %1324 = vmatprep.subr.bf16.mxu0 %v1912_v35 }
 0x23a   : > { %1325 = vmatpush1.bf16.msra.mxu0 %v1910_v36 }
 0x23b   : > { %1326 = vmatprep.subr.bf16.mxu0 %v1917_v37 }
 0x23e   : > { %1327 = vmatpush1.bf16.msra.mxu0 %v1915_v39 }
 0x23f   : > { %1337 = vmatprep.subr.bf16.mxu0 %v1922_v41 }
 0x2d4   : > { %v749_v50 = vpop.f32.mrb[4].mxu0  ;;  %v2244_v51 = vpop.f32.mrb[4].mxu1 }
 0x2d5   : > { %v750_v52 = vadd.f32 %v749_v50, %v575_v48  ;;  %v751_v53 = vpop.f32.mrb[5].mxu0  ;;  %v1753_v54 = vpop.f32.mrb[5].mxu1  ;;  %v791_v23 = vadd.f32 %v2244_v51, %v583_v19 }
 0x2d6   : > { %v752_v55 = vadd.f32 %v751_v53, %v579_v49  ;;  %v753_v56 = vpop.f32.mrb[6].mxu0  ;;  %v793_v57 = vpop.f32.mrb[6].mxu1 }
 0x2d7   : > { %v754_v58 = vpop.f32.mrb[7].mxu0  ;;  %v1754_v59 = vpop.f32.mrb[7].mxu1  ;;  %v796_v63 = vpack.c.bf16 %v750_v52, %v750_v52  ;;  %v798_v24 = vpack.c.bf16 %v791_v23, %v791_v23 }
 0x2d8   : > { %v797_v60 = vpack.c.bf16 %v752_v55, %v752_v55 }
 0x2da   : > { %1328 = vmatprep.mubr.bf16.mxu0 %v797_v60  ;;  %1410 = vmatprep.mubr.bf16.mxu1 %v797_v60 }
 0x2db   : > { %1329 = vmatmul.mubr.bf16.vlgmr.msra.gmra.mrb[8].mxu0 %v796_v63  ;;  %1411 = vmatmul.mubr.bf16.vlgmr.msra.gmra.mrb[8].mxu1 %v796_v63 }
 0x2dc   : > { %1338 = vmatpush1.bf16.msra.mxu0 %v1920_v61  ;;  %1756 = vmatpush3.bf16.msra.mxu1 %v1923_v62 }
 0x2dd   : > { %1339 = vmatprep.subr.bf16.mxu0 %v1926_v1  ;;  %1757 = vmatprep.subr.bf16.mxu1 %v2028_v0 }
 0x2de   : > { %1369 = vmatprep.mubr.bf16.mxu0 %v2030_v46  ;;  %1771 = vmatprep.mubr.msk.bf16.mxu1 %vm2029_vm0, %v2028_v0  ;;  %v1936_v46 = vld [vmem:[#allocation4 + $0x1e0] ss:$12 sps:$4 sm:$0xff]  }
 0x2e0   : > { %1340 = vmatpush1.bf16.msra.mxu0 %v1924_v2  ;;  %1758 = vmatpush3.bf16.msra.mxu1 %v1927_v3 }
 0x2e1   : > { %1341 = vmatprep.subr.bf16.mxu0 %v1930_v4  ;;  %1759 = vmatprep.subr.bf16.mxu1 %v2028_v0 }
 0x2e4   : > { %1342 = vmatpush1.bf16.msra.mxu0 %v1928_v5  ;;  %1760 = vmatpush3.bf16.msra.mxu1 %v1931_v6 }
 0x2e5   : > { %1343 = vmatprep.subr.bf16.mxu0 %v1934_v7  ;;  %1761 = vmatprep.subr.bf16.mxu1 %v2028_v0 }
 0x2e8   : > { %1344 = vmatpush1.bf16.msra.mxu0 %v1932_v8  ;;  %1762 = vmatpush3.bf16.msra.mxu1 %v1935_v9 }
 0x2e9   : > { %1345 = vmatprep.subr.bf16.mxu0 %v1938_v10  ;;  %1763 = vmatprep.subr.bf16.mxu1 %v2028_v0 }
 0x2ec   : > { %1346 = vmatpush1.bf16.msra.mxu0 %v1936_v46  ;;  %1764 = vmatpush3.bf16.msra.mxu1 %v1939_v11 }
 0x2ed   : > { %1347 = vmatprep.subr.bf16.mxu0 %v1942_v12  ;;  %1765 = vmatprep.subr.bf16.mxu1 %v2028_v0 }
 0x2f0   : > { %1348 = vmatpush1.bf16.msra.mxu0 %v1940_v13  ;;  %1766 = vmatpush3.bf16.msra.mxu1 %v1943_v14 }
 0x2f1   : > { %1349 = vmatprep.subr.bf16.mxu0 %v1946_v16  ;;  %1767 = vmatprep.subr.bf16.mxu1 %v2028_v0 }
 0x2f4   : > { %1350 = vmatpush1.bf16.msra.mxu0 %v1944_v17  ;;  %1768 = vmatpush3.bf16.msra.mxu1 %v1947_v18 }
 0x2f5   : > { %1351 = vmatprep.subr.bf16.mxu0 %v1950_v20  ;;  %1769 = vmatprep.subr.bf16.mxu1 %v2028_v0  ;;  %v904_v0 = vrot.slane %v895_v30, %v578_v47 }
 0x2f8   : > { %1352 = vmatpush1.bf16.msra.mxu0 %v1948_v21  ;;  %1770 = vmatpush3.bf16.msra.mxu1 %v1951_v22 }
 0x2fb   : > { %1370 = vmatmul.mubr.bf16.vlgmr.msra.gmra.mrb[8].mxu0 %v798_v24  ;;  %1772 = vmatmul.mubr.bf16.vlgmr.msra.gmra.mrb[12].mxu1 %v798_v24 }
 0x3ae   : > { %v1694_v25 = vpop.f32.mrb[8].mxu1 }
 0x3af   : > { %v1695_v26 = vpop.f32.mrb[9].mxu1 }
 0x3b0   : > { %v1696_v27 = vadd.f32 %v1695_v26, %v1694_v25  ;;  %v1697_v28 = vpop.f32.mrb[10].mxu1 }
 0x3b1   : > { %v1698_v29 = vpop.f32.mrb[11].mxu1 }
 0x3b2   : > { %v1413_v33 = vadd.f32 %v1696_v27, %v908_v31 }
 0x3ce   : > { %v1371_v34 = vpop.f32.mrb[8].mxu0  ;;  %v1452_v35 = vpop.f32.mrb[12].mxu1 }
 0x3cf   : > { %v1775_v36 = vadd.f32 %v1371_v34, %v900_v32  ;;  %v1453_v37 = vadd.f32 %v1452_v35, %v1413_v33  ;;  %v1373_v38 = vpop.f32.mrb[9].mxu0  ;;  %v1773_v39 = vpop.f32.mrb[13].mxu1 }
 0x3d0   : > { %v1776_v40 = vadd.f32 %v1373_v38, %v904_v0  ;;  %v1375_v41 = vpop.f32.mrb[10].mxu0  ;;  %v1455_v42 = vpop.f32.mrb[14].mxu1 }
 0x3d1   : > { %1458 = vst [vmem:[%s359_s19] sm:$0xff] %v1775_v36  ;;  %1460 = vst [vmem:[%s359_s19 + $0x10] sm:$0xff] %v1453_v37  ;;  %v1376_v44 = vpop.f32.mrb[11].mxu0  ;;  %v1774_v45 = vpop.f32.mrb[15].mxu1 }
 0x3d2   : > { %1459 = vst [vmem:[%s359_s19 + $0x8] sm:$0xff] %v1776_v40 }
 0x3d3 PF: > { %s21_s30 = sadd.s32 1, %s2022_s30  }
 0x3d4   : > { %p18_p5 = scmp.ge.s32.totalorder %s21_s30, 6  }
 0x3d6   :  { %20 = sbr.rel (!%p18_p5) target bundleno = 2 (0x2), region = 95 }
 0x3dd   :  { %1482 = vsyncpa [#allocation3], 1 }
 0x3de   :  { %1484 = vsyncpa [#allocation3 + $0x1], 1 }
 0x3df   :  { %1485 = vsyncpa [#allocation5], 1 }

// kernel: _lambda_.4
= control target key start
LH: loop header
LB: loop body
LE: loop exit
PB: predicated region body
PF: predicated region fallthrough
CT: control target
= control target key end

     0   :  { %s1879_s24 = smov 0   ;;  %s2269_s0 = inlined_call_operand.vmem [shape: f32[4,8,384], index: 0, kind: input, shape index: {}]   ;;  %s2270_s1 = inlined_call_operand.vmem [shape: bf16[1,128,384], index: 1, kind: input, shape index: {}]   ;;  %s2271_s2 = inlined_call_operand.vmem [shape: f32[1,1,384], index: 2, kind: input, shape index: {}]   ;;  %s2272_s3 = inlined_call_operand.vmem [shape: bf16[2,128,384], index: 3, kind: input, shape index: {}]   ;;  %s2273_s4 = inlined_call_operand.vmem [shape: f32[2,1,384], index: 4, kind: input, shape index: {}]   ;;  %s2274_s5 = inlined_call_operand.vmem [shape: bf16[128,384], index: 5, kind: input, shape index: {}]   ;;  %s2275_s6 = inlined_call_operand.vmem [shape: f32[1,384], index: 6, kind: input, shape index: {}]   ;;  %s2276_s7 = inlined_call_operand.vmem [shape: f32[8,384], index: 7, kind: output, shape index: {}]  }
   0x1 LB: > { %s1885_s25 = sadd.s32 4294967295, %s1830_s24   ;;  %p1397_p0 = scmp.ge.s32.totalorder %s1830_s24, 1  ;;  %s1830_s24 = sphi %s1879_s24, %s17_s24  }
   0x2   : > { %p232_p1 = scmp.lt.s32.totalorder %s1830_s24, 5 }
   0x4   : > { %p233_p2 = pnand %p1397_p0, %p232_p1 }
   0x5   : > { %p259_p3 = scmp.lt.s32.totalorder (!%p233_p2), %s1885_s25, 3  ;;  %p1399_p4 = scmp.ne.s32.totalorder (!%p233_p2), %s1885_s25, 0 }
   0x6   : > { %236 = sbr.rel (%p233_p2) target bundleno = 827 (0x33b), region = 48 }
   0xd   : > { %s260_s26 = scalar_select %p259_p3, %s1885_s25, 3 }
   0xe   : > { %268 = sbr.rel (%p1399_p4) target bundleno = 21 (0x15), region = 52  ;;  %v1832_v0 = vmov (!%p1399_p4), 0.0  }
   0xf   : > { %s1660_s27 = smul.u32 24, %s260_s26  ;;  %269 = vst [vmem:[#allocation2] sm:$0xff] (!%p1399_p4), %v1832_v0  ;;  %270 = vst [vmem:[#allocation2 + $0x8] sm:$0xff] (!%p1399_p4), %v1832_v0 }
  0x11   : > { %s1894_s30 = scalar_lea.vmem %s2269_s0, %s1660_s27 }
  0x15 PF: > { %v1676_v1 = vld [vmem:[%s2272_s3 + $0x4] ss:$12 sps:$4 sm:$0xff]   ;;  %v1678_v2 = vld [vmem:[%s2272_s3] ss:$12 sps:$4 sm:$0xff]   ;;  %v1833_v3 = vmov 0.0   ;;  %v1834_v4 = vmov 0   ;;  %v310_v54 = vlaneseq }
  0x16   : > { %1572 = vmatprep.subr.bf16.mxu1 %v1833_v3  ;;  %485 = vmatprep.mubr.bf16.mxu0 %v1834_v4  ;;  %v1679_v5 = vld [vmem:[%s2272_s3 + $0x1c] ss:$12 sps:$4 sm:$0xff]   ;;  %vm1835_vm0 = vmmov 0   ;;  %v1681_v6 = vld [vmem:[%s2272_s3 + $0x18] ss:$12 sps:$4 sm:$0xff]   ;;  %p1509_p5 = scmp.ne.s32.totalorder %s1885_s25, 3 }
  0x17   : > { %453 = vmatprep.subr.bf16.mxu0 %v1676_v1  ;;  %1588 = vmatprep.mubr.msk.bf16.mxu1 %vm1835_vm0, %v1833_v3  ;;  %v1682_v7 = vld [vmem:[%s2272_s3 + $0x34] ss:$12 sps:$4 sm:$0xff]   ;;  %v1684_v8 = vld [vmem:[%s2272_s3 + $0x30] ss:$12 sps:$4 sm:$0xff]   ;;  %v1685_v9 = vld [vmem:[%s2272_s3 + $0x4c] ss:$12 sps:$4 sm:$0xff]  }
  0x18   : > { %454 = vmatpush1.bf16.msra.mxu0 %v1678_v2  ;;  %v1697_v10 = vld [vmem:[%s2272_s3 + $0x8] ss:$12 sps:$4 sm:$0xff]   ;;  %v1688_v12 = vld [vmem:[%s2272_s3 + $0x64] ss:$12 sps:$4 sm:$0xff]   ;;  %v1701_v13 = vld [vmem:[%s2272_s3 + $0x20] ss:$12 sps:$4 sm:$0xff]  }
  0x19   : > { %455 = vmatprep.subr.bf16.mxu0 %v1679_v5  ;;  %v1687_v11 = vld [vmem:[%s2272_s3 + $0x48] ss:$12 sps:$4 sm:$0xff]   ;;  %1573 = vmatpush3.bf16.msra.mxu1 %v1697_v10  ;;  %v1690_v14 = vld [vmem:[%s2272_s3 + $0x60] ss:$12 sps:$4 sm:$0xff]   ;;  %v1702_v16 = vld [vmem:[%s2272_s3 + $0x38] ss:$12 sps:$4 sm:$0xff]  }
  0x1a   : > { %1574 = vmatprep.subr.bf16.mxu1 %v1833_v3  ;;  %v1691_v15 = vld [vmem:[%s2272_s3 + $0x7c] ss:$12 sps:$4 sm:$0xff]   ;;  %v1693_v17 = vld [vmem:[%s2272_s3 + $0x78] ss:$12 sps:$4 sm:$0xff]   ;;  %v1694_v18 = vld [vmem:[%s2272_s3 + $0x94] ss:$12 sps:$4 sm:$0xff]  }
  0x1b   : > { %v1703_v19 = vld [vmem:[%s2272_s3 + $0x50] ss:$12 sps:$4 sm:$0xff]   ;;  %v1698_v21 = vld [vmem:[%s2272_s3 + $0xac] ss:$12 sps:$4 sm:$0xff]   ;;  %v1704_v22 = vld [vmem:[%s2272_s3 + $0x68] ss:$12 sps:$4 sm:$0xff]  }
  0x1c   : > { %456 = vmatpush1.bf16.msra.mxu0 %v1681_v6  ;;  %v1696_v20 = vld [vmem:[%s2272_s3 + $0x90] ss:$12 sps:$4 sm:$0xff]   ;;  %v1700_v23 = vld [vmem:[%s2272_s3 + $0xa8] ss:$12 sps:$4 sm:$0xff]   ;;  %v1967_v24 = vld [vmem:[#allocation2] sm:$0xff]  ;;  %v311_v55 = vshrl.u32 %v310_v54, 7 }
  0x1d   : > { %457 = vmatprep.subr.bf16.mxu0 %v1682_v7  ;;  %1575 = vmatpush3.bf16.msra.mxu1 %v1701_v13  ;;  %v1705_v25 = vld [vmem:[%s2272_s3 + $0x80] ss:$12 sps:$4 sm:$0xff]   ;;  %v308_v26 = vpack.c.bf16 %v1967_v24, %v1967_v24  ;;  %v1706_v27 = vld [vmem:[%s2272_s3 + $0x98] ss:$12 sps:$4 sm:$0xff]   ;;  %v1707_v28 = vld [vmem:[%s2272_s3 + $0xb0] ss:$12 sps:$4 sm:$0xff]  }
  0x1e   : > { %1576 = vmatprep.subr.bf16.mxu1 %v1833_v3  ;;  %v1710_v29 = vld [vmem:[%s2270_s1 + $0x4] ss:$12 sps:$4 sm:$0xff]   ;;  %v1708_v30 = vld [vmem:[%s2270_s1] ss:$12 sps:$4 sm:$0xff]   ;;  %v1711_v31 = vld [vmem:[%s2270_s1 + $0x8] ss:$12 sps:$4 sm:$0xff]  }
  0x1f   : > { %v1712_v32 = vld [vmem:[%s2270_s1 + $0x18] ss:$12 sps:$4 sm:$0xff]   ;;  %v1714_v33 = vld [vmem:[%s2270_s1 + $0x1c] ss:$12 sps:$4 sm:$0xff]   ;;  %v1715_v34 = vld [vmem:[%s2270_s1 + $0x20] ss:$12 sps:$4 sm:$0xff]  }
  0x20   : > { %458 = vmatpush1.bf16.msra.mxu0 %v1684_v8  ;;  %v1718_v35 = vld [vmem:[%s2270_s1 + $0x34] ss:$12 sps:$4 sm:$0xff]   ;;  %v1716_v36 = vld [vmem:[%s2270_s1 + $0x30] ss:$12 sps:$4 sm:$0xff]   ;;  %v1719_v37 = vld [vmem:[%s2270_s1 + $0x38] ss:$12 sps:$4 sm:$0xff]  }
  0x21   : > { %459 = vmatprep.subr.bf16.mxu0 %v1685_v9  ;;  %1577 = vmatpush3.bf16.msra.mxu1 %v1702_v16  ;;  %v1722_v38 = vld [vmem:[%s2270_s1 + $0x4c] ss:$12 sps:$4 sm:$0xff]   ;;  %v1720_v39 = vld [vmem:[%s2270_s1 + $0x48] ss:$12 sps:$4 sm:$0xff]   ;;  %v1723_v40 = vld [vmem:[%s2270_s1 + $0x50] ss:$12 sps:$4 sm:$0xff]  }
  0x22   : > { %1578 = vmatprep.subr.bf16.mxu1 %v1833_v3  ;;  %v1726_v41 = vld [vmem:[%s2270_s1 + $0x64] ss:$12 sps:$4 sm:$0xff]   ;;  %v1724_v42 = vld [vmem:[%s2270_s1 + $0x60] ss:$12 sps:$4 sm:$0xff]   ;;  %v1727_v43 = vld [vmem:[%s2270_s1 + $0x68] ss:$12 sps:$4 sm:$0xff]  }
  0x23   : > { %v1730_v44 = vld [vmem:[%s2270_s1 + $0x7c] ss:$12 sps:$4 sm:$0xff]   ;;  %v1728_v45 = vld [vmem:[%s2270_s1 + $0x78] ss:$12 sps:$4 sm:$0xff]   ;;  %v1731_v46 = vld [vmem:[%s2270_s1 + $0x80] ss:$12 sps:$4 sm:$0xff]  }
  0x24   : > { %460 = vmatpush1.bf16.msra.mxu0 %v1687_v11  ;;  %v1734_v47 = vld [vmem:[%s2270_s1 + $0x94] ss:$12 sps:$4 sm:$0xff]   ;;  %v1732_v48 = vld [vmem:[%s2270_s1 + $0x90] ss:$12 sps:$4 sm:$0xff]   ;;  %v1735_v49 = vld [vmem:[%s2270_s1 + $0x98] ss:$12 sps:$4 sm:$0xff]  }
  0x25   : > { %461 = vmatprep.subr.bf16.mxu0 %v1688_v12  ;;  %1579 = vmatpush3.bf16.msra.mxu1 %v1703_v19  ;;  %v1738_v50 = vld [vmem:[%s2270_s1 + $0xac] ss:$12 sps:$4 sm:$0xff]   ;;  %v1736_v51 = vld [vmem:[%s2270_s1 + $0xa8] ss:$12 sps:$4 sm:$0xff]   ;;  %v1739_v52 = vld [vmem:[%s2270_s1 + $0xb0] ss:$12 sps:$4 sm:$0xff]  }
  0x26   : > { %1580 = vmatprep.subr.bf16.mxu1 %v1833_v3  ;;  %v1742_v53 = vld [vmem:[%s2272_s3 + $0xc4] ss:$12 sps:$4 sm:$0xff]   ;;  %v2071_v56 = vsub.s32 0, %v311_v55  ;;  %v307_v57 = vld [vmem:[%s2273_s4] sm:$0x7]  ;;  %v2076_v58 = vsub.s32 1, %v311_v55 }
  0x27   : > { %v271_v61 = vld [vmem:[%s1894_s30] sm:$0xff]  ;;  %v272_v6 = vld [vmem:[%s1894_s30 + $0x8] sm:$0xff]  ;;  %vm1837_vm1 = vmmov (!%p1509_p5), 0  }
  0x28   : > { %462 = vmatpush1.bf16.msra.mxu0 %v1690_v14  ;;  %v313_v59 = vrot.slane %v307_v57, %v2071_v56  ;;  %v317_v60 = vrot.slane %v307_v57, %v2076_v58  ;;  %v816_v54 = vld [vmem:[#allocation2 + $0x8] sm:$0xff] }
  0x29   : > { %463 = vmatprep.subr.bf16.mxu0 %v1691_v15  ;;  %1581 = vmatpush3.bf16.msra.mxu1 %v1704_v22 }
  0x2a   : > { %1582 = vmatprep.subr.bf16.mxu1 %v1833_v3 }
  0x2c   : > { %464 = vmatpush1.bf16.msra.mxu0 %v1693_v17  ;;  %v2082_v17 = vsub.s32 2, %v311_v55  ;;  %v1771_v55 = vld [vmem:[%s2272_s3 + $0x170] ss:$12 sps:$4 sm:$0xff]  }
  0x2d   : > { %465 = vmatprep.subr.bf16.mxu0 %v1694_v18  ;;  %1583 = vmatpush3.bf16.msra.mxu1 %v1705_v25 }
  0x2e   : > { %1584 = vmatprep.subr.bf16.mxu1 %v1833_v3  ;;  %v321_v18 = vrot.slane %v307_v57, %v2082_v17  ;;  %v852_v57 = vpack.c.bf16 %v816_v54, %v816_v54 }
  0x30   : > { %466 = vmatpush1.bf16.msra.mxu0 %v1696_v20 }
  0x31   : > { %467 = vmatprep.subr.bf16.mxu0 %v1698_v21  ;;  %1585 = vmatpush3.bf16.msra.mxu1 %v1706_v27 }
  0x32   : > { %1586 = vmatprep.subr.bf16.mxu1 %v1833_v3 }
  0x34   : > { %468 = vmatpush1.bf16.msra.mxu0 %v1700_v23  ;;  %v273_v23 = vld [vmem:[%s1894_s30 + $0x10] sm:$0xff] }
  0x35   : > { %1587 = vmatpush3.bf16.msra.mxu1 %v1707_v28  ;;  %734 = vmatprep.subr.bf16.mxu0 %v1710_v29 }
  0x36   : > { %1592 = vmatprep.subr.bf16.mxu1 %v1833_v3 }
  0x37   : > { %486 = vmatmul.mubr.bf16.vlgmr.msra.gmra.mrb[0].mxu0 %v308_v26 }
  0x38   : > { %766 = vmatprep.mubr.bf16.mxu0 %v1834_v4  ;;  %1589 = vmatmul.mubr.bf16.vlgmr.msra.gmra.mrb[0].mxu1 %v308_v26 }
  0x39   : > { %1608 = vmatprep.mubr.msk.bf16.mxu1 %vm1835_vm0, %v1833_v3  ;;  %735 = vmatpush1.bf16.msra.mxu0 %v1708_v30 }
  0x3a   : > { %1593 = vmatpush3.bf16.msra.mxu1 %v1711_v31  ;;  %736 = vmatprep.subr.bf16.mxu0 %v1714_v33  ;;  %v1740_v33 = vld [vmem:[%s2272_s3 + $0xc0] ss:$12 sps:$4 sm:$0xff]  }
  0x3b   : > { %1594 = vmatprep.subr.bf16.mxu1 %v1833_v3 }
  0x3d   : > { %737 = vmatpush1.bf16.msra.mxu0 %v1712_v32 }
  0x3e   : > { %1595 = vmatpush3.bf16.msra.mxu1 %v1715_v34  ;;  %738 = vmatprep.subr.bf16.mxu0 %v1718_v35  ;;  %v1761_v34 = vld [vmem:[%s2272_s3 + $0xc8] ss:$12 sps:$4 sm:$0xff]  }
  0x3f   : > { %1596 = vmatprep.subr.bf16.mxu1 %v1833_v3 }
  0x41   : > { %739 = vmatpush1.bf16.msra.mxu0 %v1716_v36  ;;  %v1745_v36 = vld [vmem:[%s2272_s3 + $0xdc] ss:$12 sps:$4 sm:$0xff]  }
  0x42   : > { %1597 = vmatpush3.bf16.msra.mxu1 %v1719_v37  ;;  %740 = vmatprep.subr.bf16.mxu0 %v1722_v38  ;;  %v1765_v37 = vld [vmem:[%s2272_s3 + $0xe0] ss:$12 sps:$4 sm:$0xff]  }
  0x43   : > { %1598 = vmatprep.subr.bf16.mxu1 %v1833_v3  ;;  %v1748_v38 = vld [vmem:[%s2272_s3 + $0xf4] ss:$12 sps:$4 sm:$0xff]  }
  0x45   : > { %741 = vmatpush1.bf16.msra.mxu0 %v1720_v39  ;;  %v1746_v39 = vld [vmem:[%s2272_s3 + $0xf0] ss:$12 sps:$4 sm:$0xff]  }
  0x46   : > { %1599 = vmatpush3.bf16.msra.mxu1 %v1723_v40  ;;  %742 = vmatprep.subr.bf16.mxu0 %v1726_v41  ;;  %v1766_v40 = vld [vmem:[%s2272_s3 + $0xf8] ss:$12 sps:$4 sm:$0xff]  }
  0x47   : > { %1600 = vmatprep.subr.bf16.mxu1 %v1833_v3  ;;  %v1751_v41 = vld [vmem:[%s2272_s3 + $0x10c] ss:$12 sps:$4 sm:$0xff]  }
  0x49   : > { %743 = vmatpush1.bf16.msra.mxu0 %v1724_v42  ;;  %v1767_v42 = vld [vmem:[%s2272_s3 + $0x110] ss:$12 sps:$4 sm:$0xff]  }
  0x4a   : > { %1601 = vmatpush3.bf16.msra.mxu1 %v1727_v43  ;;  %744 = vmatprep.subr.bf16.mxu0 %v1730_v44  ;;  %v1754_v43 = vld [vmem:[%s2272_s3 + $0x124] ss:$12 sps:$4 sm:$0xff]   ;;  %v1752_v44 = vld [vmem:[%s2272_s3 + $0x120] ss:$12 sps:$4 sm:$0xff]  }
  0x4b   : > { %1602 = vmatprep.subr.bf16.mxu1 %v1833_v3 }
  0x4d   : > { %745 = vmatpush1.bf16.msra.mxu0 %v1728_v45  ;;  %v1768_v45 = vld [vmem:[%s2272_s3 + $0x128] ss:$12 sps:$4 sm:$0xff]  }
  0x4e   : > { %1603 = vmatpush3.bf16.msra.mxu1 %v1731_v46  ;;  %746 = vmatprep.subr.bf16.mxu0 %v1734_v47  ;;  %v1757_v46 = vld [vmem:[%s2272_s3 + $0x13c] ss:$12 sps:$4 sm:$0xff]   ;;  %v1755_v47 = vld [vmem:[%s2272_s3 + $0x138] ss:$12 sps:$4 sm:$0xff]  }
  0x4f   : > { %1604 = vmatprep.subr.bf16.mxu1 %v1833_v3 }
  0x51   : > { %747 = vmatpush1.bf16.msra.mxu0 %v1732_v48  ;;  %v1769_v48 = vld [vmem:[%s2272_s3 + $0x140] ss:$12 sps:$4 sm:$0xff]  }
  0x52   : > { %1605 = vmatpush3.bf16.msra.mxu1 %v1735_v49  ;;  %748 = vmatprep.subr.bf16.mxu0 %v1738_v50  ;;  %v1760_v49 = vld [vmem:[%s2272_s3 + $0x154] ss:$12 sps:$4 sm:$0xff]   ;;  %v1758_v50 = vld [vmem:[%s2272_s3 + $0x150] ss:$12 sps:$4 sm:$0xff]  }
  0x53   : > { %1606 = vmatprep.subr.bf16.mxu1 %v1833_v3 }
  0x55   : > { %749 = vmatpush1.bf16.msra.mxu0 %v1736_v51  ;;  %v1770_v51 = vld [vmem:[%s2272_s3 + $0x158] ss:$12 sps:$4 sm:$0xff]  }
  0x56   : > { %1607 = vmatpush3.bf16.msra.mxu1 %v1739_v52  ;;  %997 = vmatprep.subr.bf16.mxu0 %v1742_v53  ;;  %v1764_v52 = vld [vmem:[%s2272_s3 + $0x16c] ss:$12 sps:$4 sm:$0xff]   ;;  %v1762_v53 = vld [vmem:[%s2272_s3 + $0x168] ss:$12 sps:$4 sm:$0xff]  }
  0x57   : > { %1612 = vmatprep.subr.bf16.mxu1 %v1833_v3 }
 0x10a   : > { %v487_v62 = vpop.f32.mrb[0].mxu0 }
 0x10b   : > { %v488_v63 = vadd.f32 %v487_v62, %v313_v59  ;;  %v489_v0 = vpop.f32.mrb[1].mxu0  ;;  %v528_v10 = vpop.f32.mrb[0].mxu1 }
 0x10c   : > { %v490_v1 = vadd.f32 %v489_v0, %v317_v60  ;;  %v491_v2 = vpop.f32.mrb[2].mxu0  ;;  %v1590_v12 = vpop.f32.mrb[1].mxu1  ;;  %v529_v21 = vadd.f32 %v528_v10, %v321_v18  ;;  %v589_v0 = vld [vmem:[%s2271_s2] sm:$0x7] }
 0x10d   : > { %v534_v5 = vadd.f32 %v488_v63, %v271_v61  ;;  %v492_v7 = vpop.f32.mrb[3].mxu0  ;;  %v531_v13 = vpop.f32.mrb[2].mxu1  ;;  %v1482_v63 = vld [vmem:[%s2273_s4 + $0x3] sm:$0x7]  ;;  %v598_v2 = vrot.slane %v589_v0, %v2076_v58 }
 0x10e   : > { %v541_v9 = vadd.f32 %v490_v1, %v272_v6  ;;  %v1591_v14 = vpop.f32.mrb[3].mxu1  ;;  %v594_v1 = vrot.slane %v589_v0, %v2071_v56 }
 0x10f   : > { %v1424_v8 = vmul.f32 -1.442695, %v534_v5  ;;  %v861_v5 = vrot.slane %v1482_v63, %v2076_v58 }
 0x110   : > { %v1425_v11 = vmul.f32 -1.442695, %v541_v9 }
 0x111   : > { %1772 = vpow2.f32 %v1424_v8  ;;  %v1654_v8 = vadd.f32 %v861_v5, %v598_v2 }
 0x112   : > { %1774 = vpow2.f32 %v1425_v11 }
 0x11b   : > { %v1773_v15 = vpop.eup %1772 }
 0x11c   : > { %v538_v16 = vadd.f32 1.0, %v1773_v15  ;;  %v1775_v19 = vpop.eup %1774 }
 0x11d   : > { %v545_v20 = vadd.f32 1.0, %v1775_v19 }
 0x11e   : > { %1776 = vrcp.f32 %v538_v16 }
 0x11f   : > { %1778 = vrcp.f32 %v545_v20 }
 0x128   : > { %v1777_v22 = vpop.eup %1776 }
 0x129   : > { %v548_v25 = vmul.f32 %v1777_v22, %v529_v21  ;;  %v1779_v27 = vpop.eup %1778 }
 0x12a   : > { %v551_v28 = vsub.f32 1.0, %v1779_v27  ;;  %v553_v31 = vmul.f32 %v1779_v27, %v1967_v24  ;;  %v1743_v24 = vld [vmem:[%s2272_s3 + $0xd8] ss:$12 sps:$4 sm:$0xff]  }
 0x12b   : > { %v549_v26 = vadd.f32 %v548_v25, %v273_v23  ;;  %v865_v23 = vrot.slane %v1482_v63, %v2082_v17 }
 0x12d   : > { %1780 = vtanh.f32 %v549_v26  ;;  %v602_v26 = vrot.slane %v589_v0, %v2082_v17  ;;  %v1823_v0 = vld [vmem:[%s2274_s5 + $0xa8] ss:$12 sps:$4 sm:$0xff] (!%p1509_p5)  }
 0x137   : > { %v1781_v29 = vpop.eup %1780 }
 0x138   : > { %v552_v30 = vmul.f32 %v1781_v29, %v551_v28 }
 0x13a   : > { %v554_v32 = vadd.f32 %v553_v31, %v552_v30 }
 0x13c   : > { %555 = vst [vmem:[#allocation2] sm:$0xff] %v554_v32  ;;  %v588_v35 = vpack.c.bf16 %v554_v32, %v554_v32 }
 0x13e   : > { %767 = vmatmul.mubr.bf16.vlgmr.msra.gmra.mrb[4].mxu0 %v588_v35  ;;  %1609 = vmatmul.mubr.bf16.vlgmr.msra.gmra.mrb[4].mxu1 %v588_v35 }
 0x13f   : > { %998 = vmatpush1.bf16.msra.mxu0 %v1740_v33  ;;  %1613 = vmatpush3.bf16.msra.mxu1 %v1761_v34 }
 0x140   : > { %999 = vmatprep.subr.bf16.mxu0 %v1745_v36  ;;  %1614 = vmatprep.subr.bf16.mxu1 %v1833_v3 }
 0x141   : > { %1029 = vmatprep.mubr.bf16.mxu0 %v1834_v4  ;;  %1628 = vmatprep.mubr.msk.bf16.mxu1 %vm1835_vm0, %v1833_v3  ;;  %v1749_v4 = vld [vmem:[%s2272_s3 + $0x108] ss:$12 sps:$4 sm:$0xff]  }
 0x143   : > { %1000 = vmatpush1.bf16.msra.mxu0 %v1743_v24  ;;  %1615 = vmatpush3.bf16.msra.mxu1 %v1765_v37 }
 0x144   : > { %1001 = vmatprep.subr.bf16.mxu0 %v1748_v38  ;;  %1616 = vmatprep.subr.bf16.mxu1 %v1833_v3  ;;  %v1792_v38 = vld [vmem:[%s2274_s5 + $0x4] ss:$12 sps:$4 sm:$0xff] (!%p1509_p5)  }
 0x147   : > { %1002 = vmatpush1.bf16.msra.mxu0 %v1746_v39  ;;  %1617 = vmatpush3.bf16.msra.mxu1 %v1766_v40  ;;  %v1836_v39 = vmov (!%p1509_p5), 0.0   ;;  %v1794_v40 = vld [vmem:[%s2274_s5 + $0x8] ss:$12 sps:$4 sm:$0xff] (!%p1509_p5)  }
 0x148   : > { %1003 = vmatprep.subr.bf16.mxu0 %v1751_v41  ;;  %1618 = vmatprep.subr.bf16.mxu1 %v1833_v3  ;;  %v1795_v41 = vld [vmem:[%s2274_s5] ss:$12 sps:$4 sm:$0xff] (!%p1509_p5)  }
 0x14b   : > { %1004 = vmatpush1.bf16.msra.mxu0 %v1749_v4  ;;  %1619 = vmatpush3.bf16.msra.mxu1 %v1767_v42  ;;  %v1796_v4 = vld [vmem:[%s2274_s5 + $0x1c] ss:$12 sps:$4 sm:$0xff] (!%p1509_p5)   ;;  %v1838_v42 = vmov (!%p1509_p5), 0  }
 0x14c   : > { %1005 = vmatprep.subr.bf16.mxu0 %v1754_v43  ;;  %1620 = vmatprep.subr.bf16.mxu1 %v1833_v3  ;;  %v1798_v43 = vld [vmem:[%s2274_s5 + $0x20] ss:$12 sps:$4 sm:$0xff] (!%p1509_p5)  }
 0x14f   : > { %1006 = vmatpush1.bf16.msra.mxu0 %v1752_v44  ;;  %1621 = vmatpush3.bf16.msra.mxu1 %v1768_v45  ;;  %v1799_v44 = vld [vmem:[%s2274_s5 + $0x18] ss:$12 sps:$4 sm:$0xff] (!%p1509_p5)   ;;  %v1800_v45 = vld [vmem:[%s2274_s5 + $0x34] ss:$12 sps:$4 sm:$0xff] (!%p1509_p5)  }
 0x150   : > { %1007 = vmatprep.subr.bf16.mxu0 %v1757_v46  ;;  %1622 = vmatprep.subr.bf16.mxu1 %v1833_v3  ;;  %v1802_v46 = vld [vmem:[%s2274_s5 + $0x38] ss:$12 sps:$4 sm:$0xff] (!%p1509_p5)  }
 0x153   : > { %1008 = vmatpush1.bf16.msra.mxu0 %v1755_v47  ;;  %1623 = vmatpush3.bf16.msra.mxu1 %v1769_v48  ;;  %v1803_v47 = vld [vmem:[%s2274_s5 + $0x30] ss:$12 sps:$4 sm:$0xff] (!%p1509_p5)   ;;  %v1804_v48 = vld [vmem:[%s2274_s5 + $0x4c] ss:$12 sps:$4 sm:$0xff] (!%p1509_p5)  }
 0x154   : > { %1009 = vmatprep.subr.bf16.mxu0 %v1760_v49  ;;  %1624 = vmatprep.subr.bf16.mxu1 %v1833_v3  ;;  %v1806_v49 = vld [vmem:[%s2274_s5 + $0x50] ss:$12 sps:$4 sm:$0xff] (!%p1509_p5)  }
 0x157   : > { %1010 = vmatpush1.bf16.msra.mxu0 %v1758_v50  ;;  %1625 = vmatpush3.bf16.msra.mxu1 %v1770_v51  ;;  %v1807_v50 = vld [vmem:[%s2274_s5 + $0x48] ss:$12 sps:$4 sm:$0xff] (!%p1509_p5)   ;;  %v1808_v51 = vld [vmem:[%s2274_s5 + $0x64] ss:$12 sps:$4 sm:$0xff] (!%p1509_p5)  }
 0x158   : > { %1011 = vmatprep.subr.bf16.mxu0 %v1764_v52  ;;  %1626 = vmatprep.subr.bf16.mxu1 %v1833_v3  ;;  %v857_v3 = vrot.slane %v1482_v63, %v2071_v56  ;;  %v1810_v52 = vld [vmem:[%s2274_s5 + $0x68] ss:$12 sps:$4 sm:$0xff] (!%p1509_p5)   ;;  %v1822_v63 = vld [vmem:[%s2274_s5 + $0xb0] ss:$12 sps:$4 sm:$0xff] (!%p1509_p5)  }
 0x15a   : > { %v1652_v6 = vadd.f32 %v857_v3, %v594_v1  ;;  %v1137_v3 = vld [vmem:[%s2275_s6] sm:$0x7] (!%p1509_p5) }
 0x15b   : > { %1012 = vmatpush1.bf16.msra.mxu0 %v1762_v53  ;;  %1627 = vmatpush3.bf16.msra.mxu1 %v1771_v55  ;;  %v1811_v53 = vld [vmem:[%s2274_s5 + $0x60] ss:$12 sps:$4 sm:$0xff] (!%p1509_p5)   ;;  %v1150_v2 = vrot.slane (!%p1509_p5), %v1137_v3, %v2082_v17  ;;  %v1142_v5 = vrot.slane (!%p1509_p5), %v1137_v3, %v2071_v56 }
 0x15c   : > { %1632 = vmatprep.subr.bf16.mxu1 (!%p1509_p5), %v1836_v39  ;;  %1282 = vmatprep.subr.bf16.mxu0 (!%p1509_p5), %v1792_v38  ;;  %v1814_v55 = vld [vmem:[%s2274_s5 + $0x80] ss:$12 sps:$4 sm:$0xff] (!%p1509_p5)  }
 0x15e   : > { %1030 = vmatmul.mubr.bf16.vlgmr.msra.gmra.mrb[4].mxu0 %v852_v57  ;;  %1629 = vmatmul.mubr.bf16.vlgmr.msra.gmra.mrb[8].mxu1 %v852_v57  ;;  %v1815_v57 = vld [vmem:[%s2274_s5 + $0x78] ss:$12 sps:$4 sm:$0xff] (!%p1509_p5)  }
 0x15f   : > { %1648 = vmatprep.mubr.msk.bf16.mxu1 (!%p1509_p5), %vm1837_vm1, %v1836_v39  ;;  %1633 = vmatpush3.bf16.msra.mxu1 (!%p1509_p5), %v1794_v40 }
 0x160   : > { %1314 = vmatprep.mubr.bf16.mxu0 (!%p1509_p5), %v1838_v42  ;;  %1283 = vmatpush1.bf16.msra.mxu0 (!%p1509_p5), %v1795_v41 }
 0x161   : > { %1634 = vmatprep.subr.bf16.mxu1 (!%p1509_p5), %v1836_v39  ;;  %1284 = vmatprep.subr.bf16.mxu0 (!%p1509_p5), %v1796_v4 }
 0x163   : > { %1635 = vmatpush3.bf16.msra.mxu1 (!%p1509_p5), %v1798_v43 }
 0x164   : > { %1285 = vmatpush1.bf16.msra.mxu0 (!%p1509_p5), %v1799_v44  ;;  %1636 = vmatprep.subr.bf16.mxu1 (!%p1509_p5), %v1836_v39 }
 0x165   : > { %1286 = vmatprep.subr.bf16.mxu0 (!%p1509_p5), %v1800_v45 }
 0x167   : > { %1637 = vmatpush3.bf16.msra.mxu1 (!%p1509_p5), %v1802_v46 }
 0x168   : > { %1287 = vmatpush1.bf16.msra.mxu0 (!%p1509_p5), %v1803_v47  ;;  %1638 = vmatprep.subr.bf16.mxu1 (!%p1509_p5), %v1836_v39 }
 0x169   : > { %1288 = vmatprep.subr.bf16.mxu0 (!%p1509_p5), %v1804_v48 }
 0x16b   : > { %1639 = vmatpush3.bf16.msra.mxu1 (!%p1509_p5), %v1806_v49 }
 0x16c   : > { %1289 = vmatpush1.bf16.msra.mxu0 (!%p1509_p5), %v1807_v50  ;;  %1640 = vmatprep.subr.bf16.mxu1 (!%p1509_p5), %v1836_v39 }
 0x16d   : > { %1290 = vmatprep.subr.bf16.mxu0 (!%p1509_p5), %v1808_v51 }
 0x16f   : > { %1641 = vmatpush3.bf16.msra.mxu1 (!%p1509_p5), %v1810_v52 }
 0x170   : > { %1291 = vmatpush1.bf16.msra.mxu0 (!%p1509_p5), %v1811_v53  ;;  %1642 = vmatprep.subr.bf16.mxu1 (!%p1509_p5), %v1836_v39 }
 0x173   : > { %1643 = vmatpush3.bf16.msra.mxu1 (!%p1509_p5), %v1814_v55 }
 0x174   : > { %1644 = vmatprep.subr.bf16.mxu1 (!%p1509_p5), %v1836_v39 }
 0x211   : > { %v809_v59 = vpop.f32.mrb[4].mxu1 }
 0x212   : > { %v1610_v60 = vpop.f32.mrb[5].mxu1  ;;  %v810_v30 = vadd.f32 %v809_v59, %v602_v26  ;;  %v1816_v59 = vld [vmem:[%s2274_s5 + $0x94] ss:$12 sps:$4 sm:$0xff] (!%p1509_p5)  }
 0x213   : > { %v812_v61 = vpop.f32.mrb[6].mxu1  ;;  %v1818_v60 = vld [vmem:[%s2274_s5 + $0x98] ss:$12 sps:$4 sm:$0xff] (!%p1509_p5)  }
 0x214   : > { %v1611_v62 = vpop.f32.mrb[7].mxu1  ;;  %v1819_v61 = vld [vmem:[%s2274_s5 + $0x90] ss:$12 sps:$4 sm:$0xff] (!%p1509_p5)   ;;  %1645 = vmatpush3.bf16.msra.mxu1 (!%p1509_p5), %v1818_v60 }
 0x215   : > { %v1820_v62 = vld [vmem:[%s2274_s5 + $0xac] ss:$12 sps:$4 sm:$0xff] (!%p1509_p5)   ;;  %1646 = vmatprep.subr.bf16.mxu1 (!%p1509_p5), %v1836_v39 }
 0x218   : > { %1647 = vmatpush3.bf16.msra.mxu1 (!%p1509_p5), %v1822_v63 }
 0x231   : > { %v1031_v7 = vpop.f32.mrb[4].mxu0  ;;  %v1072_v9 = vpop.f32.mrb[8].mxu1 }
 0x232   : > { %v1653_v10 = vadd.f32 %v1652_v6, %v1031_v7  ;;  %v1033_v11 = vpop.f32.mrb[5].mxu0  ;;  %v1630_v12 = vpop.f32.mrb[9].mxu1  ;;  %v1073_v28 = vadd.f32 %v1072_v9, %v865_v23  ;;  %v1146_v6 = vrot.slane (!%p1509_p5), %v1137_v3, %v2076_v58 }
 0x233   : > { %v1035_v13 = vpop.f32.mrb[6].mxu0  ;;  %v1075_v14 = vpop.f32.mrb[10].mxu1  ;;  %v1655_v19 = vadd.f32 %v1654_v8, %v1033_v11 }
 0x234   : > { %v1507_v15 = vmul.f32 -1.442695, %v1653_v10  ;;  %v1036_v16 = vpop.f32.mrb[7].mxu0  ;;  %v1631_v18 = vpop.f32.mrb[11].mxu1 }
 0x235   : > { %v1508_v20 = vmul.f32 -1.442695, %v1655_v19 }
 0x236   : > { %1782 = vpow2.f32 %v1507_v15 }
 0x237   : > { %1784 = vpow2.f32 %v1508_v20 }
 0x240   : > { %v1783_v21 = vpop.eup %1782 }
 0x241   : > { %v1082_v22 = vadd.f32 1.0, %v1783_v21  ;;  %v1785_v25 = vpop.eup %1784 }
 0x242   : > { %v1089_v27 = vadd.f32 1.0, %v1785_v25 }
 0x243   : > { %1786 = vrcp.f32 %v1082_v22 }
 0x244   : > { %1788 = vrcp.f32 %v1089_v27 }
 0x24d   : > { %v1787_v29 = vpop.eup %1786 }
 0x24e   : > { %v1092_v31 = vmul.f32 %v1787_v29, %v1073_v28  ;;  %v1789_v33 = vpop.eup %1788 }
 0x24f   : > { %v1095_v34 = vsub.f32 1.0, %v1789_v33  ;;  %v1097_v36 = vmul.f32 %v1789_v33, %v816_v54  ;;  %v1812_v54 = vld [vmem:[%s2274_s5 + $0x7c] ss:$12 sps:$4 sm:$0xff] (!%p1509_p5)  }
 0x250   : > { %v1093_v32 = vadd.f32 %v1092_v31, %v810_v30  ;;  %1292 = vmatprep.subr.bf16.mxu0 (!%p1509_p5), %v1812_v54 }
 0x251   : > { %1293 = vmatpush1.bf16.msra.mxu0 (!%p1509_p5), %v1815_v57 }
 0x252   : > { %1790 = vtanh.f32 %v1093_v32  ;;  %1294 = vmatprep.subr.bf16.mxu0 (!%p1509_p5), %v1816_v59 }
 0x255   : > { %1295 = vmatpush1.bf16.msra.mxu0 (!%p1509_p5), %v1819_v61 }
 0x256   : > { %1296 = vmatprep.subr.bf16.mxu0 (!%p1509_p5), %v1820_v62 }
 0x259   : > { %1297 = vmatpush1.bf16.msra.mxu0 (!%p1509_p5), %v1823_v0 }
 0x25b   : > { %1103 = sbr.rel (%p1509_p5) target bundleno = 827 (0x33b), region = 56 }
 0x25c   : > { %v1791_v35 = vpop.eup %1790 }
 0x25d   : > { %v1096_v24 = vmul.f32 %v1791_v35, %v1095_v34 }
 0x25f   : > { %v1098_v37 = vadd.f32 %v1097_v36, %v1096_v24 }
 0x261   : > { %1099 = vst [vmem:[#allocation2 + $0x8] sm:$0xff] %v1098_v37  ;;  %v1104_v1 = vpack.c.bf16 (!%p1509_p5), %v1098_v37, %v1098_v37 }
 0x263   : > { %1649 = vmatmul.mubr.bf16.vlgmr.msra.gmra.mrb[0].mxu1 %v1104_v1  ;;  %1315 = vmatmul.mubr.bf16.vlgmr.msra.gmra.mrb[0].mxu0 %v1104_v1 }
 0x336   : > { %v1357_v7 = vpop.f32.mrb[0].mxu1  ;;  %v1316_v9 = vpop.f32.mrb[0].mxu0 }
 0x337   : > { %v1358_v8 = vadd.f32 %v1357_v7, %v1150_v2  ;;  %v1650_v10 = vpop.f32.mrb[1].mxu1  ;;  %v1317_v11 = vadd.f32 %v1316_v9, %v1142_v5  ;;  %v1318_v12 = vpop.f32.mrb[1].mxu0 }
 0x338   : > { %v1360_v13 = vpop.f32.mrb[2].mxu1  ;;  %v1319_v14 = vadd.f32 %v1318_v12, %v1146_v6  ;;  %v1320_v15 = vpop.f32.mrb[2].mxu0 }
 0x339   : > { %1365 = vst [vmem:[%s2276_s7 + $0x10] sm:$0xff] %v1358_v8  ;;  %v1651_v16 = vpop.f32.mrb[3].mxu1  ;;  %1363 = vst [vmem:[%s2276_s7] sm:$0xff] %v1317_v11  ;;  %v1321_v56 = vpop.f32.mrb[3].mxu0 }
 0x33a   : > { %1364 = vst [vmem:[%s2276_s7 + $0x8] sm:$0xff] %v1319_v14 }
 0x33b PF: > { %s17_s24 = sadd.s32 1, %s1830_s24  }
 0x33c   : > { %p14_p6 = scmp.ge.s32.totalorder %s17_s24, 6  }
 0x33e   :  { %16 = sbr.rel (!%p14_p6) target bundleno = 1 (0x1), region = 85 }

// kernel: tile.19
= control target key start
LH: loop header
LB: loop body
LE: loop exit
PB: predicated region body
PF: predicated region fallthrough
CT: control target
= control target key end

     0   :  { %s67_s10 = smov 21   ;;  %s68_s11 = smov 15   ;;  %vm3_vm0 = vcmask 23552   ;;  %vm9_vm1 = vcmask 195752   ;;  %vm15_vm2 = vcmask 171152   ;;  %vm21_vm3 = vcmask 146552   ;;  %s111_s0 = inlined_call_operand.vmem [shape: f32[8,3], index: 0, kind: input, shape index: {}]   ;;  %s112_s1 = inlined_call_operand.vmem [shape: f32[1,24], index: 1, kind: output, shape index: {}]  }
   0x1   :  { %v53_v0 = vld [vmem:[%s111_s0 + $0x7] sm:$0x1]   ;;  %v55_v1 = vld [vmem:[%s111_s0 + $0x5] sm:$0x1]   ;;  %v54_v2 = vld [vmem:[%s111_s0 + $0x6] sm:$0x1]  }
   0x2   :  { %7 = vrot.lane.b32.xlu0 %v53_v0, %s67_s10  ;;  %19 = vrot.lane.b32.xlu1 %v55_v1, %s68_s11  ;;  %v56_v3 = vld [vmem:[%s111_s0 + $0x4] sm:$0x1]   ;;  %v2_v4 = vld [vmem:[%s111_s0] sm:$0x1]   ;;  %s69_s18 = smov 18   ;;  %s70_s19 = smov 12  }
   0x3   :  { %4 = vst.msk [vmem:[#allocation0] sm:$0x1] %vm3_vm0, %v2_v4   ;;  %v57_v5 = vld [vmem:[%s111_s0 + $0x3] sm:$0x1]   ;;  %v58_v6 = vld [vmem:[%s111_s0 + $0x2] sm:$0x1]  }
   0x4   :  { %s71_s24 = smov 9   ;;  %s72_s25 = smov 6   ;;  %v59_v7 = vld [vmem:[%s111_s0 + $0x1] sm:$0x1]   ;;  %vm27_vm4 = vcmask 121952   ;;  %vm33_vm5 = vcmask 97352  }
   0x5   :  { %s73_s0 = smov 3   ;;  %vm39_vm6 = vcmask 72752   ;;  %vm45_vm7 = vcmask 48152  }
   0x6   :  { %13 = vrot.lane.b32.xlu0 %v54_v2, %s69_s18  ;;  %25 = vrot.lane.b32.xlu1 %v56_v3, %s70_s19 }
   0xa   :  { %31 = vrot.lane.b32.xlu0 %v57_v5, %s71_s24  ;;  %37 = vrot.lane.b32.xlu1 %v58_v6, %s72_s25 }
   0xe   :  { %43 = vrot.lane.b32.xlu0 %v59_v7, %s73_s0 }
  0x74   :  { %v8_v8 = vpop.permute.xlu0 %7   ;;  %v20_v9 = vpop.permute.xlu1 %19  }
  0x75   :  { %10 = vst.msk [vmem:[#allocation0] sm:$0x1] %vm9_vm1, %v8_v8  }
  0x78   :  { %v14_v10 = vpop.permute.xlu0 %13   ;;  %v26_v11 = vpop.permute.xlu1 %25  }
  0x79   :  { %16 = vst.msk [vmem:[#allocation0] sm:$0x1] %vm15_vm2, %v14_v10  }
  0x7a   :  { %22 = vst.msk [vmem:[#allocation0] sm:$0x1] %vm21_vm3, %v20_v9  }
  0x7b   :  { %28 = vst.msk [vmem:[#allocation0] sm:$0x1] %vm27_vm4, %v26_v11  }
  0x7c   :  { %v32_v12 = vpop.permute.xlu0 %31   ;;  %v38_v13 = vpop.permute.xlu1 %37  }
  0x7d   :  { %34 = vst.msk [vmem:[#allocation0] sm:$0x1] %vm33_vm5, %v32_v12  }
  0x7e   :  { %40 = vst.msk [vmem:[#allocation0] sm:$0x1] %vm39_vm6, %v38_v13  }
  0x80   :  { %v44_v14 = vpop.permute.xlu0 %43  }
  0x81   :  { %46 = vst.msk [vmem:[#allocation0] sm:$0x1] %vm45_vm7, %v44_v14  }
  0x88   :  { %v50_v15 = vld [vmem:[#allocation0] sm:$0x1] }
  0x89   :  { %52 = vst [vmem:[%s112_s1] sm:$0x1] %v50_v15 }

// kernel: tile.18
= control target key start
LH: loop header
LB: loop body
LE: loop exit
PB: predicated region body
PF: predicated region fallthrough
CT: control target
= control target key end

     0   :  { %s22_s0 = inlined_call_operand.vmem [shape: f32[3], index: 0, kind: input, shape index: {}]   ;;  %s23_s1 = inlined_call_operand.vmem [shape: f32[8,3], index: 1, kind: output, shape index: {}]  }
   0x1   :  { %v4_v0 = vld [vmem:[%s22_s0] ss:$0 sm:$0xff] }
   0x2   :  { %5 = vst [vmem:[%s23_s1] sm:$0xff] %v4_v0 }

// kernel: _lambda_.5
= control target key start
LH: loop header
LB: loop body
LE: loop exit
PB: predicated region body
PF: predicated region fallthrough
CT: control target
= control target key end

     0   :  { %s1476_s24 = smov 0   ;;  %s1799_s0 = inlined_call_operand.vmem [shape: f32[128,24], index: 0, kind: input, shape index: {}]   ;;  %s1800_s1 = inlined_call_operand.vmem [shape: bf16[128,128], index: 1, kind: input, shape index: {}]   ;;  %s1801_s2 = inlined_call_operand.vmem [shape: bf16[2,128,128], index: 2, kind: input, shape index: {}]   ;;  %s1802_s3 = inlined_call_operand.vmem [shape: bf16[24,64], index: 3, kind: input, shape index: {}]   ;;  %s1803_s4 = inlined_call_operand.vmem [shape: f32[1,64], index: 4, kind: input, shape index: {}]   ;;  %s1804_s5 = inlined_call_operand.vmem [shape: bf16[64,24], index: 5, kind: input, shape index: {}]   ;;  %s1805_s6 = inlined_call_operand.vmem [shape: f32[1,24], index: 6, kind: input, shape index: {}]   ;;  %s1806_s7 = inlined_call_operand.vmem [shape: f32[128,24], index: 7, kind: output, shape index: {}]  }
   0x1 LB: > { %s1482_s25 = sadd.s32 4294967295, %s1434_s24   ;;  %p1142_p0 = scmp.ge.s32.totalorder %s1434_s24, 1  ;;  %s1434_s24 = sphi %s1476_s24, %s17_s24  }
   0x2   : > { %p232_p1 = scmp.lt.s32.totalorder %s1434_s24, 3 }
   0x4   : > { %p233_p2 = pnand %p1142_p0, %p232_p1 }
   0x5   : > { %p259_p3 = scmp.lt.s32.totalorder (!%p233_p2), %s1482_s25, 1  ;;  %p1145_p4 = scmp.ne.s32.totalorder (!%p233_p2), %s1482_s25, 0 }
   0x6   : > { %236 = sbr.rel (%p233_p2) target bundleno = 1030 (0x406), region = 48 }
   0xd   : > { %s260_s26 = scalar_select %p259_p3, %s1482_s25, 1 }
   0xe   : > { %268 = sbr.rel (%p1145_p4) target bundleno = 255 (0xff), region = 52  ;;  %v1374_v0 = vld [vmem:[%s1802_s3] sm:$0xff] (!%p1145_p4)   ;;  %v1375_v1 = vld [vmem:[%s1802_s3 + $0x8] ss:$0 sps:$4 sm:$0xff] (!%p1145_p4)   ;;  %vm337_vm0 = vcmask (!%p1145_p4), 1043456   ;;  %vm312_vm1 = vcmask (!%p1145_p4), 195584  }
   0xf   : > { %s1189_s27 = sshll.u32 %s260_s26, 6  ;;  %v269_v2 = vld [vmem:[%s1799_s0] sm:$0xff] (!%p1145_p4)  ;;  %1244 = vmatprep.subr.bf16.mxu0 (!%p1145_p4), %v1374_v0  ;;  %1352 = vmatprep.subr.bf16.mxu1 (!%p1145_p4), %v1374_v0  ;;  %v270_v3 = vld [vmem:[%s1799_s0 + $0x8] sm:$0xff] (!%p1145_p4)  ;;  %v271_v8 = vld [vmem:[%s1799_s0 + $0x10] sm:$0xff] (!%p1145_p4)  ;;  %v339_v11 = vsel (!%p1145_p4), %vm337_vm0, %v1375_v1, 0  ;;  %vm486_vm2 = vcmask (!%p1145_p4), 523264  }
  0x10   : > { %s1491_s30 = scalar_lea.vmem %s1801_s2, %s1189_s27  ;;  %v277_v4 = vld [vmem:[%s1799_s0 + $0x40] sm:$0xff] (!%p1145_p4)  ;;  %v278_v5 = vld [vmem:[%s1799_s0 + $0x48] sm:$0xff] (!%p1145_p4)  ;;  %1245 = vmatpush3.bf16.msra.mxu0 (!%p1145_p4), %v1374_v0  ;;  %1354 = vmatpush3.bf16.msra.mxu1 (!%p1145_p4), %v1374_v0  ;;  %v285_v6 = vpack.c.bf16 (!%p1145_p4), %v270_v3, %v269_v2  ;;  %v272_v9 = vld [vmem:[%s1799_s0 + $0x18] sm:$0xff] (!%p1145_p4) }
  0x11   : > { %v289_v7 = vpack.c.bf16 (!%p1145_p4), %v278_v5, %v277_v4  ;;  %v279_v10 = vld [vmem:[%s1799_s0 + $0x50] sm:$0xff] (!%p1145_p4)  ;;  %1364 = vmatprep.subr.msk.bf16.mxu0 (!%p1145_p4), %vm337_vm0, %v1375_v1  ;;  %1365 = vmatprep.subr.msk.bf16.mxu1 (!%p1145_p4), %vm337_vm0, %v1375_v1  ;;  %v280_v12 = vld [vmem:[%s1799_s0 + $0x58] sm:$0xff] (!%p1145_p4)  ;;  %v273_v13 = vld [vmem:[%s1799_s0 + $0x20] sm:$0xff] (!%p1145_p4)  ;;  %v286_v17 = vpack.c.bf16 (!%p1145_p4), %v272_v9, %v271_v8 }
  0x12   : > { %v274_v14 = vld [vmem:[%s1799_s0 + $0x28] sm:$0xff] (!%p1145_p4)  ;;  %1248 = vmatprep.mubr.msk.bf16.mxu0 (!%p1145_p4), %vm312_vm1, %v285_v6  ;;  %v281_v15 = vld [vmem:[%s1799_s0 + $0x60] sm:$0xff] (!%p1145_p4)  ;;  %v290_v18 = vpack.c.bf16 (!%p1145_p4), %v280_v12, %v279_v10  ;;  %v275_v21 = vld [vmem:[%s1799_s0 + $0x30] sm:$0xff] (!%p1145_p4) }
  0x13   : > { %1256 = vmatprep.mubr.msk.bf16.mxu1 (!%p1145_p4), %vm312_vm1, %v289_v7  ;;  %v282_v16 = vld [vmem:[%s1799_s0 + $0x68] sm:$0xff] (!%p1145_p4)  ;;  %v287_v19 = vpack.c.bf16 (!%p1145_p4), %v274_v14, %v273_v13  ;;  %v276_v22 = vld [vmem:[%s1799_s0 + $0x38] sm:$0xff] (!%p1145_p4)  ;;  %v283_v23 = vld [vmem:[%s1799_s0 + $0x70] sm:$0xff] (!%p1145_p4) }
  0x14   : > { %1247 = vmatpush3.bf16.msra.mxu0 (!%p1145_p4), %v339_v11  ;;  %1355 = vmatpush3.bf16.msra.mxu1 (!%p1145_p4), %v339_v11  ;;  %v291_v20 = vpack.c.bf16 (!%p1145_p4), %v282_v16, %v281_v15  ;;  %v284_v24 = vld [vmem:[%s1799_s0 + $0x78] sm:$0xff] (!%p1145_p4)  ;;  %v288_v25 = vpack.c.bf16 (!%p1145_p4), %v276_v22, %v275_v21  ;;  %v1562_v27 = vld [vmem:[%s1803_s4] ss:$0 sm:$0xff] (!%p1145_p4) }
  0x15   : > { %v292_v26 = vpack.c.bf16 %v284_v24, %v283_v23 }
  0x17   : > { %1249 = vmatmul.mubr.msk.bf16.vlgmr.msra.gmra.mrb[0].mxu0 %vm312_vm1, %v286_v17  ;;  %1257 = vmatmul.mubr.msk.bf16.vlgmr.msra.gmra.mrb[0].mxu1 %vm312_vm1, %v290_v18 }
  0x18   : > { %1252 = vmatprep.mubr.msk.bf16.mxu0 %vm312_vm1, %v287_v19  ;;  %1260 = vmatprep.mubr.msk.bf16.mxu1 %vm312_vm1, %v291_v20 }
  0x1f   : > { %1253 = vmatmul.mubr.msk.bf16.gmra.mrb[4].mxu0 %vm312_vm1, %v288_v25  ;;  %1261 = vmatmul.mubr.msk.bf16.gmra.mrb[4].mxu1 %vm312_vm1, %v292_v26 }
  0xea   : > { %v1250_v28 = vpop.f32.mrb[0].mxu0  ;;  %v1258_v29 = vpop.f32.mrb[0].mxu1 }
  0xeb   : > { %v384_v30 = vadd.f32 %v1250_v28, %v1562_v27  ;;  %v416_v31 = vadd.f32 %v1258_v29, %v1562_v27  ;;  %v375_v32 = vpop.f32.mrb[1].mxu0  ;;  %v407_v33 = vpop.f32.mrb[1].mxu1 }
  0xec   : > { %v376_v34 = vadd.f32 %v1562_v27, %v375_v32  ;;  %v408_v35 = vadd.f32 %v1562_v27, %v407_v33  ;;  %v1251_v36 = vpop.f32.mrb[2].mxu0  ;;  %v1259_v37 = vpop.f32.mrb[2].mxu1 }
  0xed   : > { %vm440_vm3 = vcmp.ge.f32.partialorder %v384_v30, 0.0  ;;  %v456_v38 = vmul.f32 0.01, %v384_v30  ;;  %vm448_vm4 = vcmp.ge.f32.partialorder %v416_v31, 0.0  ;;  %v464_v39 = vmul.f32 0.01, %v416_v31 }
  0xee   : > { %vm438_vm5 = vcmp.ge.f32.partialorder %v376_v34, 0.0  ;;  %v454_v40 = vmul.f32 0.01, %v376_v34  ;;  %vm446_vm6 = vcmp.ge.f32.partialorder %v408_v35, 0.0  ;;  %v462_v41 = vmul.f32 0.01, %v408_v35 }
  0xef   : > { %v472_v42 = vsel %vm440_vm3, %v384_v30, %v456_v38  ;;  %v480_v43 = vsel %vm448_vm4, %v416_v31, %v464_v39  ;;  %v387_v44 = vadd.f32 %v1251_v36, %v1562_v27  ;;  %v419_v45 = vadd.f32 %v1259_v37, %v1562_v27  ;;  %v378_v46 = vpop.f32.mrb[3].mxu0  ;;  %v410_v47 = vpop.f32.mrb[3].mxu1 }
  0xf0   : > { %489 = vst.msk [vmem:[#allocation2 + $0x10] sm:$0xff] %vm486_vm2, %v472_v42  ;;  %497 = vst.msk [vmem:[#allocation2 + $0x50] sm:$0xff] %vm486_vm2, %v480_v43  ;;  %v470_v48 = vsel %vm438_vm5, %v376_v34, %v454_v40  ;;  %v478_v49 = vsel %vm446_vm6, %v408_v35, %v462_v41  ;;  %v379_v50 = vadd.f32 %v1562_v27, %v378_v46 }
  0xf1   : > { %v411_v51 = vadd.f32 %v1562_v27, %v410_v47  ;;  %487 = vst.msk [vmem:[#allocation2] sm:$0xff] %vm486_vm2, %v470_v48  ;;  %495 = vst.msk [vmem:[#allocation2 + $0x40] sm:$0xff] %vm486_vm2, %v478_v49  ;;  %vm441_vm7 = vcmp.ge.f32.partialorder %v387_v44, 0.0  ;;  %v457_v52 = vmul.f32 0.01, %v387_v44  ;;  %vm449_vm8 = vcmp.ge.f32.partialorder %v419_v45, 0.0 }
  0xf2   : > { %v465_v53 = vmul.f32 0.01, %v419_v45  ;;  %vm439_vm9 = vcmp.ge.f32.partialorder %v379_v50, 0.0  ;;  %v455_v54 = vmul.f32 0.01, %v379_v50  ;;  %v1254_v58 = vpop.f32.mrb[4].mxu0 }
  0xf3   : > { %vm447_vm10 = vcmp.ge.f32.partialorder %v411_v51, 0.0  ;;  %v463_v55 = vmul.f32 0.01, %v411_v51  ;;  %v473_v56 = vsel %vm441_vm7, %v387_v44, %v457_v52  ;;  %v1262_v59 = vpop.f32.mrb[4].mxu1  ;;  %v400_v62 = vadd.f32 %v1254_v58, %v1562_v27  ;;  %v391_v0 = vpop.f32.mrb[5].mxu0 }
  0xf4   : > { %v481_v57 = vsel %vm449_vm8, %v419_v45, %v465_v53  ;;  %490 = vst.msk [vmem:[#allocation2 + $0x18] sm:$0xff] %vm486_vm2, %v473_v56  ;;  %v471_v60 = vsel %vm439_vm9, %v379_v50, %v455_v54  ;;  %v432_v63 = vadd.f32 %v1262_v59, %v1562_v27  ;;  %v423_v1 = vpop.f32.mrb[5].mxu1  ;;  %v392_v2 = vadd.f32 %v1562_v27, %v391_v0  ;;  %v1255_v4 = vpop.f32.mrb[6].mxu0 }
  0xf5   : > { %498 = vst.msk [vmem:[#allocation2 + $0x58] sm:$0xff] %vm486_vm2, %v481_v57  ;;  %v479_v61 = vsel %vm447_vm10, %v411_v51, %v463_v55  ;;  %488 = vst.msk [vmem:[#allocation2 + $0x8] sm:$0xff] %vm486_vm2, %v471_v60  ;;  %v424_v3 = vadd.f32 %v1562_v27, %v423_v1  ;;  %v1263_v5 = vpop.f32.mrb[6].mxu1  ;;  %vm444_vm11 = vcmp.ge.f32.partialorder %v400_v62, 0.0  ;;  %v460_v6 = vmul.f32 0.01, %v400_v62 }
  0xf6   : > { %496 = vst.msk [vmem:[#allocation2 + $0x48] sm:$0xff] %vm486_vm2, %v479_v61  ;;  %vm452_vm12 = vcmp.ge.f32.partialorder %v432_v63, 0.0  ;;  %v468_v7 = vmul.f32 0.01, %v432_v63  ;;  %vm442_vm13 = vcmp.ge.f32.partialorder %v392_v2, 0.0  ;;  %v403_v12 = vadd.f32 %v1255_v4, %v1562_v27  ;;  %v394_v14 = vpop.f32.mrb[7].mxu0 }
  0xf7   : > { %v458_v8 = vmul.f32 0.01, %v392_v2  ;;  %vm450_vm14 = vcmp.ge.f32.partialorder %v424_v3, 0.0  ;;  %v466_v9 = vmul.f32 0.01, %v424_v3  ;;  %v476_v10 = vsel %vm444_vm11, %v400_v62, %v460_v6  ;;  %v426_v15 = vpop.f32.mrb[7].mxu1 }
  0xf8   : > { %v484_v11 = vsel %vm452_vm12, %v432_v63, %v468_v7  ;;  %v435_v13 = vadd.f32 %v1263_v5, %v1562_v27  ;;  %493 = vst.msk [vmem:[#allocation2 + $0x30] sm:$0xff] %vm486_vm2, %v476_v10  ;;  %v395_v18 = vadd.f32 %v1562_v27, %v394_v14  ;;  %v427_v19 = vadd.f32 %v1562_v27, %v426_v15 }
  0xf9   : > { %501 = vst.msk [vmem:[#allocation2 + $0x70] sm:$0xff] %vm486_vm2, %v484_v11  ;;  %v474_v16 = vsel %vm442_vm13, %v392_v2, %v458_v8  ;;  %v482_v17 = vsel %vm450_vm14, %v424_v3, %v466_v9  ;;  %vm445_vm15 = vcmp.ge.f32.partialorder %v403_v12, 0.0  ;;  %v461_v20 = vmul.f32 0.01, %v403_v12 }
  0xfa   : > { %491 = vst.msk [vmem:[#allocation2 + $0x20] sm:$0xff] %vm486_vm2, %v474_v16  ;;  %499 = vst.msk [vmem:[#allocation2 + $0x60] sm:$0xff] %vm486_vm2, %v482_v17  ;;  %vm453_vm0 = vcmp.ge.f32.partialorder %v435_v13, 0.0  ;;  %v469_v21 = vmul.f32 0.01, %v435_v13  ;;  %vm443_vm1 = vcmp.ge.f32.partialorder %v395_v18, 0.0 }
  0xfb   : > { %v459_v22 = vmul.f32 0.01, %v395_v18  ;;  %vm451_vm3 = vcmp.ge.f32.partialorder %v427_v19, 0.0  ;;  %v467_v23 = vmul.f32 0.01, %v427_v19  ;;  %v477_v24 = vsel %vm445_vm15, %v403_v12, %v461_v20 }
  0xfc   : > { %v485_v25 = vsel %vm453_vm0, %v435_v13, %v469_v21  ;;  %494 = vst.msk [vmem:[#allocation2 + $0x38] sm:$0xff] %vm486_vm2, %v477_v24 }
  0xfd   : > { %502 = vst.msk [vmem:[#allocation2 + $0x78] sm:$0xff] %vm486_vm2, %v485_v25  ;;  %v475_v26 = vsel %vm443_vm1, %v395_v18, %v459_v22  ;;  %v483_v27 = vsel %vm451_vm3, %v427_v19, %v467_v23 }
  0xfe   : > { %492 = vst.msk [vmem:[#allocation2 + $0x28] sm:$0xff] %vm486_vm2, %v475_v26  ;;  %500 = vst.msk [vmem:[#allocation2 + $0x68] sm:$0xff] %vm486_vm2, %v483_v27 }
  0xff PF: > { %v1596_v28 = vld [vmem:[#allocation2] sm:$0xff]  ;;  %v1598_v29 = vld [vmem:[#allocation2 + $0x8] sm:$0xff]  ;;  %v1600_v30 = vld [vmem:[#allocation2 + $0x10] sm:$0xff]  ;;  %vm889_vm2 = vcmask 523264   ;;  %p1173_p5 = scmp.ne.s32.totalorder %s1482_s25, 1 }
 0x100   : > { %v551_v31 = vpack.c.bf16 %v1598_v29, %v1596_v28  ;;  %v1604_v32 = vld [vmem:[#allocation2 + $0x18] sm:$0xff]  ;;  %v1612_v36 = vld [vmem:[#allocation2 + $0x30] sm:$0xff]  ;;  %v1376_v39 = vld [vmem:[%s1491_s30] sm:$0xff]   ;;  %vm1094_vm4 = vcmask (!%p1173_p5), 195584  }
 0x101   : > { %v552_v33 = vpack.c.bf16 %v1604_v32, %v1600_v30  ;;  %v1608_v34 = vld [vmem:[#allocation2 + $0x20] sm:$0xff]  ;;  %1280 = vmatprep.mubr.bf16.mxu0 %v1376_v39  ;;  %v1623_v42 = vld [vmem:[#allocation2 + $0x48] sm:$0xff]  ;;  %v1625_v43 = vld [vmem:[#allocation2 + $0x50] sm:$0xff] }
 0x102   : > { %1264 = vmatprep.subr.bf16.mxu0 %v551_v31  ;;  %v1621_v41 = vld [vmem:[#allocation2 + $0x40] sm:$0xff]  ;;  %v1629_v45 = vld [vmem:[#allocation2 + $0x58] sm:$0xff]  ;;  %v1639_v50 = vld [vmem:[#allocation2 + $0x70] sm:$0xff] }
 0x103   : > { %1265 = vmatpush3.bf16.msra.mxu0 %v551_v31  ;;  %v1616_v38 = vld [vmem:[#allocation2 + $0x38] sm:$0xff]  ;;  %v555_v44 = vpack.c.bf16 %v1623_v42, %v1621_v41  ;;  %v1631_v46 = vld [vmem:[#allocation2 + $0x60] sm:$0xff]  ;;  %v556_v47 = vpack.c.bf16 %v1629_v45, %v1625_v43  ;;  %v1377_v53 = vld [vmem:[%s1491_s30 + $0x8] sm:$0xff]  }
 0x104   : > { %1266 = vmatprep.subr.bf16.mxu0 %v552_v33  ;;  %v554_v40 = vpack.c.bf16 %v1616_v38, %v1612_v36  ;;  %v1641_v51 = vld [vmem:[#allocation2 + $0x78] sm:$0xff]  ;;  %v1378_v54 = vld [vmem:[%s1491_s30 + $0x10] sm:$0xff]   ;;  %v1380_v56 = vld [vmem:[%s1491_s30 + $0x20] sm:$0xff]  }
 0x105   : > { %v1610_v35 = vld [vmem:[#allocation2 + $0x28] sm:$0xff]  ;;  %v558_v52 = vpack.c.bf16 %v1641_v51, %v1639_v50  ;;  %v1379_v55 = vld [vmem:[%s1491_s30 + $0x18] sm:$0xff]   ;;  %v1382_v58 = vld [vmem:[%s1491_s30 + $0x30] sm:$0xff]  }
 0x106   : > { %v553_v37 = vpack.c.bf16 %v1610_v35, %v1608_v34  ;;  %v1635_v48 = vld [vmem:[#allocation2 + $0x68] sm:$0xff]  ;;  %v1383_v59 = vld [vmem:[%s1491_s30 + $0x38] sm:$0xff]   ;;  %v1384_v60 = vld [vmem:[%s1800_s1] sm:$0xff]  }
 0x107   : > { %1267 = vmatpush3.bf16.msra.mxu0 %v552_v33  ;;  %v557_v49 = vpack.c.bf16 %v1635_v48, %v1631_v46  ;;  %v1381_v57 = vld [vmem:[%s1491_s30 + $0x28] sm:$0xff]   ;;  %1312 = vmatprep.mubr.bf16.mxu1 %v1384_v60  ;;  %v1386_v22 = vld [vmem:[%s1800_s1 + $0x10] sm:$0xff]   ;;  %v1387_v23 = vld [vmem:[%s1800_s1 + $0x18] sm:$0xff]  }
 0x108   : > { %1268 = vmatprep.subr.bf16.mxu0 %v553_v37  ;;  %v1385_v21 = vld [vmem:[%s1800_s1 + $0x8] sm:$0xff]   ;;  %v1388_v24 = vld [vmem:[%s1800_s1 + $0x20] sm:$0xff]   ;;  %v1390_v26 = vld [vmem:[%s1800_s1 + $0x30] sm:$0xff]  }
 0x109   : > { %v1389_v25 = vld [vmem:[%s1800_s1 + $0x28] sm:$0xff]   ;;  %v1391_v27 = vld [vmem:[%s1800_s1 + $0x38] sm:$0xff]  }
 0x10b   : > { %1269 = vmatpush3.bf16.msra.mxu0 %v553_v37 }
 0x10c   : > { %1270 = vmatprep.subr.bf16.mxu0 %v554_v40 }
 0x10f   : > { %1271 = vmatpush3.bf16.msra.mxu0 %v554_v40 }
 0x110   : > { %1272 = vmatprep.subr.bf16.mxu0 %v555_v44 }
 0x113   : > { %1273 = vmatpush3.bf16.msra.mxu0 %v555_v44 }
 0x114   : > { %1274 = vmatprep.subr.bf16.mxu0 %v556_v47 }
 0x117   : > { %1275 = vmatpush3.bf16.msra.mxu0 %v556_v47 }
 0x118   : > { %1276 = vmatprep.subr.bf16.mxu0 %v557_v49 }
 0x11b   : > { %1277 = vmatpush3.bf16.msra.mxu0 %v557_v49 }
 0x11c   : > { %1278 = vmatprep.subr.bf16.mxu0 %v558_v52 }
 0x11f   : > { %1279 = vmatpush3.bf16.msra.mxu0 %v558_v52 }
 0x122   : > { %1281 = vmatmul.mubr.bf16.vlgmr.msra.gmra.mrb[0].mxu0 %v1377_v53 }
 0x123   : > { %1284 = vmatprep.mubr.bf16.mxu0 %v1378_v54 }
 0x12a   : > { %1285 = vmatmul.mubr.bf16.gmra.mrb[4].mxu0 %v1379_v55 }
 0x12b   : > { %1288 = vmatprep.mubr.bf16.mxu0 %v1380_v56 }
 0x132   : > { %1289 = vmatmul.mubr.bf16.gmra.mrb[8].mxu0 %v1381_v57 }
 0x133   : > { %1292 = vmatprep.mubr.bf16.mxu0 %v1382_v58 }
 0x13a   : > { %1293 = vmatmul.mubr.bf16.gmra.mrb[12].mxu0 %v1383_v59 }
 0x1f5   : > { %v1282_v61 = vpop.f32.mrb[0].mxu0 }
 0x1f6   : > { %v641_v62 = vpop.f32.mrb[1].mxu0 }
 0x1f7   : > { %v1283_v63 = vpop.f32.mrb[2].mxu0 }
 0x1f8   : > { %v705_v0 = vpack.c.bf16 %v1283_v63, %v1282_v61  ;;  %v644_v1 = vpop.f32.mrb[3].mxu0 }
 0x1f9   : > { %v704_v2 = vpack.c.bf16 %v644_v1, %v641_v62 }
 0x1fb   : > { %1296 = vmatprep.subr.bf16.mxu1 %v704_v2 }
 0x1fc   : > { %1297 = vmatpush3.bf16.msra.mxu1 %v704_v2 }
 0x1fd   : > { %v1286_v3 = vpop.f32.mrb[4].mxu0  ;;  %1298 = vmatprep.subr.bf16.mxu1 %v705_v0 }
 0x1fe   : > { %v657_v4 = vpop.f32.mrb[5].mxu0 }
 0x1ff   : > { %v1287_v5 = vpop.f32.mrb[6].mxu0 }
 0x200   : > { %v707_v6 = vpack.c.bf16 %v1287_v5, %v1286_v3  ;;  %v660_v7 = vpop.f32.mrb[7].mxu0  ;;  %1299 = vmatpush3.bf16.msra.mxu1 %v705_v0 }
 0x201   : > { %v706_v8 = vpack.c.bf16 %v660_v7, %v657_v4 }
 0x203   : > { %1300 = vmatprep.subr.bf16.mxu1 %v706_v8 }
 0x204   : > { %1301 = vmatpush3.bf16.msra.mxu1 %v706_v8 }
 0x205   : > { %v1290_v9 = vpop.f32.mrb[8].mxu0  ;;  %1302 = vmatprep.subr.bf16.mxu1 %v707_v6 }
 0x206   : > { %v673_v10 = vpop.f32.mrb[9].mxu0 }
 0x207   : > { %v1291_v11 = vpop.f32.mrb[10].mxu0 }
 0x208   : > { %v709_v12 = vpack.c.bf16 %v1291_v11, %v1290_v9  ;;  %v676_v13 = vpop.f32.mrb[11].mxu0  ;;  %1303 = vmatpush3.bf16.msra.mxu1 %v707_v6 }
 0x209   : > { %v708_v14 = vpack.c.bf16 %v676_v13, %v673_v10 }
 0x20b   : > { %1304 = vmatprep.subr.bf16.mxu1 %v708_v14 }
 0x20c   : > { %1305 = vmatpush3.bf16.msra.mxu1 %v708_v14 }
 0x20d   : > { %v1294_v15 = vpop.f32.mrb[12].mxu0  ;;  %1306 = vmatprep.subr.bf16.mxu1 %v709_v12 }
 0x20e   : > { %v689_v16 = vpop.f32.mrb[13].mxu0 }
 0x20f   : > { %v1295_v17 = vpop.f32.mrb[14].mxu0 }
 0x210   : > { %v711_v18 = vpack.c.bf16 %v1295_v17, %v1294_v15  ;;  %v692_v19 = vpop.f32.mrb[15].mxu0  ;;  %1307 = vmatpush3.bf16.msra.mxu1 %v709_v12 }
 0x211   : > { %v710_v20 = vpack.c.bf16 %v692_v19, %v689_v16 }
 0x213   : > { %1308 = vmatprep.subr.bf16.mxu1 %v710_v20 }
 0x214   : > { %1309 = vmatpush3.bf16.msra.mxu1 %v710_v20 }
 0x215   : > { %1310 = vmatprep.subr.bf16.mxu1 %v711_v18 }
 0x218   : > { %1311 = vmatpush3.bf16.msra.mxu1 %v711_v18 }
 0x21b   : > { %1313 = vmatmul.mubr.bf16.vlgmr.msra.gmra.mrb[0].mxu1 %v1385_v21  ;;  %v1427_v21 = vld [vmem:[%s1804_s5 + $0x18] sm:$0xff] (!%p1173_p5)  }
 0x21c   : > { %1316 = vmatprep.mubr.bf16.mxu1 %v1386_v22 }
 0x223   : > { %1317 = vmatmul.mubr.bf16.gmra.mrb[4].mxu1 %v1387_v23 }
 0x224   : > { %1320 = vmatprep.mubr.bf16.mxu1 %v1388_v24 }
 0x22b   : > { %1321 = vmatmul.mubr.bf16.gmra.mrb[8].mxu1 %v1389_v25 }
 0x22c   : > { %1324 = vmatprep.mubr.bf16.mxu1 %v1390_v26 }
 0x233   : > { %1325 = vmatmul.mubr.bf16.gmra.mrb[12].mxu1 %v1391_v27 }
 0x2ee   : > { %v1314_v31 = vpop.f32.mrb[0].mxu1 }
 0x2ef   : > { %1392 = vtanh.f32 %v1314_v31  ;;  %v794_v33 = vpop.f32.mrb[1].mxu1 }
 0x2f0   : > { %1394 = vtanh.f32 %v794_v33  ;;  %v1315_v37 = vpop.f32.mrb[2].mxu1 }
 0x2f1   : > { %1396 = vtanh.f32 %v1315_v37  ;;  %v797_v39 = vpop.f32.mrb[3].mxu1 }
 0x2f2   : > { %1398 = vtanh.f32 %v797_v39 }
 0x2f6   : > { %v1318_v40 = vpop.f32.mrb[4].mxu1 }
 0x2f7   : > { %1400 = vtanh.f32 %v1318_v40  ;;  %v810_v44 = vpop.f32.mrb[5].mxu1 }
 0x2f8   : > { %1402 = vtanh.f32 %v810_v44  ;;  %v1319_v47 = vpop.f32.mrb[6].mxu1 }
 0x2f9   : > { %v1393_v49 = vpop.eup %1392  ;;  %1404 = vtanh.f32 %v1319_v47  ;;  %v813_v52 = vpop.f32.mrb[7].mxu1 }
 0x2fa   : > { %v1395_v53 = vpop.eup %1394  ;;  %v875_v54 = vadd.f32 %v1393_v49, %v1600_v30  ;;  %1406 = vtanh.f32 %v813_v52 }
 0x2fb   : > { %v1397_v55 = vpop.eup %1396  ;;  %v873_v56 = vadd.f32 %v1395_v53, %v1596_v28 }
 0x2fc   : > { %v1399_v57 = vpop.eup %1398  ;;  %892 = vst.msk [vmem:[#allocation2 + $0x10] sm:$0xff] %vm889_vm2, %v875_v54  ;;  %v876_v58 = vadd.f32 %v1397_v55, %v1604_v32 }
 0x2fd   : > { %890 = vst.msk [vmem:[#allocation2] sm:$0xff] %vm889_vm2, %v873_v56  ;;  %v874_v59 = vadd.f32 %v1399_v57, %v1598_v29  ;;  %v1174_v56 = vld [vmem:[%s1805_s6] ss:$0 sm:$0xff] (!%p1173_p5) }
 0x2fe   : > { %893 = vst.msk [vmem:[#allocation2 + $0x18] sm:$0xff] %vm889_vm2, %v876_v58  ;;  %v1322_v60 = vpop.f32.mrb[8].mxu1 }
 0x2ff   : > { %891 = vst.msk [vmem:[#allocation2 + $0x8] sm:$0xff] %vm889_vm2, %v874_v59  ;;  %1408 = vtanh.f32 %v1322_v60  ;;  %v826_v30 = vpop.f32.mrb[9].mxu1 }
 0x300   : > { %1410 = vtanh.f32 %v826_v30  ;;  %v1323_v61 = vpop.f32.mrb[10].mxu1 }
 0x301   : > { %v1401_v62 = vpop.eup %1400  ;;  %1412 = vtanh.f32 %v1323_v61  ;;  %v829_v28 = vpop.f32.mrb[11].mxu1 }
 0x302   : > { %v1403_v63 = vpop.eup %1402  ;;  %v879_v0 = vadd.f32 %v1401_v62, %v1612_v36  ;;  %1414 = vtanh.f32 %v829_v28 }
 0x303   : > { %v1405_v32 = vpop.eup %1404  ;;  %v877_v1 = vadd.f32 %v1403_v63, %v1608_v34  ;;  %v912_v22 = vld [vmem:[#allocation2 + $0x10] sm:$0xff] (!%p1173_p5) }
 0x304   : > { %v1407_v29 = vpop.eup %1406  ;;  %896 = vst.msk [vmem:[#allocation2 + $0x30] sm:$0xff] %vm889_vm2, %v879_v0  ;;  %v880_v2 = vadd.f32 %v1405_v32, %v1616_v38 }
 0x305   : > { %894 = vst.msk [vmem:[#allocation2 + $0x20] sm:$0xff] %vm889_vm2, %v877_v1  ;;  %v878_v3 = vadd.f32 %v1407_v29, %v1610_v35  ;;  %v913_v23 = vld [vmem:[#allocation2 + $0x18] sm:$0xff] (!%p1173_p5) }
 0x306   : > { %897 = vst.msk [vmem:[#allocation2 + $0x38] sm:$0xff] %vm889_vm2, %v880_v2  ;;  %v1326_v4 = vpop.f32.mrb[12].mxu1  ;;  %v911_v16 = vld [vmem:[#allocation2 + $0x8] sm:$0xff] (!%p1173_p5)  ;;  %v927_v37 = vpack.c.bf16 (!%p1173_p5), %v913_v23, %v912_v22 }
 0x307   : > { %895 = vst.msk [vmem:[#allocation2 + $0x28] sm:$0xff] %vm889_vm2, %v878_v3  ;;  %1416 = vtanh.f32 %v1326_v4  ;;  %v842_v36 = vpop.f32.mrb[13].mxu1 }
 0x308   : > { %1418 = vtanh.f32 %v842_v36  ;;  %v1327_v5 = vpop.f32.mrb[14].mxu1 }
 0x309   : > { %v1409_v6 = vpop.eup %1408  ;;  %1420 = vtanh.f32 %v1327_v5  ;;  %v845_v34 = vpop.f32.mrb[15].mxu1 }
 0x30a   : > { %v1411_v7 = vpop.eup %1410  ;;  %v883_v8 = vadd.f32 %v1409_v6, %v1625_v43  ;;  %1422 = vtanh.f32 %v845_v34 }
 0x30b   : > { %v1413_v38 = vpop.eup %1412  ;;  %v881_v9 = vadd.f32 %v1411_v7, %v1621_v41  ;;  %v916_v47 = vld [vmem:[#allocation2 + $0x30] sm:$0xff] (!%p1173_p5) }
 0x30c   : > { %v1415_v35 = vpop.eup %1414  ;;  %900 = vst.msk [vmem:[#allocation2 + $0x50] sm:$0xff] %vm889_vm2, %v883_v8  ;;  %v884_v10 = vadd.f32 %v1413_v38, %v1629_v45  ;;  %v914_v26 = vld [vmem:[#allocation2 + $0x20] sm:$0xff] (!%p1173_p5) }
 0x30d   : > { %898 = vst.msk [vmem:[#allocation2 + $0x40] sm:$0xff] %vm889_vm2, %v881_v9  ;;  %v882_v11 = vadd.f32 %v1415_v35, %v1623_v42  ;;  %v917_v49 = vld [vmem:[#allocation2 + $0x38] sm:$0xff] (!%p1173_p5) }
 0x30e   : > { %901 = vst.msk [vmem:[#allocation2 + $0x58] sm:$0xff] %vm889_vm2, %v884_v10  ;;  %v915_v27 = vld [vmem:[#allocation2 + $0x28] sm:$0xff] (!%p1173_p5)  ;;  %v929_v54 = vpack.c.bf16 (!%p1173_p5), %v917_v49, %v916_v47 }
 0x30f   : > { %899 = vst.msk [vmem:[#allocation2 + $0x48] sm:$0xff] %vm889_vm2, %v882_v11  ;;  %v928_v40 = vpack.c.bf16 (!%p1173_p5), %v915_v27, %v914_v26 }
 0x311   : > { %v1417_v12 = vpop.eup %1416  ;;  %909 = sbr.rel (%p1173_p5) target bundleno = 1030 (0x406), region = 56 }
 0x312   : > { %v1419_v13 = vpop.eup %1418  ;;  %v887_v43 = vadd.f32 %v1417_v12, %v1639_v50  ;;  %v1425_v50 = vld [vmem:[%s1804_s5 + $0x8] sm:$0xff] (!%p1173_p5)  }
 0x313   : > { %v1421_v14 = vpop.eup %1420  ;;  %v885_v41 = vadd.f32 %v1419_v13, %v1631_v46  ;;  %v1424_v46 = vld [vmem:[%s1804_s5] sm:$0xff] (!%p1173_p5)   ;;  %v920_v24 = vld [vmem:[#allocation2 + $0x50] sm:$0xff] (!%p1173_p5) }
 0x314   : > { %v1423_v15 = vpop.eup %1422  ;;  %904 = vst.msk [vmem:[#allocation2 + $0x70] sm:$0xff] %vm889_vm2, %v887_v43  ;;  %v888_v45 = vadd.f32 %v1421_v14, %v1641_v51  ;;  %1328 = vmatprep.subr.bf16.mxu0 (!%p1173_p5), %v1424_v46  ;;  %1356 = vmatprep.subr.bf16.mxu1 (!%p1173_p5), %v1424_v46  ;;  %v910_v51 = vld [vmem:[#allocation2] sm:$0xff] (!%p1173_p5) }
 0x315   : > { %902 = vst.msk [vmem:[#allocation2 + $0x60] sm:$0xff] %vm889_vm2, %v885_v41  ;;  %v886_v42 = vadd.f32 %v1423_v15, %v1635_v48  ;;  %1329 = vmatpush3.bf16.msra.mxu0 (!%p1173_p5), %v1424_v46  ;;  %1360 = vmatpush3.bf16.msra.mxu1 (!%p1173_p5), %v1424_v46  ;;  %v1426_v48 = vld [vmem:[%s1804_s5 + $0x10] sm:$0xff] (!%p1173_p5)   ;;  %v918_v17 = vld [vmem:[#allocation2 + $0x40] sm:$0xff] (!%p1173_p5)  ;;  %v926_v18 = vpack.c.bf16 (!%p1173_p5), %v911_v16, %v910_v51  ;;  %v921_v25 = vld [vmem:[#allocation2 + $0x58] sm:$0xff] (!%p1173_p5) }
 0x316   : > { %905 = vst.msk [vmem:[#allocation2 + $0x78] sm:$0xff] %vm889_vm2, %v888_v45  ;;  %1330 = vmatprep.subr.bf16.mxu0 (!%p1173_p5), %v1425_v50  ;;  %1357 = vmatprep.subr.bf16.mxu1 (!%p1173_p5), %v1425_v50  ;;  %v919_v19 = vld [vmem:[#allocation2 + $0x48] sm:$0xff] (!%p1173_p5)  ;;  %v931_v39 = vpack.c.bf16 (!%p1173_p5), %v921_v25, %v920_v24 }
 0x317   : > { %903 = vst.msk [vmem:[#allocation2 + $0x68] sm:$0xff] %vm889_vm2, %v886_v42  ;;  %v930_v20 = vpack.c.bf16 (!%p1173_p5), %v919_v19, %v918_v17  ;;  %1336 = vmatprep.mubr.msk.bf16.mxu0 (!%p1173_p5), %vm889_vm2, %v926_v18 }
 0x319   : > { %1331 = vmatpush3.bf16.msra.mxu0 %v1425_v50  ;;  %1361 = vmatpush3.bf16.msra.mxu1 %v1425_v50 }
 0x31a   : > { %1332 = vmatprep.subr.bf16.mxu0 %v1426_v48  ;;  %1358 = vmatprep.subr.bf16.mxu1 %v1426_v48 }
 0x31b   : > { %1344 = vmatprep.mubr.msk.bf16.mxu1 %vm889_vm2, %v930_v20  ;;  %v924_v52 = vld [vmem:[#allocation2 + $0x70] sm:$0xff] }
 0x31c   : > { %v922_v31 = vld [vmem:[#allocation2 + $0x60] sm:$0xff] }
 0x31d   : > { %1333 = vmatpush3.bf16.msra.mxu0 %v1426_v48  ;;  %1362 = vmatpush3.bf16.msra.mxu1 %v1426_v48  ;;  %v925_v53 = vld [vmem:[#allocation2 + $0x78] sm:$0xff] }
 0x31e   : > { %1334 = vmatprep.subr.bf16.mxu0 %v1427_v21  ;;  %1359 = vmatprep.subr.bf16.mxu1 %v1427_v21  ;;  %v923_v33 = vld [vmem:[#allocation2 + $0x68] sm:$0xff]  ;;  %v933_v55 = vpack.c.bf16 %v925_v53, %v924_v52 }
 0x31f   : > { %v932_v44 = vpack.c.bf16 %v923_v33, %v922_v31 }
 0x321   : > { %1335 = vmatpush3.bf16.msra.mxu0 %v1427_v21  ;;  %1363 = vmatpush3.bf16.msra.mxu1 %v1427_v21 }
 0x324   : > { %1337 = vmatmul.mubr.msk.bf16.vlgmr.msra.gmra.mrb[0].mxu0 %vm889_vm2, %v927_v37  ;;  %1345 = vmatmul.mubr.msk.bf16.vlgmr.msra.gmra.mrb[0].mxu1 %vm889_vm2, %v931_v39 }
 0x325   : > { %1340 = vmatprep.mubr.msk.bf16.mxu0 %vm889_vm2, %v928_v40  ;;  %1348 = vmatprep.mubr.msk.bf16.mxu1 %vm889_vm2, %v932_v44 }
 0x32c   : > { %1341 = vmatmul.mubr.msk.bf16.gmra.mrb[4].mxu0 %vm889_vm2, %v929_v54  ;;  %1349 = vmatmul.mubr.msk.bf16.gmra.mrb[4].mxu1 %vm889_vm2, %v933_v55 }
 0x3f7   : > { %v1338_v57 = vpop.f32.mrb[0].mxu0  ;;  %v1346_v58 = vpop.f32.mrb[0].mxu1 }
 0x3f8   : > { %v1040_v59 = vadd.f32 %v1338_v57, %v1174_v56  ;;  %v1072_v60 = vadd.f32 %v1346_v58, %v1174_v56  ;;  %v1031_v30 = vpop.f32.mrb[1].mxu0  ;;  %v1063_v61 = vpop.f32.mrb[1].mxu1 }
 0x3f9   : > { %v1032_v62 = vadd.f32 %v1174_v56, %v1031_v30  ;;  %v1064_v28 = vadd.f32 %v1174_v56, %v1063_v61  ;;  %v1339_v63 = vpop.f32.mrb[2].mxu0  ;;  %v1347_v0 = vpop.f32.mrb[2].mxu1 }
 0x3fa   : > { %1097 = vst.msk [vmem:[%s1806_s7 + $0x10] sm:$0xff] %vm1094_vm4, %v1040_v59  ;;  %1105 = vst.msk [vmem:[%s1806_s7 + $0x50] sm:$0xff] %vm1094_vm4, %v1072_v60  ;;  %v1043_v32 = vadd.f32 %v1339_v63, %v1174_v56  ;;  %v1075_v1 = vadd.f32 %v1347_v0, %v1174_v56  ;;  %v1034_v29 = vpop.f32.mrb[3].mxu0  ;;  %v1066_v2 = vpop.f32.mrb[3].mxu1 }
 0x3fb   : > { %1095 = vst.msk [vmem:[%s1806_s7] sm:$0xff] %vm1094_vm4, %v1032_v62  ;;  %1103 = vst.msk [vmem:[%s1806_s7 + $0x40] sm:$0xff] %vm1094_vm4, %v1064_v28  ;;  %v1035_v3 = vadd.f32 %v1174_v56, %v1034_v29  ;;  %v1067_v4 = vadd.f32 %v1174_v56, %v1066_v2 }
 0x3fc   : > { %1098 = vst.msk [vmem:[%s1806_s7 + $0x18] sm:$0xff] %vm1094_vm4, %v1043_v32  ;;  %1106 = vst.msk [vmem:[%s1806_s7 + $0x58] sm:$0xff] %vm1094_vm4, %v1075_v1 }
 0x3fd   : > { %1096 = vst.msk [vmem:[%s1806_s7 + $0x8] sm:$0xff] %vm1094_vm4, %v1035_v3  ;;  %1104 = vst.msk [vmem:[%s1806_s7 + $0x48] sm:$0xff] %vm1094_vm4, %v1067_v4 }
 0x3ff   : > { %v1342_v36 = vpop.f32.mrb[4].mxu0  ;;  %v1350_v5 = vpop.f32.mrb[4].mxu1 }
 0x400   : > { %v1056_v6 = vadd.f32 %v1342_v36, %v1174_v56  ;;  %v1088_v34 = vadd.f32 %v1350_v5, %v1174_v56  ;;  %v1047_v7 = vpop.f32.mrb[5].mxu0  ;;  %v1079_v8 = vpop.f32.mrb[5].mxu1 }
 0x401   : > { %v1048_v38 = vadd.f32 %v1174_v56, %v1047_v7  ;;  %v1080_v9 = vadd.f32 %v1174_v56, %v1079_v8  ;;  %v1343_v35 = vpop.f32.mrb[6].mxu0  ;;  %v1351_v10 = vpop.f32.mrb[6].mxu1 }
 0x402   : > { %1101 = vst.msk [vmem:[%s1806_s7 + $0x30] sm:$0xff] %vm1094_vm4, %v1056_v6  ;;  %1109 = vst.msk [vmem:[%s1806_s7 + $0x70] sm:$0xff] %vm1094_vm4, %v1088_v34  ;;  %v1059_v11 = vadd.f32 %v1343_v35, %v1174_v56  ;;  %v1091_v12 = vadd.f32 %v1351_v10, %v1174_v56  ;;  %v1050_v13 = vpop.f32.mrb[7].mxu0  ;;  %v1082_v43 = vpop.f32.mrb[7].mxu1 }
 0x403   : > { %1099 = vst.msk [vmem:[%s1806_s7 + $0x20] sm:$0xff] %vm1094_vm4, %v1048_v38  ;;  %1107 = vst.msk [vmem:[%s1806_s7 + $0x60] sm:$0xff] %vm1094_vm4, %v1080_v9  ;;  %v1051_v14 = vadd.f32 %v1174_v56, %v1050_v13  ;;  %v1083_v41 = vadd.f32 %v1174_v56, %v1082_v43 }
 0x404   : > { %1102 = vst.msk [vmem:[%s1806_s7 + $0x38] sm:$0xff] %vm1094_vm4, %v1059_v11  ;;  %1110 = vst.msk [vmem:[%s1806_s7 + $0x78] sm:$0xff] %vm1094_vm4, %v1091_v12 }
 0x405   : > { %1100 = vst.msk [vmem:[%s1806_s7 + $0x28] sm:$0xff] %vm1094_vm4, %v1051_v14  ;;  %1108 = vst.msk [vmem:[%s1806_s7 + $0x68] sm:$0xff] %vm1094_vm4, %v1083_v41 }
 0x406 PF: > { %s17_s24 = sadd.s32 1, %s1434_s24  }
 0x407   : > { %p14_p6 = scmp.ge.s32.totalorder %s17_s24, 4  }
 0x409   :  { %16 = sbr.rel (!%p14_p6) target bundleno = 1 (0x1), region = 82 }

</bundles_post_ra>
